<compile_context>
chip_gen: v5e
topology: v5e:2x2
jax: 0.10.0
libtpu: 0.0.40
codegen_flags: <defaults>
</compile_context>

<pallas_src>
import math
import jax
import jax.numpy as jnp
from jax import lax
from jax.experimental import pallas as pl
from jax.experimental.pallas import tpu as pltpu


_LANE = 128  # each projection's nclass columns padded to a 128-lane boundary


# ----------------------------------------------------------------------------- glue helpers
def _axis_interp_matrix(dst, src):
    """(dst, src) bilinear align_corners=True interpolation matrix along one axis."""
    if src == 1:
        return jnp.ones((dst, 1), jnp.float32)
    pos = (jnp.zeros((dst,), jnp.float32) if dst == 1
           else jnp.linspace(0.0, float(src - 1), dst, dtype=jnp.float32))
    lo = jnp.clip(jnp.floor(pos).astype(jnp.int32), 0, src - 1)
    hi = jnp.clip(lo + 1, 0, src - 1)
    w = (pos - lo.astype(jnp.float32))[:, None]
    return (jax.nn.one_hot(lo, src, dtype=jnp.float32) * (1.0 - w)
            + jax.nn.one_hot(hi, src, dtype=jnp.float32) * w)


def _bilinear_resize_matrix(h_src, w_src, h_dst, w_dst):
    """Right-multiply operator M (h_src*w_src, h_dst*w_dst):
       x_flat(..., h_src*w_src) @ M == F.interpolate(x, (h_dst,w_dst), 'bilinear', align_corners=True)."""
    r = _axis_interp_matrix(h_dst, h_src)          # (h_dst, h_src)
    c = _axis_interp_matrix(w_dst, w_src)          # (w_dst, w_src)
    return jnp.kron(r, c).T                        # (h_src*w_src, h_dst*w_dst)


def _multi_tensorcore_chip():
    """True for chips where the batch grid axis can be sharded across TensorCores."""
    try:
        kind = jax.devices()[0].device_kind.lower()
    except Exception:
        return False
    return any(tag in kind for tag in ("v7", "v5p", "v4"))


# ----------------------------------------------------------------------------- fused Pallas kernel
def make_corr_kernel(bb, hw, n_samples, sample_chunk):
    P = _LANE

    def corr_fused_kernel(feat_ref, w_ref, b_ref, out_ref, rin_ref, sel_ref, rout_ref,
                          corr_out_ref, mask_ref):
        # Fused twin 1x1-conv projection: one bf16 MXU matmul over all bb*hw rows,
        # f32 accumulation, f32 bias add (scale 1/sqrt(nclass) already folded into half 1).
        f = jnp.dot(feat_ref[...], w_ref[...], preferred_element_type=jnp.float32)
        f = f + b_ref[...]                                                    # (bb*hw, 2P) f32

        for b in range(bb):                                                   # static, bb <= n
            fb = f[b * hw:(b + 1) * hw]                                       # (hw, 2P)
            f1 = fb[:, :P].astype(jnp.bfloat16)                               # lane-aligned halves
            f2 = fb[:, P:].astype(jnp.bfloat16)

            # s[q,k] = sum_c f1[q,c]*f2[k,c]  (padded columns are zero in BOTH halves -> exact)
            s = lax.dot_general(f1, f2, (((1,), (1,)), ((), ())),
                                preferred_element_type=jnp.float32)           # (hw, hw)

            # exact row-wise softmax in f32 (denominator divide is once per tile; keep exact)
            s_max = jnp.max(s, axis=-1, keepdims=True)
            p = jnp.exp(s - s_max)
            corr = p / jnp.sum(p, axis=-1, keepdims=True)                     # (hw, hw) f32
            corr_bf = corr.astype(jnp.bfloat16)

            # out (detached) resized to feature resolution (dense bilinear matrix) then
            # re-projected; produced directly in (c_out, hw) layout -> no transposes.
            out_t = jnp.dot(out_ref[b], rin_ref[...],
                            preferred_element_type=jnp.float32)               # (c_out, hw)
            corr_out_ref[b] = jnp.dot(out_t.astype(jnp.bfloat16), corr_bf,
                                      preferred_element_type=jnp.float32)     # (c_out, hw)

            # sample rows (one-hot matmul), bilinear-resize to output resolution, threshold.
            # Chunked over sample rows to bound vreg live range of the f32 `resized` tile.
            for c0 in range(0, n_samples, sample_chunk):
                sel_c = sel_ref[c0:c0 + sample_chunk, :]                       # (chunk, hw) bf16
                sampled = jnp.dot(sel_c, corr_bf,
                                  preferred_element_type=jnp.float32)          # (chunk, hw)
                resized = jnp.dot(sampled.astype(jnp.bfloat16), rout_ref[...],
                                  preferred_element_type=jnp.float32)          # (chunk, hw_out)
                mn = jnp.min(resized, axis=-1, keepdims=True)
                mx = jnp.max(resized, axis=-1, keepdims=True)
                # (m - mn)/(mx - mn) > 0.5   <=>   2*m > mn + mx  (no divide, no NaN when mx==mn)
                mask_ref[b, c0:c0 + sample_chunk, :] = (
                    resized + resized > mn + mx).astype(jnp.int8)

    return corr_fused_kernel


# ----------------------------------------------------------------------------- wrapper
def corr_forward(feature_in, out, w1, b1, w2, b2, sample_key, n_samples=128):
    n, cin, h_in, w_in = feature_in.shape
    _, c_out, h_out, w_out = out.shape
    hw = h_in * w_in
    hw_out = h_out * w_out
    nclass = w1.shape[1]
    P = _LANE
    assert nclass <= P

    # Fused, lane-padded twin projection weights; 1/sqrt(nclass) folded into the conv1 half.
    scale = 1.0 / math.sqrt(float(nclass))
    w_fused = jnp.zeros((cin, 2 * P), jnp.float32)
    w_fused = w_fused.at[:, :nclass].set(w1 * scale)
    w_fused = w_fused.at[:, P:P + nclass].set(w2)
    w_fused = w_fused.astype(jnp.bfloat16)                                    # bf16 MXU operand
    b_fused = jnp.zeros((1, 2 * P), jnp.float32)                              # f32 (post-acc add)
    b_fused = b_fused.at[0, :nclass].set(b1 * scale)
    b_fused = b_fused.at[0, P:P + nclass].set(b2)

    # feature resize to its own size is the identity under align_corners bilinear;
    # channels-last flatten so the batch-collapse path can merge the (n*hw) rows.
    # (accepted glue transpose at toy size)
    feat = jnp.transpose(feature_in, (0, 2, 3, 1)).reshape(n * hw, cin).astype(jnp.bfloat16)
    out_flat = out.reshape(n, c_out, hw_out).astype(jnp.bfloat16)

    rmat_out_to_feat = _bilinear_resize_matrix(h_out, w_out, h_in, w_in).astype(jnp.bfloat16)
    rmat_feat_to_out = _bilinear_resize_matrix(h_in, w_in, h_out, w_out).astype(jnp.bfloat16)

    # torch.randint(0, hw-1, [128]) (high exclusive) replicated with a deterministic key,
    # turned into a one-hot selector so the gather happens as an MXU matmul in-kernel.
    # TODO(synk): torch's global-RNG sampling order cannot be reproduced bit-exactly in JAX.
    idx = jax.random.randint(sample_key, (n_samples,), 0, hw - 1)
    sel = jax.nn.one_hot(idx, hw, dtype=jnp.bfloat16)                          # (n_samples, hw)
    # TODO(synk): for production HW replace the one-hot gather with scalar-prefetched row slices
    # and the dense kron resize with separable row/col interpolation (quadratic -> linear).

    # Per-chip batch tiling: multi-TC chips keep grid=(n,) "parallel"; single-TC chips collapse
    # the batch into one grid step (removes per-step overhead, 2x MXU rows on the projection).
    bb = 1 if (_multi_tensorcore_chip() and n > 1) else n
    grid = (n // bb,)
    sample_chunk = 64 if (n_samples % 64 == 0) else n_samples

    kernel = make_corr_kernel(bb, hw, n_samples, sample_chunk)

    # Advisory cost estimate so XLA can overlap the (tiny) custom call with neighbours.
    flops = 2 * n * (hw * cin * 2 * P + hw * hw * P + c_out * hw_out * hw
                     + c_out * hw * hw + n_samples * hw * hw + n_samples * hw * hw_out)
    transcendentals = n * hw * hw
    bytes_accessed = (n * hw * cin * 2 + cin * 2 * P * 2 + 2 * P * 4
                      + n * c_out * hw_out * 2 + hw_out * hw * 2 + n_samples * hw * 2
                      + hw * hw_out * 2 + n * c_out * hw * 4 + n * n_samples * hw_out)

    corr_out_flat, mask = pl.pallas_call(
        kernel,
        out_shape=(jax.ShapeDtypeStruct((n, c_out, hw), jnp.float32),
                   jax.ShapeDtypeStruct((n, n_samples, hw_out), jnp.int8)),
        grid_spec=pltpu.PrefetchScalarGridSpec(
            num_scalar_prefetch=0,
            grid=grid,
            in_specs=[pl.BlockSpec((bb * hw, cin), lambda i: (i, 0)),
                      pl.BlockSpec((cin, 2 * P), lambda i: (0, 0)),
                      pl.BlockSpec((1, 2 * P), lambda i: (0, 0)),
                      pl.BlockSpec((bb, c_out, hw_out), lambda i: (i, 0, 0)),
                      pl.BlockSpec((hw_out, hw), lambda i: (0, 0)),
                      pl.BlockSpec((n_samples, hw), lambda i: (0, 0)),
                      pl.BlockSpec((hw, hw_out), lambda i: (0, 0))],
            out_specs=[pl.BlockSpec((bb, c_out, hw), lambda i: (i, 0, 0)),
                       pl.BlockSpec((bb, n_samples, hw_out), lambda i: (i, 0, 0))]),
        compiler_params=pltpu.CompilerParams(dimension_semantics=("parallel",)),
        cost_estimate=pl.CostEstimate(flops=flops, transcendentals=transcendentals,
                                      bytes_accessed=bytes_accessed),
    )(feat, w_fused, b_fused, out_flat, rmat_out_to_feat, sel, rmat_feat_to_out)

    corr_out = corr_out_flat.reshape(n, c_out, h_in, w_in)                     # NCHW, no transpose
    corr_map_out = mask.reshape(n, n_samples, h_out, w_out).astype(jnp.bool_)
    dict_return = {}
    return corr_map_out, corr_out, dict_return


# ----------------------------------------------------------------------------- main
if __name__ == "__main__":
    key = jax.random.PRNGKey(0)
    k_feat, k_out, kw1, kb1, kw2, kb2, k_samp = jax.random.split(key, 7)

    N, Cin, Hin, Win = 2, 256, 8, 8       # Conv2d(256, nclass) fixes Cin = 256
    nclass = 21
    Hout, Wout = 16, 16

    feature_in = jax.random.normal(k_feat, (N, Cin, Hin, Win), jnp.float32)
    out = jax.random.normal(k_out, (N, nclass, Hout, Wout), jnp.float32)

    # Deterministic parameter init (1x1 conv kernels stored as (Cin, nclass)).
    fan_in_scale = 1.0 / math.sqrt(Cin)
    w1 = jax.random.normal(kw1, (Cin, nclass), jnp.float32) * fan_in_scale
    b1 = jax.random.normal(kb1, (nclass,), jnp.float32) * 0.01
    w2 = jax.random.normal(kw2, (Cin, nclass), jnp.float32) * fan_in_scale
    b2 = jax.random.normal(kb2, (nclass,), jnp.float32) * 0.01

    corr_map_out, corr_out, _ = jax.jit(corr_forward)(
        feature_in, out, w1, b1, w2, b2, k_samp)
    jax.block_until_ready((corr_map_out, corr_out))

    assert corr_map_out.shape == (N, 128, Hout, Wout) and corr_map_out.dtype == jnp.bool_
    assert corr_out.shape == (N, nclass, Hin, Win) and corr_out.dtype == jnp.float32
    assert bool(jnp.isfinite(corr_out).all())
    print("KERNEL_OK")
</pallas_src>

<mosaic_0001>
module attributes {stable_mosaic.version = 11 : i64} {
  func.func @corr_fused_kernel(%arg0: i32, %arg1: memref<128x256xbf16, #tpu.memory_space<vmem>>, %arg2: memref<256x256xbf16, #tpu.memory_space<vmem>>, %arg3: memref<1x256xf32, #tpu.memory_space<vmem>>, %arg4: memref<2x21x256xbf16, #tpu.memory_space<vmem>>, %arg5: memref<256x64xbf16, #tpu.memory_space<vmem>>, %arg6: memref<128x64xbf16, #tpu.memory_space<vmem>>, %arg7: memref<64x256xbf16, #tpu.memory_space<vmem>>, %arg8: memref<2x21x64xf32, #tpu.memory_space<vmem>>, %arg9: memref<2x128x256xi8, #tpu.memory_space<vmem>>) attributes {dimension_semantics = [#tpu.dimension_semantics<parallel>], iteration_bounds = array<i64: 1>, scalar_prefetch = 0 : i64, scratch_operands = 0 : i64, tpu.core_type = #tpu.core_type<tc>, window_params = [{transform_indices = @transform_0, window_bounds = array<i64: 128, 256>}, {pipeline_mode = #tpu.pipeline_mode<synchronous>, transform_indices = @transform_1, window_bounds = array<i64: 256, 256>}, {pipeline_mode = #tpu.pipeline_mode<synchronous>, transform_indices = @transform_2, window_bounds = array<i64: 1, 256>}, {transform_indices = @transform_3, window_bounds = array<i64: 2, 21, 256>}, {pipeline_mode = #tpu.pipeline_mode<synchronous>, transform_indices = @transform_4, window_bounds = array<i64: 256, 64>}, {pipeline_mode = #tpu.pipeline_mode<synchronous>, transform_indices = @transform_5, window_bounds = array<i64: 128, 64>}, {pipeline_mode = #tpu.pipeline_mode<synchronous>, transform_indices = @transform_6, window_bounds = array<i64: 64, 256>}, {transform_indices = @transform_7, window_bounds = array<i64: 2, 21, 64>}, {transform_indices = @transform_8, window_bounds = array<i64: 2, 128, 256>}]} {
    %c0 = arith.constant 0 : index
    %c0_0 = arith.constant 0 : index
    %0 = vector.load %arg1[%c0, %c0_0] : memref<128x256xbf16, #tpu.memory_space<vmem>>, vector<128x256xbf16>
    %c0_1 = arith.constant 0 : index
    %c0_2 = arith.constant 0 : index
    %1 = vector.load %arg2[%c0_1, %c0_2] : memref<256x256xbf16, #tpu.memory_space<vmem>>, vector<256x256xbf16>
    %cst = arith.constant dense<0.000000e+00> : vector<128x256xf32>
    %2 = tpu.matmul %0, %1, %cst {dimension_numbers = #tpu.dot_dimension_numbers<[1], [0], [0], [1], [0, 0, 1, 1], [], []>} : vector<128x256xbf16>, vector<256x256xbf16>, vector<128x256xf32> -> vector<128x256xf32>
    %c0_3 = arith.constant 0 : index
    %c0_4 = arith.constant 0 : index
    %3 = vector.load %arg3[%c0_3, %c0_4] : memref<1x256xf32, #tpu.memory_space<vmem>>, vector<1x256xf32>
    %4 = vector.broadcast %3 : vector<1x256xf32> to vector<128x256xf32>
    %5 = arith.addf %2, %4 : vector<128x256xf32>
    %6 = vector.extract_strided_slice %5 {offsets = [0, 0], sizes = [64, 256], strides = [1, 1]} : vector<128x256xf32> to vector<64x256xf32>
    %7 = vector.extract_strided_slice %6 {offsets = [0, 0], sizes = [64, 128], strides = [1, 1]} : vector<64x256xf32> to vector<64x128xf32>
    %8 = arith.truncf %7 : vector<64x128xf32> to vector<64x128xbf16>
    %9 = vector.extract_strided_slice %6 {offsets = [0, 128], sizes = [64, 128], strides = [1, 1]} : vector<64x256xf32> to vector<64x128xf32>
    %10 = arith.truncf %9 : vector<64x128xf32> to vector<64x128xbf16>
    %cst_5 = arith.constant dense<0.000000e+00> : vector<64x64xf32>
    %11 = tpu.matmul %8, %10, %cst_5 {dimension_numbers = #tpu.dot_dimension_numbers<[1], [1], [0], [0], [0, 0, 1, 0], [], []>} : vector<64x128xbf16>, vector<64x128xbf16>, vector<64x64xf32> -> vector<64x64xf32>
    %cst_6 = arith.constant dense<0xFF800000> : vector<64xf32>
    %12 = vector.multi_reduction <maximumf>, %11, %cst_6 [1] : vector<64x64xf32> to vector<64xf32>
    %13 = vector.shape_cast %12 : vector<64xf32> to vector<64x1xf32>
    %14 = vector.broadcast %13 : vector<64x1xf32> to vector<64x64xf32>
    %15 = arith.subf %11, %14 : vector<64x64xf32>
    %16 = math.exp %15 : vector<64x64xf32>
    %cst_7 = arith.constant dense<0.000000e+00> : vector<64xf32>
    %17 = vector.multi_reduction <add>, %16, %cst_7 [1] : vector<64x64xf32> to vector<64xf32>
    %18 = vector.shape_cast %17 : vector<64xf32> to vector<64x1xf32>
    %19 = vector.broadcast %18 : vector<64x1xf32> to vector<64x64xf32>
    %20 = arith.divf %16, %19 : vector<64x64xf32>
    %21 = arith.truncf %20 : vector<64x64xf32> to vector<64x64xbf16>
    %c0_8 = arith.constant 0 : index
    %c0_9 = arith.constant 0 : index
    %c0_10 = arith.constant 0 : index
    %22 = vector.load %arg4[%c0_8, %c0_9, %c0_10] : memref<2x21x256xbf16, #tpu.memory_space<vmem>>, vector<1x21x256xbf16>
    %23 = vector.shape_cast %22 : vector<1x21x256xbf16> to vector<21x256xbf16>
    %c0_11 = arith.constant 0 : index
    %c0_12 = arith.constant 0 : index
    %24 = vector.load %arg5[%c0_11, %c0_12] : memref<256x64xbf16, #tpu.memory_space<vmem>>, vector<256x64xbf16>
    %cst_13 = arith.constant dense<0.000000e+00> : vector<21x64xf32>
    %25 = tpu.matmul %23, %24, %cst_13 {dimension_numbers = #tpu.dot_dimension_numbers<[1], [0], [0], [1], [0, 0, 1, 1], [], []>} : vector<21x256xbf16>, vector<256x64xbf16>, vector<21x64xf32> -> vector<21x64xf32>
    %26 = arith.truncf %25 : vector<21x64xf32> to vector<21x64xbf16>
    %cst_14 = arith.constant dense<0.000000e+00> : vector<21x64xf32>
    %27 = tpu.matmul %26, %21, %cst_14 {dimension_numbers = #tpu.dot_dimension_numbers<[1], [0], [0], [1], [0, 0, 1, 1], [], []>} : vector<21x64xbf16>, vector<64x64xbf16>, vector<21x64xf32> -> vector<21x64xf32>
    %c0_15 = arith.constant 0 : index
    %c0_16 = arith.constant 0 : index
    %c0_17 = arith.constant 0 : index
    %28 = vector.load %arg8[%c0_15, %c0_16, %c0_17] : memref<2x21x64xf32, #tpu.memory_space<vmem>>, vector<1x21x64xf32>
    %29 = vector.shape_cast %28 : vector<1x21x64xf32> to vector<21x64xf32>
    %30 = vector.shape_cast %27 : vector<21x64xf32> to vector<1x21x64xf32>
    tpu.vector_store %arg8[%c0_15, %c0_16, %c0_17], %30 {strides = array<i32>} : memref<2x21x64xf32, #tpu.memory_space<vmem>>, vector<1x21x64xf32>,
    %c0_18 = arith.constant 0 : index
    %c0_19 = arith.constant 0 : index
    %31 = vector.load %arg6[%c0_18, %c0_19] : memref<128x64xbf16, #tpu.memory_space<vmem>>, vector<64x64xbf16>
    %cst_20 = arith.constant dense<0.000000e+00> : vector<64x64xf32>
    %32 = tpu.matmul %31, %21, %cst_20 {dimension_numbers = #tpu.dot_dimension_numbers<[1], [0], [0], [1], [0, 0, 1, 1], [], []>} : vector<64x64xbf16>, vector<64x64xbf16>, vector<64x64xf32> -> vector<64x64xf32>
    %33 = arith.truncf %32 : vector<64x64xf32> to vector<64x64xbf16>
    %c0_21 = arith.constant 0 : index
    %c0_22 = arith.constant 0 : index
    %34 = vector.load %arg7[%c0_21, %c0_22] : memref<64x256xbf16, #tpu.memory_space<vmem>>, vector<64x256xbf16>
    %cst_23 = arith.constant dense<0.000000e+00> : vector<64x256xf32>
    %35 = tpu.matmul %33, %34, %cst_23 {dimension_numbers = #tpu.dot_dimension_numbers<[1], [0], [0], [1], [0, 0, 1, 1], [], []>} : vector<64x64xbf16>, vector<64x256xbf16>, vector<64x256xf32> -> vector<64x256xf32>
    %cst_24 = arith.constant dense<0x7F800000> : vector<64xf32>
    %36 = vector.multi_reduction <minimumf>, %35, %cst_24 [1] : vector<64x256xf32> to vector<64xf32>
    %37 = vector.shape_cast %36 : vector<64xf32> to vector<64x1xf32>
    %cst_25 = arith.constant dense<0xFF800000> : vector<64xf32>
    %38 = vector.multi_reduction <maximumf>, %35, %cst_25 [1] : vector<64x256xf32> to vector<64xf32>
    %39 = vector.shape_cast %38 : vector<64xf32> to vector<64x1xf32>
    %40 = arith.addf %35, %35 : vector<64x256xf32>
    %41 = arith.addf %37, %39 : vector<64x1xf32>
    %42 = vector.broadcast %41 : vector<64x1xf32> to vector<64x256xf32>
    %43 = arith.cmpf ogt, %40, %42 : vector<64x256xf32>
    %44 = arith.extui %43 : vector<64x256xi1> to vector<64x256xi8>
    %c0_26 = arith.constant 0 : index
    %c0_27 = arith.constant 0 : index
    %c0_28 = arith.constant 0 : index
    %45 = vector.load %arg9[%c0_26, %c0_27, %c0_28] : memref<2x128x256xi8, #tpu.memory_space<vmem>>, vector<1x64x256xi8>
    %46 = vector.shape_cast %45 : vector<1x64x256xi8> to vector<64x256xi8>
    %47 = vector.shape_cast %44 : vector<64x256xi8> to vector<1x64x256xi8>
    tpu.vector_store %arg9[%c0_26, %c0_27, %c0_28], %47 {strides = array<i32>} : memref<2x128x256xi8, #tpu.memory_space<vmem>>, vector<1x64x256xi8>,
    %c64 = arith.constant 64 : index
    %c0_29 = arith.constant 0 : index
    %48 = vector.load %arg6[%c64, %c0_29] : memref<128x64xbf16, #tpu.memory_space<vmem>>, vector<64x64xbf16>
    %cst_30 = arith.constant dense<0.000000e+00> : vector<64x64xf32>
    %49 = tpu.matmul %48, %21, %cst_30 {dimension_numbers = #tpu.dot_dimension_numbers<[1], [0], [0], [1], [0, 0, 1, 1], [], []>} : vector<64x64xbf16>, vector<64x64xbf16>, vector<64x64xf32> -> vector<64x64xf32>
    %50 = arith.truncf %49 : vector<64x64xf32> to vector<64x64xbf16>
    %c0_31 = arith.constant 0 : index
    %c0_32 = arith.constant 0 : index
    %51 = vector.load %arg7[%c0_31, %c0_32] : memref<64x256xbf16, #tpu.memory_space<vmem>>, vector<64x256xbf16>
    %cst_33 = arith.constant dense<0.000000e+00> : vector<64x256xf32>
    %52 = tpu.matmul %50, %51, %cst_33 {dimension_numbers = #tpu.dot_dimension_numbers<[1], [0], [0], [1], [0, 0, 1, 1], [], []>} : vector<64x64xbf16>, vector<64x256xbf16>, vector<64x256xf32> -> vector<64x256xf32>
    %cst_34 = arith.constant dense<0x7F800000> : vector<64xf32>
    %53 = vector.multi_reduction <minimumf>, %52, %cst_34 [1] : vector<64x256xf32> to vector<64xf32>
    %54 = vector.shape_cast %53 : vector<64xf32> to vector<64x1xf32>
    %cst_35 = arith.constant dense<0xFF800000> : vector<64xf32>
    %55 = vector.multi_reduction <maximumf>, %52, %cst_35 [1] : vector<64x256xf32> to vector<64xf32>
    %56 = vector.shape_cast %55 : vector<64xf32> to vector<64x1xf32>
    %57 = arith.addf %52, %52 : vector<64x256xf32>
    %58 = arith.addf %54, %56 : vector<64x1xf32>
    %59 = vector.broadcast %58 : vector<64x1xf32> to vector<64x256xf32>
    %60 = arith.cmpf ogt, %57, %59 : vector<64x256xf32>
    %61 = arith.extui %60 : vector<64x256xi1> to vector<64x256xi8>
    %c0_36 = arith.constant 0 : index
    %c64_37 = arith.constant 64 : index
    %c0_38 = arith.constant 0 : index
    %62 = vector.load %arg9[%c0_36, %c64_37, %c0_38] : memref<2x128x256xi8, #tpu.memory_space<vmem>>, vector<1x64x256xi8>
    %63 = vector.shape_cast %62 : vector<1x64x256xi8> to vector<64x256xi8>
    %64 = vector.shape_cast %61 : vector<64x256xi8> to vector<1x64x256xi8>
    tpu.vector_store %arg9[%c0_36, %c64_37, %c0_38], %64 {strides = array<i32>} : memref<2x128x256xi8, #tpu.memory_space<vmem>>, vector<1x64x256xi8>,
    %65 = vector.extract_strided_slice %5 {offsets = [64, 0], sizes = [64, 256], strides = [1, 1]} : vector<128x256xf32> to vector<64x256xf32>
    %66 = vector.extract_strided_slice %65 {offsets = [0, 0], sizes = [64, 128], strides = [1, 1]} : vector<64x256xf32> to vector<64x128xf32>
    %67 = arith.truncf %66 : vector<64x128xf32> to vector<64x128xbf16>
    %68 = vector.extract_strided_slice %65 {offsets = [0, 128], sizes = [64, 128], strides = [1, 1]} : vector<64x256xf32> to vector<64x128xf32>
    %69 = arith.truncf %68 : vector<64x128xf32> to vector<64x128xbf16>
    %cst_39 = arith.constant dense<0.000000e+00> : vector<64x64xf32>
    %70 = tpu.matmul %67, %69, %cst_39 {dimension_numbers = #tpu.dot_dimension_numbers<[1], [1], [0], [0], [0, 0, 1, 0], [], []>} : vector<64x128xbf16>, vector<64x128xbf16>, vector<64x64xf32> -> vector<64x64xf32>
    %cst_40 = arith.constant dense<0xFF800000> : vector<64xf32>
    %71 = vector.multi_reduction <maximumf>, %70, %cst_40 [1] : vector<64x64xf32> to vector<64xf32>
    %72 = vector.shape_cast %71 : vector<64xf32> to vector<64x1xf32>
    %73 = vector.broadcast %72 : vector<64x1xf32> to vector<64x64xf32>
    %74 = arith.subf %70, %73 : vector<64x64xf32>
    %75 = math.exp %74 : vector<64x64xf32>
    %cst_41 = arith.constant dense<0.000000e+00> : vector<64xf32>
    %76 = vector.multi_reduction <add>, %75, %cst_41 [1] : vector<64x64xf32> to vector<64xf32>
    %77 = vector.shape_cast %76 : vector<64xf32> to vector<64x1xf32>
    %78 = vector.broadcast %77 : vector<64x1xf32> to vector<64x64xf32>
    %79 = arith.divf %75, %78 : vector<64x64xf32>
    %80 = arith.truncf %79 : vector<64x64xf32> to vector<64x64xbf16>
    %c1 = arith.constant 1 : index
    %c0_42 = arith.constant 0 : index
    %c0_43 = arith.constant 0 : index
    %81 = vector.load %arg4[%c1, %c0_42, %c0_43] : memref<2x21x256xbf16, #tpu.memory_space<vmem>>, vector<1x21x256xbf16>
    %82 = vector.shape_cast %81 : vector<1x21x256xbf16> to vector<21x256xbf16>
    %c0_44 = arith.constant 0 : index
    %c0_45 = arith.constant 0 : index
    %83 = vector.load %arg5[%c0_44, %c0_45] : memref<256x64xbf16, #tpu.memory_space<vmem>>, vector<256x64xbf16>
    %cst_46 = arith.constant dense<0.000000e+00> : vector<21x64xf32>
    %84 = tpu.matmul %82, %83, %cst_46 {dimension_numbers = #tpu.dot_dimension_numbers<[1], [0], [0], [1], [0, 0, 1, 1], [], []>} : vector<21x256xbf16>, vector<256x64xbf16>, vector<21x64xf32> -> vector<21x64xf32>
    %85 = arith.truncf %84 : vector<21x64xf32> to vector<21x64xbf16>
    %cst_47 = arith.constant dense<0.000000e+00> : vector<21x64xf32>
    %86 = tpu.matmul %85, %80, %cst_47 {dimension_numbers = #tpu.dot_dimension_numbers<[1], [0], [0], [1], [0, 0, 1, 1], [], []>} : vector<21x64xbf16>, vector<64x64xbf16>, vector<21x64xf32> -> vector<21x64xf32>
    %c1_48 = arith.constant 1 : index
    %c0_49 = arith.constant 0 : index
    %c0_50 = arith.constant 0 : index
    %87 = vector.load %arg8[%c1_48, %c0_49, %c0_50] : memref<2x21x64xf32, #tpu.memory_space<vmem>>, vector<1x21x64xf32>
    %88 = vector.shape_cast %87 : vector<1x21x64xf32> to vector<21x64xf32>
    %89 = vector.shape_cast %86 : vector<21x64xf32> to vector<1x21x64xf32>
    tpu.vector_store %arg8[%c1_48, %c0_49, %c0_50], %89 {strides = array<i32>} : memref<2x21x64xf32, #tpu.memory_space<vmem>>, vector<1x21x64xf32>,
    %c0_51 = arith.constant 0 : index
    %c0_52 = arith.constant 0 : index
    %90 = vector.load %arg6[%c0_51, %c0_52] : memref<128x64xbf16, #tpu.memory_space<vmem>>, vector<64x64xbf16>
    %cst_53 = arith.constant dense<0.000000e+00> : vector<64x64xf32>
    %91 = tpu.matmul %90, %80, %cst_53 {dimension_numbers = #tpu.dot_dimension_numbers<[1], [0], [0], [1], [0, 0, 1, 1], [], []>} : vector<64x64xbf16>, vector<64x64xbf16>, vector<64x64xf32> -> vector<64x64xf32>
    %92 = arith.truncf %91 : vector<64x64xf32> to vector<64x64xbf16>
    %c0_54 = arith.constant 0 : index
    %c0_55 = arith.constant 0 : index
    %93 = vector.load %arg7[%c0_54, %c0_55] : memref<64x256xbf16, #tpu.memory_space<vmem>>, vector<64x256xbf16>
    %cst_56 = arith.constant dense<0.000000e+00> : vector<64x256xf32>
    %94 = tpu.matmul %92, %93, %cst_56 {dimension_numbers = #tpu.dot_dimension_numbers<[1], [0], [0], [1], [0, 0, 1, 1], [], []>} : vector<64x64xbf16>, vector<64x256xbf16>, vector<64x256xf32> -> vector<64x256xf32>
    %cst_57 = arith.constant dense<0x7F800000> : vector<64xf32>
    %95 = vector.multi_reduction <minimumf>, %94, %cst_57 [1] : vector<64x256xf32> to vector<64xf32>
    %96 = vector.shape_cast %95 : vector<64xf32> to vector<64x1xf32>
    %cst_58 = arith.constant dense<0xFF800000> : vector<64xf32>
    %97 = vector.multi_reduction <maximumf>, %94, %cst_58 [1] : vector<64x256xf32> to vector<64xf32>
    %98 = vector.shape_cast %97 : vector<64xf32> to vector<64x1xf32>
    %99 = arith.addf %94, %94 : vector<64x256xf32>
    %100 = arith.addf %96, %98 : vector<64x1xf32>
    %101 = vector.broadcast %100 : vector<64x1xf32> to vector<64x256xf32>
    %102 = arith.cmpf ogt, %99, %101 : vector<64x256xf32>
    %103 = arith.extui %102 : vector<64x256xi1> to vector<64x256xi8>
    %c1_59 = arith.constant 1 : index
    %c0_60 = arith.constant 0 : index
    %c0_61 = arith.constant 0 : index
    %104 = vector.load %arg9[%c1_59, %c0_60, %c0_61] : memref<2x128x256xi8, #tpu.memory_space<vmem>>, vector<1x64x256xi8>
    %105 = vector.shape_cast %104 : vector<1x64x256xi8> to vector<64x256xi8>
    %106 = vector.shape_cast %103 : vector<64x256xi8> to vector<1x64x256xi8>
    tpu.vector_store %arg9[%c1_59, %c0_60, %c0_61], %106 {strides = array<i32>} : memref<2x128x256xi8, #tpu.memory_space<vmem>>, vector<1x64x256xi8>,
    %c64_62 = arith.constant 64 : index
    %c0_63 = arith.constant 0 : index
    %107 = vector.load %arg6[%c64_62, %c0_63] : memref<128x64xbf16, #tpu.memory_space<vmem>>, vector<64x64xbf16>
    %cst_64 = arith.constant dense<0.000000e+00> : vector<64x64xf32>
    %108 = tpu.matmul %107, %80, %cst_64 {dimension_numbers = #tpu.dot_dimension_numbers<[1], [0], [0], [1], [0, 0, 1, 1], [], []>} : vector<64x64xbf16>, vector<64x64xbf16>, vector<64x64xf32> -> vector<64x64xf32>
    %109 = arith.truncf %108 : vector<64x64xf32> to vector<64x64xbf16>
    %c0_65 = arith.constant 0 : index
    %c0_66 = arith.constant 0 : index
    %110 = vector.load %arg7[%c0_65, %c0_66] : memref<64x256xbf16, #tpu.memory_space<vmem>>, vector<64x256xbf16>
    %cst_67 = arith.constant dense<0.000000e+00> : vector<64x256xf32>
    %111 = tpu.matmul %109, %110, %cst_67 {dimension_numbers = #tpu.dot_dimension_numbers<[1], [0], [0], [1], [0, 0, 1, 1], [], []>} : vector<64x64xbf16>, vector<64x256xbf16>, vector<64x256xf32> -> vector<64x256xf32>
    %cst_68 = arith.constant dense<0x7F800000> : vector<64xf32>
    %112 = vector.multi_reduction <minimumf>, %111, %cst_68 [1] : vector<64x256xf32> to vector<64xf32>
    %113 = vector.shape_cast %112 : vector<64xf32> to vector<64x1xf32>
    %cst_69 = arith.constant dense<0xFF800000> : vector<64xf32>
    %114 = vector.multi_reduction <maximumf>, %111, %cst_69 [1] : vector<64x256xf32> to vector<64xf32>
    %115 = vector.shape_cast %114 : vector<64xf32> to vector<64x1xf32>
    %116 = arith.addf %111, %111 : vector<64x256xf32>
    %117 = arith.addf %113, %115 : vector<64x1xf32>
    %118 = vector.broadcast %117 : vector<64x1xf32> to vector<64x256xf32>
    %119 = arith.cmpf ogt, %116, %118 : vector<64x256xf32>
    %120 = arith.extui %119 : vector<64x256xi1> to vector<64x256xi8>
    %c1_70 = arith.constant 1 : index
    %c64_71 = arith.constant 64 : index
    %c0_72 = arith.constant 0 : index
    %121 = vector.load %arg9[%c1_70, %c64_71, %c0_72] : memref<2x128x256xi8, #tpu.memory_space<vmem>>, vector<1x64x256xi8>
    %122 = vector.shape_cast %121 : vector<1x64x256xi8> to vector<64x256xi8>
    %123 = vector.shape_cast %120 : vector<64x256xi8> to vector<1x64x256xi8>
    tpu.vector_store %arg9[%c1_70, %c64_71, %c0_72], %123 {strides = array<i32>} : memref<2x128x256xi8, #tpu.memory_space<vmem>>, vector<1x64x256xi8>,
    return
  }
  func.func @transform_0(%arg0: i32) -> (i32, i32) {
    %c0_i32 = arith.constant 0 : i32
    %c0_i32_0 = arith.constant 0 : i32
    return %arg0, %c0_i32 : i32, i32
  }
  func.func @transform_1(%arg0: i32) -> (i32, i32) {
    %c0_i32 = arith.constant 0 : i32
    %c0_i32_0 = arith.constant 0 : i32
    %c0_i32_1 = arith.constant 0 : i32
    return %c0_i32, %c0_i32_0 : i32, i32
  }
  func.func @transform_2(%arg0: i32) -> (i32, i32) {
    %c0_i32 = arith.constant 0 : i32
    %c0_i32_0 = arith.constant 0 : i32
    %c0_i32_1 = arith.constant 0 : i32
    return %c0_i32, %c0_i32_0 : i32, i32
  }
  func.func @transform_3(%arg0: i32) -> (i32, i32, i32) {
    %c0_i32 = arith.constant 0 : i32
    %c0_i32_0 = arith.constant 0 : i32
    %c0_i32_1 = arith.constant 0 : i32
    return %arg0, %c0_i32, %c0_i32_0 : i32, i32, i32
  }
  func.func @transform_4(%arg0: i32) -> (i32, i32) {
    %c0_i32 = arith.constant 0 : i32
    %c0_i32_0 = arith.constant 0 : i32
    %c0_i32_1 = arith.constant 0 : i32
    return %c0_i32, %c0_i32_0 : i32, i32
  }
  func.func @transform_5(%arg0: i32) -> (i32, i32) {
    %c0_i32 = arith.constant 0 : i32
    %c0_i32_0 = arith.constant 0 : i32
    %c0_i32_1 = arith.constant 0 : i32
    return %c0_i32, %c0_i32_0 : i32, i32
  }
  func.func @transform_6(%arg0: i32) -> (i32, i32) {
    %c0_i32 = arith.constant 0 : i32
    %c0_i32_0 = arith.constant 0 : i32
    %c0_i32_1 = arith.constant 0 : i32
    return %c0_i32, %c0_i32_0 : i32, i32
  }
  func.func @transform_7(%arg0: i32) -> (i32, i32, i32) {
    %c0_i32 = arith.constant 0 : i32
    %c0_i32_0 = arith.constant 0 : i32
    %c0_i32_1 = arith.constant 0 : i32
    return %arg0, %c0_i32, %c0_i32_0 : i32, i32, i32
  }
  func.func @transform_8(%arg0: i32) -> (i32, i32, i32) {
    %c0_i32 = arith.constant 0 : i32
    %c0_i32_0 = arith.constant 0 : i32
    %c0_i32_1 = arith.constant 0 : i32
    return %arg0, %c0_i32, %c0_i32_0 : i32, i32, i32
  }
}

</mosaic_0001>

<bundles_post_ra>
// kernel: corr_forward.1
= control target key start
LH: loop header
LB: loop body
LE: loop exit
PB: predicated region body
PF: predicated region fallthrough
CT: control target
= control target key end

     0   :  { %vm558_vm0 = vcmask 523264   ;;  %s5646_s1 = inlined_call_operand.vmem [shape: bf16[256,256], index: 1, kind: input, shape index: {}]   ;;  %s5647_s0 = inlined_call_operand.vmem [shape: bf16[128,256], index: 0, kind: input, shape index: {}]   ;;  %s5648_s2 = inlined_call_operand.vmem [shape: f32[1,256], index: 2, kind: input, shape index: {}]   ;;  %s5649_s4 = inlined_call_operand.vmem [shape: bf16[256,64], index: 4, kind: input, shape index: {}]   ;;  %s5650_s3 = inlined_call_operand.vmem [shape: bf16[2,21,256], index: 3, kind: input, shape index: {}]   ;;  %s5651_s6 = inlined_call_operand.vmem [shape: bf16[64,256], index: 6, kind: input, shape index: {}]   ;;  %s5652_s5 = inlined_call_operand.vmem [shape: bf16[128,64], index: 5, kind: input, shape index: {}]   ;;  %s5653_s7 = inlined_call_operand.vmem [shape: f32[2,21,64], index: 7, kind: output, shape index: {0}]   ;;  %s5654_s8 = inlined_call_operand.vmem [shape: s8[2,128,256], index: 8, kind: output, shape index: {1}]  }
   0x1   :  { %v3446_v0 = vld [vmem:[%s5646_s1 + $0x74] sm:$0xf]  ;;  %v2938_v1 = vld [vmem:[%s5646_s1 + $0x78] sm:$0xf0]  ;;  %v3444_v5 = vld [vmem:[%s5646_s1 + $0x64] sm:$0xf] }
   0x2   :  { %v3462_v2 = vld [vmem:[%s5646_s1 + $0xf4] sm:$0xf]  ;;  %v2941_v3 = vor.u32 %v3446_v0, %v2938_v1  ;;  %v3002_v4 = vld [vmem:[%s5646_s1 + $0xf8] sm:$0xf0]  ;;  %v2930_v6 = vld [vmem:[%s5646_s1 + $0x68] sm:$0xf0] }
   0x3   :  { %v3005_v7 = vor.u32 %v3462_v2, %v3002_v4  ;;  %v3460_v8 = vld [vmem:[%s5646_s1 + $0xe4] sm:$0xf]  ;;  %v2994_v9 = vld [vmem:[%s5646_s1 + $0xe8] sm:$0xf0]  ;;  %v2933_v10 = vor.u32 %v3444_v5, %v2930_v6  ;;  %v3442_v12 = vld [vmem:[%s5646_s1 + $0x54] sm:$0xf] }
   0x4   :  { %423 = vmatpush.bf16.msra.mxu2 %v2941_v3  ;;  %v2997_v11 = vor.u32 %v3460_v8, %v2994_v9  ;;  %v2922_v13 = vld [vmem:[%s5646_s1 + $0x58] sm:$0xf0]  ;;  %v3458_v14 = vld [vmem:[%s5646_s1 + $0xd4] sm:$0xf]  ;;  %v3440_v18 = vld [vmem:[%s5646_s1 + $0x44] sm:$0xf] }
   0x5   :  { %472 = vmatpush.bf16.msra.mxu3 %v3005_v7  ;;  %v2986_v15 = vld [vmem:[%s5646_s1 + $0xd8] sm:$0xf0]  ;;  %v2925_v16 = vor.u32 %v3442_v12, %v2922_v13  ;;  %v2914_v19 = vld [vmem:[%s5646_s1 + $0x48] sm:$0xf0]  ;;  %v3456_v20 = vld [vmem:[%s5646_s1 + $0xc4] sm:$0xf] }
   0x6   :  { %v2989_v17 = vor.u32 %v3458_v14, %v2986_v15  ;;  %v2978_v21 = vld [vmem:[%s5646_s1 + $0xc8] sm:$0xf0]  ;;  %v2917_v22 = vor.u32 %v3440_v18, %v2914_v19  ;;  %v3438_v24 = vld [vmem:[%s5646_s1 + $0x34] sm:$0xf]  ;;  %v2906_v25 = vld [vmem:[%s5646_s1 + $0x38] sm:$0xf0] }
   0x7   :  { %v2981_v23 = vor.u32 %v3456_v20, %v2978_v21  ;;  %v3454_v26 = vld [vmem:[%s5646_s1 + $0xb4] sm:$0xf]  ;;  %v2970_v27 = vld [vmem:[%s5646_s1 + $0xb8] sm:$0xf0]  ;;  %v2909_v28 = vor.u32 %v3438_v24, %v2906_v25  ;;  %v3436_v30 = vld [vmem:[%s5646_s1 + $0x24] sm:$0xf] }
   0x8   :  { %424 = vmatpush.bf16.msra.mxu2 %v2933_v10  ;;  %v2973_v29 = vor.u32 %v3454_v26, %v2970_v27  ;;  %v2898_v31 = vld [vmem:[%s5646_s1 + $0x28] sm:$0xf0]  ;;  %v3452_v32 = vld [vmem:[%s5646_s1 + $0xa4] sm:$0xf]  ;;  %v3434_v36 = vld [vmem:[%s5646_s1 + $0x14] sm:$0xf] }
   0x9   :  { %473 = vmatpush.bf16.msra.mxu3 %v2997_v11  ;;  %v2962_v33 = vld [vmem:[%s5646_s1 + $0xa8] sm:$0xf0]  ;;  %v2901_v34 = vor.u32 %v3436_v30, %v2898_v31  ;;  %v2890_v37 = vld [vmem:[%s5646_s1 + $0x18] sm:$0xf0]  ;;  %v3450_v38 = vld [vmem:[%s5646_s1 + $0x94] sm:$0xf] }
   0xa   :  { %v2965_v35 = vor.u32 %v3452_v32, %v2962_v33  ;;  %v2954_v39 = vld [vmem:[%s5646_s1 + $0x98] sm:$0xf0]  ;;  %v2893_v40 = vor.u32 %v3434_v36, %v2890_v37  ;;  %v3432_v42 = vld [vmem:[%s5646_s1 + $0x4] sm:$0xf]  ;;  %v2882_v43 = vld [vmem:[%s5646_s1 + $0x8] sm:$0xf0] }
   0xb   :  { %v2957_v41 = vor.u32 %v3450_v38, %v2954_v39  ;;  %v3448_v44 = vld [vmem:[%s5646_s1 + $0x84] sm:$0xf]  ;;  %v2946_v45 = vld [vmem:[%s5646_s1 + $0x88] sm:$0xf0]  ;;  %v2885_v46 = vor.u32 %v3432_v42, %v2882_v43  ;;  %v2816_v47 = vld [vmem:[%s5647_s0] sm:$0xf] }
   0xc   :  { %425 = vmatpush.bf16.msra.mxu2 %v2925_v16  ;;  %v3417_v48 = vld [vmem:[%s5647_s0 + $0x4] sm:$0xf0]  ;;  %v2949_v49 = vor.u32 %v3448_v44, %v2946_v45  ;;  %v3416_v50 = vld [vmem:[%s5647_s0 + $0x4] sm:$0xf]  ;;  %v2818_v51 = vld [vmem:[%s5647_s0 + $0x8] sm:$0xf0] }
   0xd   :  { %474 = vmatpush.bf16.msra.mxu3 %v2989_v17  ;;  %v3779_v52 = vor.u32 %v3417_v48, %v2816_v47  ;;  %v3781_v53 = vor.u32 %v3416_v50, %v2818_v51  ;;  %v2824_v54 = vld [vmem:[%s5647_s0 + $0x10] sm:$0xf]  ;;  %v3419_v55 = vld [vmem:[%s5647_s0 + $0x14] sm:$0xf0]  ;;  %v3418_v56 = vld [vmem:[%s5647_s0 + $0x14] sm:$0xf] }
   0xe   :  { %v2826_v57 = vld [vmem:[%s5647_s0 + $0x18] sm:$0xf0]  ;;  %v3797_v58 = vor.u32 %v3419_v55, %v2824_v54  ;;  %v2936_v59 = vld [vmem:[%s5646_s1 + $0x70] sm:$0xf]  ;;  %v3447_v60 = vld [vmem:[%s5646_s1 + $0x74] sm:$0xf0] }
   0xf   :  { %v3805_v61 = vor.u32 %v3418_v56, %v2826_v57  ;;  %v2937_v62 = vor.u32 %v3447_v60, %v2936_v59  ;;  %v3000_v63 = vld [vmem:[%s5646_s1 + $0xf0] sm:$0xf]  ;;  %v3463_v0 = vld [vmem:[%s5646_s1 + $0xf4] sm:$0xf0]  ;;  %v2928_v2 = vld [vmem:[%s5646_s1 + $0x60] sm:$0xf] }
  0x10   :  { %426 = vmatpush.bf16.msra.mxu2 %v2917_v22  ;;  %v3001_v1 = vor.u32 %v3463_v0, %v3000_v63  ;;  %v3445_v3 = vld [vmem:[%s5646_s1 + $0x64] sm:$0xf0]  ;;  %v2992_v5 = vld [vmem:[%s5646_s1 + $0xe0] sm:$0xf]  ;;  %v2920_v7 = vld [vmem:[%s5646_s1 + $0x50] sm:$0xf] }
  0x11   :  { %475 = vmatpush.bf16.msra.mxu3 %v2981_v23  ;;  %325 = vmatpush.bf16.msra.mxu0 %v2937_v62  ;;  %v2929_v4 = vor.u32 %v3445_v3, %v2928_v2  ;;  %v3461_v6 = vld [vmem:[%s5646_s1 + $0xe4] sm:$0xf0]  ;;  %v3443_v9 = vld [vmem:[%s5646_s1 + $0x54] sm:$0xf0]  ;;  %v2984_v11 = vld [vmem:[%s5646_s1 + $0xd0] sm:$0xf] }
  0x12   :  { %374 = vmatpush.bf16.msra.mxu1 %v3001_v1  ;;  %v2993_v8 = vor.u32 %v3461_v6, %v2992_v5  ;;  %v2921_v10 = vor.u32 %v3443_v9, %v2920_v7  ;;  %v3459_v12 = vld [vmem:[%s5646_s1 + $0xd4] sm:$0xf0]  ;;  %v2912_v13 = vld [vmem:[%s5646_s1 + $0x40] sm:$0xf]  ;;  %v3441_v14 = vld [vmem:[%s5646_s1 + $0x44] sm:$0xf0] }
  0x13   :  { %v2985_v15 = vor.u32 %v3459_v12, %v2984_v11  ;;  %v2913_v16 = vor.u32 %v3441_v14, %v2912_v13  ;;  %v2976_v17 = vld [vmem:[%s5646_s1 + $0xc0] sm:$0xf]  ;;  %v3457_v18 = vld [vmem:[%s5646_s1 + $0xc4] sm:$0xf0]  ;;  %v2904_v19 = vld [vmem:[%s5646_s1 + $0x30] sm:$0xf] }
  0x14   :  { %427 = vmatpush.bf16.msra.mxu2 %v2909_v28  ;;  %v3439_v20 = vld [vmem:[%s5646_s1 + $0x34] sm:$0xf0]  ;;  %v2832_v21 = vld [vmem:[%s5647_s0 + $0x20] sm:$0xf]  ;;  %v3421_v22 = vld [vmem:[%s5647_s0 + $0x24] sm:$0xf0]  ;;  %v2977_v25 = vor.u32 %v3457_v18, %v2976_v17 }
  0x15   :  { %476 = vmatpush.bf16.msra.mxu3 %v2973_v29  ;;  %326 = vmatpush.bf16.msra.mxu0 %v2929_v4  ;;  %v3420_v23 = vld [vmem:[%s5647_s0 + $0x24] sm:$0xf]  ;;  %v2834_v24 = vld [vmem:[%s5647_s0 + $0x28] sm:$0xf0]  ;;  %v2905_v26 = vor.u32 %v3439_v20, %v2904_v19  ;;  %v2968_v27 = vld [vmem:[%s5646_s1 + $0xb0] sm:$0xf]  ;;  %v2833_v29 = vor.u32 %v3421_v22, %v2832_v21 }
  0x16   :  { %375 = vmatpush.bf16.msra.mxu1 %v2993_v8  ;;  %v3455_v28 = vld [vmem:[%s5646_s1 + $0xb4] sm:$0xf0]  ;;  %v2896_v30 = vld [vmem:[%s5646_s1 + $0x20] sm:$0xf]  ;;  %v3437_v31 = vld [vmem:[%s5646_s1 + $0x24] sm:$0xf0]  ;;  %v2837_v32 = vor.u32 %v3420_v23, %v2834_v24 }
  0x17   :  { %v2969_v33 = vor.u32 %v3455_v28, %v2968_v27  ;;  %v3453_v36 = vld [vmem:[%s5646_s1 + $0xa4] sm:$0xf0]  ;;  %v2888_v37 = vld [vmem:[%s5646_s1 + $0x10] sm:$0xf]  ;;  %v3435_v38 = vld [vmem:[%s5646_s1 + $0x14] sm:$0xf0] }
  0x18   :  { %428 = vmatpush.bf16.msra.mxu2 %v2901_v34  ;;  %v2897_v34 = vor.u32 %v3437_v31, %v2896_v30  ;;  %v3451_v42 = vld [vmem:[%s5646_s1 + $0x94] sm:$0xf0]  ;;  %v2880_v43 = vld [vmem:[%s5646_s1] sm:$0xf]  ;;  %v3433_v44 = vld [vmem:[%s5646_s1 + $0x4] sm:$0xf0] }
  0x19   :  { %477 = vmatpush.bf16.msra.mxu3 %v2965_v35  ;;  %327 = vmatpush.bf16.msra.mxu0 %v2921_v10  ;;  %v2960_v35 = vld [vmem:[%s5646_s1 + $0xa0] sm:$0xf]  ;;  %v3449_v48 = vld [vmem:[%s5646_s1 + $0x84] sm:$0xf0]  ;;  %v3423_v50 = vld [vmem:[%s5647_s0 + $0x34] sm:$0xf0] }
  0x1a   :  { %376 = vmatpush.bf16.msra.mxu1 %v2985_v15  ;;  %v2961_v39 = vor.u32 %v3453_v36, %v2960_v35  ;;  %v2944_v47 = vld [vmem:[%s5646_s1 + $0x80] sm:$0xf]  ;;  %v3422_v51 = vld [vmem:[%s5647_s0 + $0x34] sm:$0xf]  ;;  %v2842_v54 = vld [vmem:[%s5647_s0 + $0x38] sm:$0xf0] }
  0x1b   :  { %v2945_v55 = vor.u32 %v3449_v48, %v2944_v47  ;;  %v2845_v57 = vor.u32 %v3422_v51, %v2842_v54  ;;  %v2848_v59 = vld [vmem:[%s5647_s0 + $0x40] sm:$0xf]  ;;  %v2856_v4 = vld [vmem:[%s5647_s0 + $0x50] sm:$0xf]  ;;  %v3427_v5 = vld [vmem:[%s5647_s0 + $0x54] sm:$0xf0] }
  0x1c   :  { %429 = vmatpush.bf16.msra.mxu2 %v2893_v40  ;;  %v2889_v40 = vor.u32 %v3435_v38, %v2888_v37  ;;  %v3942_v62 = vld [vmem:[%s5648_s2] sm:$0x3]  ;;  %v2857_v6 = vor.u32 %v3427_v5, %v2856_v4  ;;  %v3426_v7 = vld [vmem:[%s5647_s0 + $0x54] sm:$0xf]  ;;  %v2858_v8 = vld [vmem:[%s5647_s0 + $0x58] sm:$0xf0] }
  0x1d   :  { %478 = vmatpush.bf16.msra.mxu3 %v2957_v41  ;;  %328 = vmatpush.bf16.msra.mxu0 %v2913_v16  ;;  %v2952_v41 = vld [vmem:[%s5646_s1 + $0x90] sm:$0xf]  ;;  %v3945_v63 = vperm.slane %v3942_v62, 1  ;;  %v2861_v9 = vor.u32 %v3426_v7, %v2858_v8  ;;  %v2864_v14 = vld [vmem:[%s5647_s0 + $0x60] sm:$0xf] }
  0x1e   :  { %377 = vmatpush.bf16.msra.mxu1 %v2977_v25  ;;  %v2953_v45 = vor.u32 %v3451_v42, %v2952_v41  ;;  %v3429_v15 = vld [vmem:[%s5647_s0 + $0x64] sm:$0xf0]  ;;  %v3428_v17 = vld [vmem:[%s5647_s0 + $0x64] sm:$0xf]  ;;  %v2866_v18 = vld [vmem:[%s5647_s0 + $0x68] sm:$0xf0] }
  0x1f   :  { %v2865_v16 = vor.u32 %v3429_v15, %v2864_v14  ;;  %v2869_v19 = vor.u32 %v3428_v17, %v2866_v18  ;;  %v2872_v24 = vld [vmem:[%s5647_s0 + $0x70] sm:$0xf]  ;;  %v3431_v25 = vld [vmem:[%s5647_s0 + $0x74] sm:$0xf0]  ;;  %v3430_v27 = vld [vmem:[%s5647_s0 + $0x74] sm:$0xf] }
  0x20   :  { %430 = vmatpush.bf16.msra.mxu2 %v2885_v46  ;;  %v2881_v46 = vor.u32 %v3433_v44, %v2880_v43  ;;  %v2874_v28 = vld [vmem:[%s5647_s0 + $0x78] sm:$0xf0] }
  0x21   :  { %479 = vmatpush.bf16.msra.mxu3 %v2949_v49  ;;  %329 = vmatpush.bf16.msra.mxu0 %v2905_v26  ;;  %v2840_v49 = vld [vmem:[%s5647_s0 + $0x30] sm:$0xf]  ;;  %v2873_v26 = vor.u32 %v3431_v25, %v2872_v24 }
  0x22   :  { %378 = vmatpush.bf16.msra.mxu1 %v2969_v33  ;;  %v2841_v56 = vor.u32 %v3423_v50, %v2840_v49 }
  0x23   :  { %431 = vmatmul.bf16.vlgmr.msra.gmra.mxu2 %v3779_v52 }
  0x24   :  { %480 = vmatmul.bf16.vlgmr.msra.gmra.mxu3 %v3781_v53 }
  0x25   :  { %330 = vmatpush.bf16.msra.mxu0 %v2897_v34 }
  0x26   :  { %379 = vmatpush.bf16.msra.mxu1 %v2961_v39 }
  0x29   :  { %331 = vmatpush.bf16.msra.mxu0 %v2889_v40 }
  0x2a   :  { %380 = vmatpush.bf16.msra.mxu1 %v2953_v45 }
  0x2d   :  { %332 = vmatpush.bf16.msra.mxu0 %v2881_v46 }
  0x2e   :  { %381 = vmatpush.bf16.msra.mxu1 %v2945_v55 }
  0x30   :  { %333 = vmatmul.bf16.vlgmr.msra.gmra.mxu0 %v3779_v52  ;;  %v3425_v52 = vld [vmem:[%s5647_s0 + $0x44] sm:$0xf0] }
  0x31   :  { %382 = vmatmul.bf16.vlgmr.msra.gmra.mxu1 %v3781_v53  ;;  %v2849_v60 = vor.u32 %v3425_v52, %v2848_v59  ;;  %v3424_v53 = vld [vmem:[%s5647_s0 + $0x44] sm:$0xf] }
  0x33   :  { %436 = vmatmul.bf16.gmra.mxu2 %v3797_v58 }
  0x34   :  { %485 = vmatmul.bf16.gmra.mxu3 %v3805_v61 }
  0x40   :  { %338 = vmatmul.bf16.gmra.mxu0 %v3797_v58  ;;  %v2850_v58 = vld [vmem:[%s5647_s0 + $0x48] sm:$0xf0] }
  0x41   :  { %387 = vmatmul.bf16.gmra.mxu1 %v3805_v61  ;;  %v2853_v61 = vor.u32 %v3424_v53, %v2850_v58 }
  0x43   :  { %441 = vmatmul.bf16.gmra.mxu2 %v2833_v29 }
  0x44   :  { %490 = vmatmul.bf16.gmra.mxu3 %v2837_v32 }
  0x50   :  { %343 = vmatmul.bf16.gmra.mxu0 %v2833_v29  ;;  %v2877_v29 = vor.u32 %v3430_v27, %v2874_v28 }
  0x51   :  { %392 = vmatmul.bf16.gmra.mxu1 %v2837_v32 }
  0x53   :  { %446 = vmatmul.bf16.gmra.mxu2 %v2841_v56 }
  0x54   :  { %495 = vmatmul.bf16.gmra.mxu3 %v2845_v57 }
  0x60   :  { %348 = vmatmul.bf16.gmra.mxu0 %v2841_v56 }
  0x61   :  { %397 = vmatmul.bf16.gmra.mxu1 %v2845_v57 }
  0x63   :  { %451 = vmatmul.bf16.gmra.mxu2 %v2849_v60 }
  0x64   :  { %500 = vmatmul.bf16.gmra.mxu3 %v2853_v61 }
  0x70   :  { %353 = vmatmul.bf16.gmra.mxu0 %v2849_v60 }
  0x71   :  { %402 = vmatmul.bf16.gmra.mxu1 %v2853_v61  ;;  %v3996_v61 = vperm.slane %v3942_v62, 0 }
  0x73   :  { %456 = vmatmul.bf16.gmra.mxu2 %v2857_v6 }
  0x74   :  { %505 = vmatmul.bf16.gmra.mxu3 %v2861_v9 }
  0x80   :  { %358 = vmatmul.bf16.gmra.mxu0 %v2857_v6 }
  0x81   :  { %407 = vmatmul.bf16.gmra.mxu1 %v2861_v9 }
  0x83   :  { %461 = vmatmul.bf16.gmra.mxu2 %v2865_v16 }
  0x84   :  { %510 = vmatmul.bf16.gmra.mxu3 %v2869_v19 }
  0x90   :  { %363 = vmatmul.bf16.gmra.mxu0 %v2865_v16 }
  0x91   :  { %412 = vmatmul.bf16.gmra.mxu1 %v2869_v19 }
  0x93   :  { %466 = vmatmul.bf16.gmra.mxu2 %v2873_v26 }
  0x94   :  { %515 = vmatmul.bf16.gmra.mxu3 %v2877_v29 }
  0xa0   :  { %368 = vmatmul.bf16.gmra.mxu0 %v2873_v26 }
  0xa1   :  { %417 = vmatmul.bf16.gmra.mxu1 %v2877_v29 }
  0xa6   :  { %v432_v0 = vpop.f32.mrf.mxu2 }
  0xa7   :  { %v433_v1 = vadd.f32 %v432_v0, %v3945_v63  ;;  %v481_v2 = vpop.f32.mrf.mxu3 }
  0xa9   :  { %v3948_v3 = vadd.f32 %v481_v2, %v433_v1 }
  0xad   :  { %v334_v31 = vpop.f32.mrf.mxu0 }
  0xae   :  { %v434_v10 = vpop.f32.mrf.mxu2  ;;  %v383_v33 = vpop.f32.mrf.mxu1  ;;  %v335_v2 = vadd.f32 %v334_v31, %v3996_v61 }
  0xaf   :  { %v3962_v11 = vpop.f32.mrf.mxu3  ;;  %v435_v60 = vadd.f32 %v434_v10, %v3945_v63 }
  0xb0   :  { %v384_v6 = vadd.f32 %v383_v33, %v335_v2 }
  0xb1   :  { %v484_v1 = vadd.f32 %v3962_v11, %v435_v60 }
  0xb3   :  { %v525_v5 = vpack.c.bf16 %v484_v1, %v3948_v3 }
  0xb5   :  { %v336_v35 = vpop.f32.mrf.mxu0 }
  0xb6   :  { %v437_v12 = vpop.f32.mrf.mxu2  ;;  %v385_v37 = vpop.f32.mrf.mxu1  ;;  %v337_v4 = vadd.f32 %v336_v35, %v3996_v61 }
  0xb7   :  { %v486_v13 = vpop.f32.mrf.mxu3  ;;  %v438_v57 = vadd.f32 %v437_v12, %v3945_v63 }
  0xb8   :  { %v386_v7 = vadd.f32 %v385_v37, %v337_v4 }
  0xb9   :  { %v487_v52 = vadd.f32 %v486_v13, %v438_v57 }
  0xba   :  { %v521_v10 = vpack.c.bf16 %v386_v7, %v384_v6  ;;  %v3473_v7 = vld [vmem:[%s5649_s4 + $0x38] sm:$0xff] }
  0xbb   :  { %903 = vmatpush.bf16.msrb.mxu1 %v3473_v7 }
  0xbd   :  { %v339_v42 = vpop.f32.mrf.mxu0 }
  0xbe   :  { %v439_v20 = vpop.f32.mrf.mxu2  ;;  %v388_v45 = vpop.f32.mrf.mxu1  ;;  %v340_v62 = vadd.f32 %v339_v42, %v3996_v61 }
  0xbf   :  { %v488_v21 = vpop.f32.mrf.mxu3  ;;  %v440_v54 = vadd.f32 %v439_v20, %v3945_v63 }
  0xc0   :  { %v389_v11 = vadd.f32 %v388_v45, %v340_v62  ;;  %v3471_v62 = vld [vmem:[%s5649_s4 + $0x28] sm:$0xff] }
  0xc1   :  { %v489_v59 = vadd.f32 %v488_v21, %v440_v54 }
  0xc3   :  { %v526_v53 = vpack.c.bf16 %v489_v59, %v487_v52 }
  0xc5   :  { %v341_v51 = vpop.f32.mrf.mxu0 }
  0xc6   :  { %v442_v22 = vpop.f32.mrf.mxu2  ;;  %v390_v56 = vpop.f32.mrf.mxu1  ;;  %v342_v13 = vadd.f32 %v341_v51, %v3996_v61 }
  0xc7   :  { %v491_v23 = vpop.f32.mrf.mxu3  ;;  %v443_v48 = vadd.f32 %v442_v22, %v3945_v63 }
  0xc8   :  { %v391_v15 = vadd.f32 %v390_v56, %v342_v13  ;;  %v3479_v13 = vld [vmem:[%s5649_s4 + $0x68] sm:$0xff] }
  0xc9   :  { %v492_v50 = vadd.f32 %v491_v23, %v443_v48 }
  0xca   :  { %v522_v16 = vpack.c.bf16 %v391_v15, %v389_v11  ;;  %v3478_v11 = vld [vmem:[%s5649_s4 + $0x60] sm:$0xff]  ;;  %v3469_v15 = vld [vmem:[%s5649_s4 + $0x18] sm:$0xff] }
  0xcd   :  { %v344_v58 = vpop.f32.mrf.mxu0 }
  0xce   :  { %v444_v30 = vpop.f32.mrf.mxu2  ;;  %v393_v0 = vpop.f32.mrf.mxu1  ;;  %v345_v3 = vadd.f32 %v344_v58, %v3996_v61 }
  0xcf   :  { %v493_v32 = vpop.f32.mrf.mxu3  ;;  %v445_v46 = vadd.f32 %v444_v30, %v3945_v63 }
  0xd0   :  { %v394_v22 = vadd.f32 %v393_v0, %v345_v3 }
  0xd1   :  { %v494_v49 = vadd.f32 %v493_v32, %v445_v46 }
  0xd3   :  { %v527_v55 = vpack.c.bf16 %v494_v49, %v492_v50 }
  0xd5   :  { %v346_v8 = vpop.f32.mrf.mxu0 }
  0xd6   :  { %v447_v34 = vpop.f32.mrf.mxu2  ;;  %v395_v9 = vpop.f32.mrf.mxu1  ;;  %v347_v19 = vadd.f32 %v346_v8, %v3996_v61  ;;  %v3481_v8 = vld [vmem:[%s5649_s4 + $0x78] sm:$0xff] }
  0xd7   :  { %v496_v36 = vpop.f32.mrf.mxu3  ;;  %v448_v38 = vadd.f32 %v447_v34, %v3945_v63  ;;  %3548 = vmatpush.bf16.msrb.mxu2 %v3481_v8 }
  0xd8   :  { %v396_v23 = vadd.f32 %v395_v9, %v347_v19  ;;  %v3472_v9 = vld [vmem:[%s5649_s4 + $0x30] sm:$0xff] }
  0xd9   :  { %v497_v43 = vadd.f32 %v496_v36, %v448_v38  ;;  %904 = vmatpush.bf16.msrb.mxu1 %v3472_v9 }
  0xda   :  { %v523_v25 = vpack.c.bf16 %v396_v23, %v394_v22  ;;  %v3476_v22 = vld [vmem:[%s5649_s4 + $0x50] sm:$0xff] }
  0xdd   :  { %v349_v12 = vpop.f32.mrf.mxu0  ;;  %905 = vmatpush.bf16.msrb.mxu1 %v3471_v62 }
  0xde   :  { %v449_v39 = vpop.f32.mrf.mxu2  ;;  %v398_v14 = vpop.f32.mrf.mxu1  ;;  %v350_v29 = vadd.f32 %v349_v12, %v3996_v61 }
  0xdf   :  { %v450_v40 = vadd.f32 %v449_v39, %v3945_v63  ;;  %v498_v41 = vpop.f32.mrf.mxu3 }
  0xe0   :  { %v399_v33 = vadd.f32 %v398_v14, %v350_v29  ;;  %v3470_v14 = vld [vmem:[%s5649_s4 + $0x20] sm:$0xff] }
  0xe1   :  { %v499_v44 = vadd.f32 %v498_v41, %v450_v40  ;;  %906 = vmatpush.bf16.msrb.mxu1 %v3470_v14 }
  0xe3   :  { %v528_v47 = vpack.c.bf16 %v499_v44, %v497_v43 }
  0xe5   :  { %533 = vmatpush.bf16.xpose.msrb.mxu0 %v528_v47  ;;  %v351_v17 = vpop.f32.mrf.mxu0  ;;  %907 = vmatpush.bf16.msrb.mxu1 %v3469_v15 }
  0xe6   :  { %v400_v18 = vpop.f32.mrf.mxu1  ;;  %v352_v30 = vadd.f32 %v351_v17, %v3996_v61 }
  0xe8   :  { %v401_v34 = vadd.f32 %v400_v18, %v352_v30  ;;  %v3466_v30 = vld [vmem:[%s5649_s4] sm:$0xff] }
  0xea   :  { %v524_v36 = vpack.c.bf16 %v401_v34, %v399_v33  ;;  %v3008_v33 = vld [vmem:[%s5650_s3] sm:$0xf]  ;;  %v3465_v34 = vld [vmem:[%s5650_s3 + $0x4] sm:$0xf0] }
  0xed   :  { %534 = vmatpush.bf16.xpose.msrb.mxu0 %v527_v55  ;;  %v354_v20 = vpop.f32.mrf.mxu0 }
  0xee   :  { %v403_v21 = vpop.f32.mrf.mxu1  ;;  %v355_v24 = vadd.f32 %v354_v20, %v3996_v61 }
  0xf0   :  { %v4009_v27 = vadd.f32 %v403_v21, %v355_v24  ;;  %v3468_v21 = vld [vmem:[%s5649_s4 + $0x10] sm:$0xff]  ;;  %v3467_v24 = vld [vmem:[%s5649_s4 + $0x8] sm:$0xff] }
  0xf1   :  { %908 = vmatpush.bf16.msrb.mxu1 %v3468_v21 }
  0xf5   :  { %535 = vmatpush.bf16.xpose.msrb.mxu0 %v526_v53  ;;  %v4007_v26 = vpop.f32.mrf.mxu0  ;;  %909 = vmatpush.bf16.msrb.mxu1 %v3467_v24 }
  0xf6   :  { %v4011_v28 = vpop.f32.mrf.mxu1 }
  0xf9   :  { %910 = vmatpush.bf16.msrb.mxu1 %v3466_v30  ;;  %v4169_v30 = vpop.f32.mrf.mxu2 }
  0xfd   :  { %536 = vmatpush.bf16.xpose.msrb.mxu0 %v525_v5  ;;  %v359_v31 = vpop.f32.mrf.mxu0 }
  0xfe   :  { %v408_v32 = vpop.f32.mrf.mxu1  ;;  %v360_v35 = vadd.f32 %v359_v31, %v3996_v61  ;;  %v3474_v31 = vld [vmem:[%s5649_s4 + $0x40] sm:$0xff] }
 0x100   :  { %v4018_v38 = vadd.f32 %v408_v32, %v360_v35  ;;  %v3464_v35 = vld [vmem:[%s5650_s3 + $0x4] sm:$0xf] }
 0x104   :  { %537 = vmatmul.bf16.vlgmr.msrb.gmra.mxu0 %v521_v10  ;;  %v3480_v10 = vld [vmem:[%s5649_s4 + $0x70] sm:$0xff] }
 0x105   :  { %v4016_v37 = vpop.f32.mrf.mxu0  ;;  %921 = vmatpush.bf16.msra.mxu0 %v3481_v8  ;;  %3549 = vmatpush.bf16.msrb.mxu2 %v3480_v10 }
 0x106   :  { %v4020_v39 = vpop.f32.mrf.mxu1 }
 0x109   :  { %922 = vmatpush.bf16.msra.mxu0 %v3480_v10  ;;  %3550 = vmatpush.bf16.msrb.mxu2 %v3479_v13 }
 0x10d   :  { %v364_v40 = vpop.f32.mrf.mxu0  ;;  %923 = vmatpush.bf16.msra.mxu0 %v3479_v13  ;;  %3551 = vmatpush.bf16.msrb.mxu2 %v3478_v11 }
 0x10e   :  { %v413_v41 = vpop.f32.mrf.mxu1  ;;  %v365_v42 = vadd.f32 %v364_v40, %v3996_v61  ;;  %v3010_v40 = vld [vmem:[%s5650_s3 + $0x8] sm:$0xf0] }
 0x110   :  { %v4023_v43 = vadd.f32 %v413_v41, %v365_v42  ;;  %v3013_v41 = vor.u32 %v3464_v35, %v3010_v40 }
 0x111   :  { %924 = vmatpush.bf16.msra.mxu0 %v3478_v11 }
 0x114   :  { %542 = vmatmul.bf16.gmra.mxu0 %v522_v16  ;;  %v3477_v16 = vld [vmem:[%s5649_s4 + $0x58] sm:$0xff] }
 0x115   :  { %v4025_v44 = vpop.f32.mrf.mxu0  ;;  %925 = vmatpush.bf16.msra.mxu0 %v3477_v16  ;;  %3552 = vmatpush.bf16.msrb.mxu2 %v3477_v16 }
 0x116   :  { %v4027_v45 = vpop.f32.mrf.mxu1 }
 0x119   :  { %926 = vmatpush.bf16.msra.mxu0 %v3476_v22  ;;  %3553 = vmatpush.bf16.msrb.mxu2 %v3476_v22 }
 0x11d   :  { %v369_v46 = vpop.f32.mrf.mxu0 }
 0x11e   :  { %v370_v47 = vadd.f32 %v369_v46, %v3996_v61  ;;  %v418_v48 = vpop.f32.mrf.mxu1 }
 0x120   :  { %v4030_v49 = vadd.f32 %v418_v48, %v370_v47 }
 0x124   :  { %547 = vmatmul.bf16.gmra.mxu0 %v523_v25  ;;  %v3475_v25 = vld [vmem:[%s5649_s4 + $0x48] sm:$0xff] }
 0x125   :  { %v4032_v50 = vpop.f32.mrf.mxu0  ;;  %927 = vmatpush.bf16.msra.mxu0 %v3475_v25  ;;  %3554 = vmatpush.bf16.msrb.mxu2 %v3475_v25 }
 0x129   :  { %928 = vmatpush.bf16.msra.mxu0 %v3474_v31  ;;  %3555 = vmatpush.bf16.msrb.mxu2 %v3474_v31 }
 0x134   :  { %552 = vmatmul.bf16.gmra.mxu0 %v524_v36  ;;  %v3009_v36 = vor.u32 %v3465_v34, %v3008_v33 }
 0x136   :  { %911 = vmatmul.bf16.vlgmr.msrb.gmra.mxu1 %v3009_v36 }
 0x144   :  { %929 = vmatmul.bf16.vlgmr.msra.gmra.mxu0 %v3013_v41 }
 0x181   :  { %v4034_v51 = vpop.f32.mrf.mxu0 }
 0x182   :  { %v559_v6 = vsel %vm558_vm0, %v4034_v51, -inf }
 0x189   :  { %v4036_v54 = vpop.f32.mrf.mxu0 }
 0x18a   :  { %v562_v1 = vsel %vm558_vm0, %v4036_v54, -inf }
 0x191   :  { %v4038_v55 = vpop.f32.mrf.mxu0 }
 0x192   :  { %v565_v56 = vsel %vm558_vm0, %v4038_v55, -inf }
 0x193   :  { %566 = vmax.xlane.f32.xlu2 %v565_v56 }
 0x199   :  { %v545_v57 = vpop.f32.mrf.mxu0 }
 0x19a   :  { %v568_v59 = vsel %vm558_vm0, %v545_v57, -inf }
 0x19b   :  { %569 = vmax.xlane.f32.xlu2 %v568_v59 }
 0x1a1   :  { %v548_v52 = vpop.f32.mrf.mxu0 }
 0x1a2   :  { %v571_v60 = vsel %vm558_vm0, %v548_v52, -inf }
 0x1a3   :  { %572 = vmax.xlane.f32.xlu1 %v571_v60 }
 0x1a9   :  { %v4044_v53 = vpop.f32.mrf.mxu0 }
 0x1aa   :  { %v574_v58 = vsel %vm558_vm0, %v4044_v53, -inf }
 0x1ab   :  { %575 = vmax.xlane.f32.xlu1 %v574_v58 }
 0x1b1   :  { %v4048_v0 = vpop.f32.mrf.mxu0 }
 0x1b2   :  { %v577_v2 = vsel %vm558_vm0, %v4048_v0, -inf }
 0x1b3   :  { %563 = vmax.xlane.f32.xlu1 %v562_v1  ;;  %578 = vmax.xlane.f32.xlu0 %v577_v2 }
 0x1b9   :  { %v4054_v4 = vpop.f32.mrf.mxu0 }
 0x1ba   :  { %v580_v5 = vsel %vm558_vm0, %v4054_v4, -inf }
 0x1bb   :  { %581 = vmax.xlane.f32.xlu0 %v580_v5 }
 0x1c3   :  { %560 = vmax.xlane.f32.xlu0 %v559_v6 }
 0x206   :  { %v4072_v12 = vpop.xlane.xlu2 %566 }
 0x207   :  { %v585_v1 = vsub.f32 %v4038_v55, %v4072_v12 }
 0x20e   :  { %v570_v17 = vpop.xlane.xlu2 %569 }
 0x20f   :  { %v586_v19 = vsub.f32 %v545_v57, %v570_v17  ;;  %v757_v17 = vld [vmem:[%s5650_s3 + $0x10] sm:$0x77] }
 0x211   :  { %v597_v23 = vmul.f32 1.442695, %v586_v19  ;;  %v797_v19 = vunpack.c.l.b16 %v757_v17 }
 0x216   :  { %v573_v18 = vpop.xlane.xlu1 %572 }
 0x217   :  { %v587_v3 = vsub.f32 %v548_v52, %v573_v18  ;;  %v798_v18 = vunpack.c.h.b16 %v757_v17 }
 0x219   :  { %v599_v20 = vmul.f32 1.442695, %v587_v3  ;;  %v802_v3 = vpack.c.b16 %v798_v18, %v798_v18 }
 0x21b   :  { %3561 = vpow2.f32 %v599_v20  ;;  %934 = vmatmul.bf16.vlgmr.msrb.gmra.mxu2 %v802_v3  ;;  %v801_v20 = vpack.c.b16 %v797_v19, %v797_v19 }
 0x21c   :  { %3563 = vpow2.f32 %v597_v23 }
 0x21d   :  { %916 = vmatmul.bf16.gmra.mxu1 %v801_v20 }
 0x21e   :  { %v576_v47 = vpop.xlane.xlu1 %575 }
 0x21f   :  { %v588_v57 = vsub.f32 %v4044_v53, %v576_v47 }
 0x221   :  { %v4104_v29 = vpop.eup %3561  ;;  %v601_v52 = vmul.f32 1.442695, %v588_v57 }
 0x222   :  { %v619_v32 = vsel %vm558_vm0, %v4104_v29, 0.0  ;;  %v4126_v46 = vpop.eup %3563 }
 0x223   :  { %620 = vadd.xlane.f32.xlu1 %v619_v32  ;;  %v616_v59 = vsel %vm558_vm0, %v4126_v46, 0.0 }
 0x226   :  { %v579_v42 = vpop.xlane.xlu0 %578  ;;  %v564_v6 = vpop.xlane.xlu1 %563 }
 0x227   :  { %v589_v48 = vsub.f32 %v4048_v0, %v579_v42  ;;  %v595_v0 = vmul.f32 1.442695, %v585_v1  ;;  %v584_v55 = vsub.f32 %v4036_v54, %v564_v6  ;;  %v4185_v42 = vpop.f32.mrf.mxu2 }
 0x229   :  { %v603_v56 = vmul.f32 1.442695, %v589_v48  ;;  %v593_v13 = vmul.f32 1.442695, %v584_v55  ;;  %v4188_v48 = vpop.f32.mrf.mxu3 }
 0x22b   :  { %617 = vadd.xlane.f32.xlu1 %v616_v59  ;;  %3565 = vpow2.f32 %v603_v56 }
 0x22c   :  { %3567 = vpow2.f32 %v601_v52 }
 0x22e   :  { %v582_v60 = vpop.xlane.xlu0 %581 }
 0x22f   :  { %v590_v58 = vsub.f32 %v4054_v4, %v582_v60 }
 0x231   :  { %v605_v2 = vmul.f32 1.442695, %v590_v58  ;;  %v4135_v5 = vpop.eup %3565  ;;  %v4225_v3 = vpop.f32.mrf.mxu3 }
 0x232   :  { %v625_v53 = vsel %vm558_vm0, %v4135_v5, 0.0  ;;  %v4140_v9 = vpop.eup %3567 }
 0x233   :  { %3569 = vpow2.f32 %v605_v2  ;;  %626 = vadd.xlane.f32.xlu2 %v625_v53  ;;  %v622_v62 = vsel %vm558_vm0, %v4140_v9, 0.0 }
 0x234   :  { %3571 = vpow2.f32 %v595_v0 }
 0x236   :  { %v561_v7 = vpop.xlane.xlu0 %560 }
 0x237   :  { %v583_v8 = vsub.f32 %v4034_v51, %v561_v7 }
 0x239   :  { %v4142_v4 = vpop.eup %3569  ;;  %v591_v10 = vmul.f32 1.442695, %v583_v8 }
 0x23a   :  { %v628_v12 = vsel %vm558_vm0, %v4142_v4, 0.0  ;;  %v4149_v14 = vpop.eup %3571 }
 0x23b   :  { %3573 = vpow2.f32 %v591_v10  ;;  %629 = vadd.xlane.f32.xlu0 %v628_v12  ;;  %623 = vadd.xlane.f32.xlu2 %v622_v62  ;;  %v613_v11 = vsel %vm558_vm0, %v4149_v14, 0.0 }
 0x23c   :  { %3575 = vpow2.f32 %v593_v13 }
 0x241   :  { %v4151_v51 = vpop.eup %3573 }
 0x242   :  { %v607_v54 = vsel %vm558_vm0, %v4151_v51, 0.0  ;;  %v4157_v15 = vpop.eup %3575 }
 0x243   :  { %614 = vadd.xlane.f32.xlu0 %v613_v11  ;;  %608 = vadd.xlane.f32.xlu2 %v607_v54  ;;  %v610_v16 = vsel %vm558_vm0, %v4157_v15, 0.0 }
 0x24b   :  { %611 = vadd.xlane.f32.xlu0 %v610_v16  ;;  %v4220_v16 = vpop.f32.mrf.mxu2 }
 0x296   :  { %v621_v21 = vpop.xlane.xlu1 %620 }
 0x297   :  { %3577 = vrcp.f32 %v621_v21  ;;  %v700_v56 = vand.u32 2147483647, %v621_v21  ;;  %v702_v57 = vand.u32 2147483648, %v621_v21  ;;  %vm696_vm2 = vweird.f32 %v621_v21 }
 0x299   :  { %vm701_vm4 = vcmp.eq.f32.partialorder %v700_v56, 8.507059e+37  ;;  %v703_v0 = vor.u32 1.1754944e-38, %v702_v57 }
 0x29d   :  { %v3578_v22 = vpop.eup %3577 }
 0x29e   :  { %v4164_v23 = vpop.xlane.xlu1 %617  ;;  %v692_v24 = vmul.f32 %v3578_v22, %v621_v21  ;;  %vm697_vm1 = vweird.f32 %v3578_v22 }
 0x29f   :  { %3579 = vrcp.f32 %v4164_v23  ;;  %v687_v60 = vand.u32 2147483648, %v4164_v23  ;;  %vm4191_vm3 = vmor %vm696_vm2, %vm697_vm1  ;;  %vm681_vm5 = vweird.f32 %v4164_v23  ;;  %v685_v8 = vand.u32 2147483647, %v4164_v23 }
 0x2a0   :  { %v693_v31 = vsub.f32 1.0, %v692_v24 }
 0x2a1   :  { %v4206_v55 = vor.u32 1.1754944e-38, %v687_v60  ;;  %vm4230_vm9 = vcmp.eq.f32.partialorder %v685_v8, 8.507059e+37 }
 0x2a2   :  { %v694_v33 = vmul.f32 %v3578_v22, %v693_v31 }
 0x2a4   :  { %v695_v47 = vadd.f32 %v3578_v22, %v694_v33 }
 0x2a5   :  { %v4172_v32 = vpop.eup %3579 }
 0x2a6   :  { %v4167_v25 = vpop.xlane.xlu2 %626  ;;  %v677_v34 = vmul.f32 %v4172_v32, %v4164_v23  ;;  %v699_v1 = vsel %vm4191_vm3, %v3578_v22, %v695_v47  ;;  %vm682_vm6 = vweird.f32 %v4172_v32  ;;  %v4249_v47 = vpop.f32.mrf.mxu1 }
 0x2a7   :  { %3581 = vrcp.f32 %v4167_v25  ;;  %v730_v62 = vand.u32 2147483647, %v4167_v25  ;;  %v4218_v54 = vsel %vm701_vm4, %v703_v0, %v699_v1  ;;  %vm726_vm8 = vweird.f32 %v4167_v25  ;;  %vm4255_vm15 = vmor %vm681_vm5, %vm682_vm6 }
 0x2a8   :  { %v678_v59 = vsub.f32 1.0, %v677_v34  ;;  %v732_v20 = vand.u32 2147483648, %v4167_v25 }
 0x2a9   :  { %vm4242_vm12 = vcmp.eq.f32.partialorder %v730_v62, 8.507059e+37 }
 0x2aa   :  { %v679_v6 = vmul.f32 %v4172_v32, %v678_v59  ;;  %v733_v23 = vor.u32 1.1754944e-38, %v732_v20  ;;  %v4301_v20 = vpop.f32.mrf.mxu3 }
 0x2ac   :  { %v680_v19 = vadd.f32 %v4172_v32, %v679_v6 }
 0x2ad   :  { %v4176_v35 = vpop.eup %3581 }
 0x2ae   :  { %v4178_v36 = vpop.xlane.xlu0 %629  ;;  %v722_v40 = vmul.f32 %v4176_v35, %v4167_v25  ;;  %v4182_v41 = vpop.xlane.xlu2 %623  ;;  %vm727_vm7 = vweird.f32 %v4176_v35  ;;  %v684_v1 = vsel %vm4255_vm15, %v4172_v32, %v680_v19 }
 0x2af   :  { %3583 = vrcp.f32 %v4178_v36  ;;  %v717_v24 = vand.u32 2147483648, %v4182_v41  ;;  %v747_v33 = vand.u32 2147483648, %v4178_v36  ;;  %vm4238_vm11 = vmor %vm726_vm8, %vm727_vm7  ;;  %vm741_vm14 = vweird.f32 %v4178_v36 }
 0x2b0   :  { %3585 = vrcp.f32 %v4182_v41  ;;  %v723_v52 = vsub.f32 1.0, %v722_v40  ;;  %v715_v59 = vand.u32 2147483647, %v4182_v41  ;;  %v745_v60 = vand.u32 2147483647, %v4178_v36 }
 0x2b1   :  { %vm711_vm1 = vweird.f32 %v4182_v41  ;;  %v718_v32 = vor.u32 1.1754944e-38, %v717_v24  ;;  %v689_v56 = vsel %vm4230_vm9, %v4206_v55, %v684_v1 }
 0x2b2   :  { %v724_v2 = vmul.f32 %v4176_v35, %v723_v52  ;;  %vm716_vm4 = vcmp.eq.f32.partialorder %v715_v59, 8.507059e+37  ;;  %vm746_vm5 = vcmp.eq.f32.partialorder %v745_v60, 8.507059e+37  ;;  %v912_v60 = vpop.f32.mrf.mxu1  ;;  %v690_v1 = vmul.f32 %v4126_v46, %v689_v56 }
 0x2b4   :  { %v725_v17 = vadd.f32 %v4176_v35, %v724_v2 }
 0x2b5   :  { %v4198_v53 = vpop.eup %3583 }
 0x2b6   :  { %v4202_v7 = vpop.eup %3585  ;;  %v737_v10 = vmul.f32 %v4198_v53, %v4178_v36  ;;  %v4210_v12 = vpop.xlane.xlu0 %614  ;;  %vm742_vm10 = vweird.f32 %v4198_v53  ;;  %v729_v57 = vsel %vm4238_vm11, %v4176_v35, %v725_v17 }
 0x2b7   :  { %v707_v13 = vmul.f32 %v4202_v7, %v4182_v41  ;;  %v4215_v11 = vpop.xlane.xlu2 %608  ;;  %3587 = vrcp.f32 %v4210_v12  ;;  %vm712_vm13 = vweird.f32 %v4202_v7  ;;  %vm4272_vm2 = vmor %vm741_vm14, %vm742_vm10  ;;  %v748_v41 = vor.u32 1.1754944e-38, %v747_v33 }
 0x2b8   :  { %v738_v18 = vsub.f32 1.0, %v737_v10  ;;  %3589 = vrcp.f32 %v4215_v11  ;;  %vm4280_vm3 = vmor %vm711_vm1, %vm712_vm13  ;;  %v734_v17 = vsel %vm4242_vm12, %v733_v23, %v729_v57  ;;  %v670_v19 = vand.u32 2147483647, %v4210_v12  ;;  %v930_v23 = vpop.f32.mrf.mxu0 }
 0x2b9   :  { %v708_v21 = vsub.f32 1.0, %v707_v13  ;;  %v735_v34 = vmul.f32 %v4135_v5, %v734_v17  ;;  %vm666_vm7 = vweird.f32 %v4210_v12  ;;  %vm636_vm9 = vweird.f32 %v4215_v11 }
 0x2ba   :  { %v739_v31 = vmul.f32 %v4198_v53, %v738_v18  ;;  %v4298_v18 = vpop.f32.mrf.mxu2  ;;  %vm671_vm10 = vcmp.eq.f32.partialorder %v670_v19, 8.507059e+37 }
 0x2bb   :  { %v709_v25 = vmul.f32 %v4202_v7, %v708_v21 }
 0x2bc   :  { %v740_v52 = vadd.f32 %v4198_v53, %v739_v31 }
 0x2bd   :  { %v3588_v58 = vpop.eup %3587  ;;  %v710_v2 = vadd.f32 %v4202_v7, %v709_v25 }
 0x2be   :  { %v4276_v0 = vpop.eup %3589  ;;  %v744_v6 = vsel %vm4272_vm2, %v4198_v53, %v740_v52  ;;  %v662_v8 = vmul.f32 %v3588_v58, %v4210_v12  ;;  %v4288_v10 = vpop.xlane.xlu0 %611  ;;  %vm667_vm6 = vweird.f32 %v3588_v58 }
 0x2bf   :  { %v714_v62 = vsel %vm4280_vm3, %v4202_v7, %v710_v2  ;;  %v632_v13 = vmul.f32 %v4276_v0, %v4215_v11  ;;  %3591 = vrcp.f32 %v4288_v10  ;;  %v672_v7 = vand.u32 2147483648, %v4210_v12  ;;  %vm668_vm8 = vmor %vm666_vm7, %vm667_vm6 }
 0x2c0   :  { %v663_v53 = vsub.f32 1.0, %v662_v8  ;;  %v749_v24 = vsel %vm746_vm5, %v748_v41, %v744_v6  ;;  %v719_v31 = vsel %vm716_vm4, %v718_v32, %v714_v62  ;;  %vm637_vm11 = vweird.f32 %v4276_v0  ;;  %v4324_v6 = vpop.f32.mrf.mxu3 }
 0x2c1   :  { %v633_v21 = vsub.f32 1.0, %v632_v13  ;;  %v750_v40 = vmul.f32 %v4142_v4, %v749_v24  ;;  %v720_v52 = vmul.f32 %v4140_v9, %v719_v31  ;;  %v673_v5 = vor.u32 1.1754944e-38, %v672_v7  ;;  %vm4328_vm12 = vmor %vm636_vm9, %vm637_vm11  ;;  %v914_v7 = vpop.f32.mrf.mxu1 }
 0x2c2   :  { %v664_v33 = vmul.f32 %v3588_v58, %v663_v53  ;;  %v705_v4 = vmul.f32 %v4104_v29, %v4218_v54  ;;  %v642_v9 = vand.u32 2147483648, %v4215_v11  ;;  %v4320_v36 = vpop.f32.mrf.mxu2  ;;  %v640_v29 = vand.u32 2147483647, %v4215_v11 }
 0x2c3   :  { %v634_v25 = vmul.f32 %v4276_v0, %v633_v21  ;;  %v754_v59 = vpack.c.bf16 %v750_v40, %v735_v34  ;;  %v655_v8 = vand.u32 2147483647, %v4288_v10  ;;  %v657_v46 = vand.u32 2147483648, %v4288_v10 }
 0x2c4   :  { %v665_v57 = vadd.f32 %v3588_v58, %v664_v33  ;;  %v753_v32 = vpack.c.bf16 %v720_v52, %v705_v4  ;;  %v643_v13 = vor.u32 1.1754944e-38, %v642_v9  ;;  %vm641_vm14 = vcmp.eq.f32.partialorder %v640_v29, 8.507059e+37  ;;  %v3112_v9 = vld [vmem:[%s5651_s6 + $0x18] sm:$0xf0] }
 0x2c5   :  { %v3592_v2 = vpop.eup %3591  ;;  %v635_v35 = vadd.f32 %v4276_v0, %v634_v25  ;;  %951 = vmatpush.bf16.msra.mxu1 %v754_v59  ;;  %3556 = vmatpush.bf16.msrb.mxu3 %v754_v59  ;;  %vm651_vm15 = vweird.f32 %v4288_v10  ;;  %v658_v53 = vor.u32 1.1754944e-38, %v657_v46  ;;  %vm656_vm2 = vcmp.eq.f32.partialorder %v655_v8, 8.507059e+37  ;;  %v3486_v46 = vld [vmem:[%s5651_s6 + $0x4] sm:$0xf] }
 0x2c6   :  { %v669_v55 = vsel %vm668_vm8, %v3588_v58, %v665_v57  ;;  %v647_v22 = vmul.f32 %v3592_v2, %v4288_v10  ;;  %1360 = vmatpush.bf16.msrb.mxu0 %v754_v59  ;;  %vm652_vm13 = vweird.f32 %v3592_v2  ;;  %v931_v25 = vadd.f32 %v930_v23, %v912_v60  ;;  %v3128_v60 = vld [vmem:[%s5651_s6 + $0x38] sm:$0xf0] }
 0x2c7   :  { %v674_v12 = vsel %vm671_vm10, %v673_v5, %v669_v55  ;;  %v639_v11 = vsel %vm4328_vm12, %v4276_v0, %v635_v35  ;;  %vm653_vm1 = vmor %vm651_vm15, %vm652_vm13  ;;  %v932_v0 = vpop.f32.mrf.mxu0  ;;  %v453_v52 = vadd.f32 %v4169_v30, %v3945_v63  ;;  %v3490_v30 = vld [vmem:[%s5651_s6 + $0x24] sm:$0xf]  ;;  %vm967_vm3 = vcmask 520192  }
 0x2c8   :  { %v648_v54 = vsub.f32 1.0, %v647_v22  ;;  %v675_v58 = vmul.f32 %v4149_v14, %v674_v12  ;;  %v644_v19 = vsel %vm641_vm14, %v643_v13, %v639_v11  ;;  %v511_v40 = vpop.f32.mrf.mxu3  ;;  %v933_v56 = vadd.f32 %v932_v0, %v914_v7  ;;  %v3482_v55 = vld [vmem:[%s5652_s5] sm:$0xff]  ;;  %v3488_v22 = vld [vmem:[%s5651_s6 + $0x14] sm:$0xf]  ;;  %v3104_v11 = vld [vmem:[%s5651_s6 + $0x8] sm:$0xf0] }
 0x2c9   :  { %952 = vmatpush.bf16.msra.mxu1 %v753_v32  ;;  %3557 = vmatpush.bf16.msrb.mxu3 %v753_v32  ;;  %v645_v33 = vmul.f32 %v4151_v51, %v644_v19  ;;  %v502_v51 = vadd.f32 %v4188_v48, %v453_v52  ;;  %v3120_v48 = vld [vmem:[%s5651_s6 + $0x28] sm:$0xf0]  ;;  %v3115_v12 = vor.u32 %v3488_v22, %v3112_v9  ;;  %v3484_v52 = vld [vmem:[%s5652_s5 + $0x10] sm:$0xff] }
 0x2ca   :  { %v649_v62 = vmul.f32 %v3592_v2, %v648_v54  ;;  %v752_v14 = vpack.c.bf16 %v690_v1, %v675_v58  ;;  %1361 = vmatpush.bf16.msrb.mxu0 %v753_v32  ;;  %v464_v31 = vpop.f32.mrf.mxu2  ;;  %v939_v57 = vpack.c.bf16 %v933_v56, %v931_v25  ;;  %v3123_v35 = vor.u32 %v3490_v30, %v3120_v48  ;;  %v917_v54 = vpop.f32.mrf.mxu1  ;;  %v3483_v25 = vld [vmem:[%s5652_s5 + $0x8] sm:$0xff] }
 0x2cb   :  { %v465_v19 = vadd.f32 %v464_v31, %v3945_v63  ;;  %v460_v56 = vadd.f32 %v4298_v18, %v3945_v63  ;;  %v455_v31 = vadd.f32 %v4185_v42, %v3945_v63  ;;  %v3485_v18 = vld [vmem:[%s5652_s5 + $0x18] sm:$0xff] }
 0x2cc   :  { %v650_v17 = vadd.f32 %v3592_v2, %v649_v62  ;;  %v3493_v42 = vld [vmem:[%s5651_s6 + $0x34] sm:$0xf0] }
 0x2cd   :  { %953 = vmatpush.bf16.msra.mxu1 %v752_v14  ;;  %3558 = vmatpush.bf16.msrb.mxu3 %v752_v14 }
 0x2ce   :  { %v654_v21 = vsel %vm653_vm1, %v3592_v2, %v650_v17  ;;  %1362 = vmatpush.bf16.msrb.mxu0 %v752_v14 }
 0x2cf   :  { %v659_v24 = vsel %vm656_vm2, %v658_v53, %v654_v21  ;;  %v463_v53 = vadd.f32 %v4320_v36, %v3945_v63  ;;  %v509_v36 = vadd.f32 %v4324_v6, %v460_v56  ;;  %v3491_v6 = vld [vmem:[%s5651_s6 + $0x24] sm:$0xf0] }
 0x2d0   :  { %v660_v34 = vmul.f32 %v4157_v15, %v659_v24  ;;  %v513_v5 = vpop.f32.mrf.mxu3  ;;  %v3492_v15 = vld [vmem:[%s5651_s6 + $0x34] sm:$0xf] }
 0x2d1   :  { %v512_v0 = vadd.f32 %v511_v40, %v463_v53  ;;  %v514_v24 = vadd.f32 %v513_v5, %v465_v19  ;;  %v3110_v5 = vld [vmem:[%s5651_s6 + $0x10] sm:$0xf]  ;;  %v372_v19 = vadd.f32 %v4032_v50, %v3996_v61 }
 0x2d2   :  { %v751_v10 = vpack.c.bf16 %v660_v34, %v645_v33  ;;  %v467_v2 = vpop.f32.mrf.mxu2  ;;  %v919_v21 = vpop.f32.mrf.mxu1  ;;  %v458_v33 = vadd.f32 %v4220_v16, %v3945_v63  ;;  %v504_v16 = vadd.f32 %v4225_v3, %v455_v31  ;;  %v3496_v50 = vld [vmem:[%s5652_s5 + $0x30] sm:$0xff] }
 0x2d3   :  { %v468_v1 = vadd.f32 %v467_v2, %v3945_v63  ;;  %v1669_v34 = vpack.c.bf16 %v514_v24, %v512_v0  ;;  %v421_v21 = vadd.f32 %v4249_v47, %v372_v19 }
 0x2d4   :  { %954 = vmatpush.bf16.msra.mxu1 %v751_v10  ;;  %3559 = vmatpush.bf16.msrb.mxu3 %v751_v10 }
 0x2d5   :  { %1363 = vmatpush.bf16.msrb.mxu0 %v751_v10 }
 0x2d7   :  { %3078 = vmatmul.msk.bf16.vlgmr.msra.gmra.mxu1 %vm558_vm0, %v939_v57  ;;  %v1667_v57 = vpack.c.bf16 %v504_v16, %v502_v51  ;;  %v3489_v51 = vld [vmem:[%s5651_s6 + $0x14] sm:$0xf0] }
 0x2d8   :  { %1013 = vmatpush.bf16.msrb.mxu1 %v754_v59  ;;  %v3131_v59 = vor.u32 %v3492_v15, %v3128_v60  ;;  %v516_v4 = vpop.f32.mrf.mxu3  ;;  %v3111_v15 = vor.u32 %v3489_v51, %v3110_v5  ;;  %v3102_v60 = vld [vmem:[%s5651_s6] sm:$0xf]  ;;  %v3186_v51 = vld [vmem:[%s5651_s6 + $0x30] sm:$0xf] }
 0x2d9   :  { %v517_v58 = vadd.f32 %v516_v4, %v468_v1 }
 0x2da   :  { %v469_v23 = vpop.f32.mrf.mxu2  ;;  %1135 = vmatpush.bf16.msra.mxu3 %v3131_v59  ;;  %v3487_v59 = vld [vmem:[%s5651_s6 + $0x4] sm:$0xf0] }
 0x2db   :  { %v470_v29 = vadd.f32 %v469_v23, %v3945_v63  ;;  %v3126_v63 = vld [vmem:[%s5651_s6 + $0x30] sm:$0xf]  ;;  %v3103_v23 = vor.u32 %v3487_v59, %v3102_v60 }
 0x2dc   :  { %1014 = vmatpush.bf16.msrb.mxu1 %v753_v32  ;;  %v3127_v3 = vor.u32 %v3493_v42, %v3126_v63  ;;  %v3188_v63 = vld [vmem:[%s5651_s6 + $0x38] sm:$0xf0] }
 0x2de   :  { %1136 = vmatpush.bf16.msra.mxu3 %v3123_v35  ;;  %1106 = vmatpush.bf16.msra.mxu2 %v3127_v3  ;;  %v3502_v3 = vld [vmem:[%s5651_s6 + $0x24] sm:$0xf] }
 0x2e0   :  { %1015 = vmatpush.bf16.msrb.mxu1 %v752_v14  ;;  %v518_v41 = vpop.f32.mrf.mxu3  ;;  %v3107_v14 = vor.u32 %v3486_v46, %v3104_v11 }
 0x2e1   :  { %v519_v62 = vadd.f32 %v518_v41, %v470_v29 }
 0x2e2   :  { %v935_v32 = vpop.f32.mrf.mxu2  ;;  %1137 = vmatpush.bf16.msra.mxu3 %v3115_v12 }
 0x2e3   :  { %v936_v8 = vadd.f32 %v935_v32, %v917_v54  ;;  %v1670_v17 = vpack.c.bf16 %v519_v62, %v517_v58 }
 0x2e4   :  { %1016 = vmatpush.bf16.msrb.mxu1 %v751_v10  ;;  %v507_v10 = vadd.f32 %v4301_v20, %v458_v33  ;;  %v3118_v20 = vld [vmem:[%s5651_s6 + $0x20] sm:$0xf]  ;;  %v3497_v33 = vld [vmem:[%s5652_s5 + $0x38] sm:$0xff] }
 0x2e5   :  { %v940_v13 = vpack.c.bf16 %v936_v8, %v936_v8  ;;  %v3119_v2 = vor.u32 %v3491_v6, %v3118_v20  ;;  %v357_v8 = vadd.f32 %v4007_v26, %v3996_v61  ;;  %v3180_v20 = vld [vmem:[%s5651_s6 + $0x28] sm:$0xf0] }
 0x2e6   :  { %1138 = vmatpush.bf16.msra.mxu3 %v3107_v14  ;;  %v1668_v40 = vpack.c.bf16 %v509_v36, %v507_v10 }
 0x2e7   :  { %3096 = vmatmul.msk.bf16.vlgmr.msrb.gmra.mxu1 %vm558_vm0, %v3482_v55  ;;  %3079 = vmatmul.msk.bf16.vlgmr.msrb.gmra.mxu3 %vm558_vm0, %v940_v13  ;;  %v406_v11 = vadd.f32 %v4011_v28, %v357_v8  ;;  %v362_v13 = vadd.f32 %v4016_v37, %v3996_v61  ;;  %v367_v28 = vadd.f32 %v4025_v44, %v3996_v61 }
 0x2e8   :  { %1107 = vmatpush.bf16.msra.mxu2 %v3119_v2  ;;  %v1666_v37 = vpack.c.bf16 %v421_v21, %v4030_v49  ;;  %v3183_v2 = vor.u32 %v3502_v3, %v3180_v20  ;;  %v3512_v3 = vld [vmem:[%s5649_s4 + $0x20] sm:$0xff]  ;;  %v3511_v20 = vld [vmem:[%s5649_s4 + $0x18] sm:$0xff] }
 0x2e9   :  { %v1663_v62 = vpack.c.bf16 %v406_v11, %v4009_v27  ;;  %v416_v27 = vadd.f32 %v4027_v45, %v367_v28  ;;  %v3499_v11 = vld [vmem:[%s5651_s6 + $0x4] sm:$0xf0] }
 0x2ea   :  { %1675 = vmatpush.bf16.xpose.msrb.mxu3 %v1670_v17  ;;  %v937_v7 = vpop.f32.mrf.mxu2  ;;  %v411_v17 = vadd.f32 %v4020_v39, %v362_v13  ;;  %v3495_v39 = vld [vmem:[%s5652_s5 + $0x28] sm:$0xff] }
 0x2eb   :  { %v1665_v53 = vpack.c.bf16 %v416_v27, %v4023_v43 }
 0x2ec   :  { %1108 = vmatpush.bf16.msra.mxu2 %v3111_v15  ;;  %v1664_v26 = vpack.c.bf16 %v411_v17, %v4018_v38  ;;  %v3494_v38 = vld [vmem:[%s5652_s5 + $0x20] sm:$0xff]  ;;  %v3505_v15 = vld [vmem:[%s5651_s6 + $0x34] sm:$0xf0] }
 0x2ed   :  { %3156 = vmatmul.msk.bf16.vlgmr.msrb.gmra.mxu0 %vm558_vm0, %v3494_v38  ;;  %v3187_v59 = vor.u32 %v3505_v15, %v3186_v51  ;;  %v3508_v51 = vld [vmem:[%s5649_s4] sm:$0xff] }
 0x2ef   :  { %1453 = vmatpush.bf16.msra.mxu1 %v3187_v59  ;;  %v3507_v59 = vld [vmem:[%s5650_s3 + $0x1c] sm:$0xf0] }
 0x2f0   :  { %1109 = vmatpush.bf16.msra.mxu2 %v3103_v23  ;;  %v3500_v23 = vld [vmem:[%s5651_s6 + $0x14] sm:$0xf] }
 0x2f2   :  { %1676 = vmatpush.bf16.xpose.msrb.mxu3 %v1669_v34 }
 0x2f7   :  { %3097 = vmatmul.msk.bf16.gmra.mxu1 %vm558_vm0, %v3483_v25 }
 0x2fa   :  { %1677 = vmatpush.bf16.xpose.msrb.mxu3 %v1668_v40 }
 0x2fd   :  { %3157 = vmatmul.msk.bf16.gmra.mxu0 %vm558_vm0, %v3495_v39 }
 0x302   :  { %1678 = vmatpush.bf16.xpose.msrb.mxu3 %v1667_v57 }
 0x307   :  { %3098 = vmatmul.msk.bf16.gmra.mxu1 %vm558_vm0, %v3484_v52 }
 0x30d   :  { %3158 = vmatmul.msk.bf16.gmra.mxu0 %vm558_vm0, %v3496_v50 }
 0x317   :  { %3099 = vmatmul.msk.bf16.gmra.mxu1 %vm558_vm0, %v3485_v18  ;;  %v3504_v18 = vld [vmem:[%s5651_s6 + $0x34] sm:$0xf] }
 0x318   :  { %v3191_v42 = vor.u32 %v3504_v18, %v3188_v63  ;;  %v3515_v18 = vld [vmem:[%s5649_s4 + $0x38] sm:$0xff]  ;;  %v3514_v63 = vld [vmem:[%s5649_s4 + $0x30] sm:$0xff] }
 0x319   :  { %2045 = vmatpush.bf16.msra.mxu0 %v3515_v18 }
 0x31a   :  { %1482 = vmatpush.bf16.msrb.mxu2 %v3191_v42  ;;  %v3513_v42 = vld [vmem:[%s5649_s4 + $0x28] sm:$0xff] }
 0x31d   :  { %3159 = vmatmul.msk.bf16.gmra.mxu0 %vm558_vm0, %v3497_v33 }
 0x31e   :  { %1483 = vmatpush.bf16.msrb.mxu2 %v3183_v2  ;;  %2046 = vmatpush.bf16.msra.mxu0 %v3514_v63  ;;  %v3510_v2 = vld [vmem:[%s5649_s4 + $0x10] sm:$0xff] }
 0x322   :  { %2047 = vmatpush.bf16.msra.mxu0 %v3513_v42 }
 0x326   :  { %2048 = vmatpush.bf16.msra.mxu0 %v3512_v3 }
 0x32a   :  { %2049 = vmatpush.bf16.msra.mxu0 %v3511_v20 }
 0x32e   :  { %2050 = vmatpush.bf16.msra.mxu0 %v3510_v2 }
 0x354   :  { %v956_v4 = vpop.f32.mrf.mxu1 }
 0x355   :  { %965 = vst.msk [vmem:[%s5653_s7] sm:$0xff] %vm558_vm0, %v956_v4  ;;  %v3172_v4 = vld [vmem:[%s5651_s6 + $0x18] sm:$0xf0] }
 0x35c   :  { %v958_v30 = vpop.f32.mrf.mxu1 }
 0x35d   :  { %966 = vst.msk [vmem:[%s5653_s7 + $0x8] sm:$0xff] %vm558_vm0, %v958_v30  ;;  %v3175_v30 = vor.u32 %v3500_v23, %v3172_v4  ;;  %v3523_v4 = vld [vmem:[%s5649_s4 + $0x78] sm:$0xff] }
 0x35f   :  { %1484 = vmatpush.bf16.msrb.mxu2 %v3175_v30  ;;  %v3522_v30 = vld [vmem:[%s5649_s4 + $0x70] sm:$0xff] }
 0x364   :  { %v1018_v48 = vpop.f32.mrf.mxu1 }
 0x36a   :  { %v961_v46 = vpop.f32.mrf.mxu3  ;;  %v1365_v60 = vpop.f32.mrf.mxu0 }
 0x36b   :  { %968 = vst.msk [vmem:[%s5653_s7 + $0x10] sm:$0x1f] %vm967_vm3, %v961_v46  ;;  %v3162_v46 = vld [vmem:[%s5651_s6] sm:$0xf] }
 0x36c   :  { %v1020_v35 = vpop.f32.mrf.mxu1 }
 0x36d   :  { %v1038_v55 = vpack.c.bf16 %v1020_v35, %v1018_v48  ;;  %v3178_v48 = vld [vmem:[%s5651_s6 + $0x20] sm:$0xf]  ;;  %v3503_v35 = vld [vmem:[%s5651_s6 + $0x24] sm:$0xf0] }
 0x36f   :  { %3136 = vmatmul.msk.bf16.vlgmr.msra.gmra.mxu3 %vm558_vm0, %v1038_v55  ;;  %3132 = vmatmul.msk.bf16.vlgmr.msra.gmra.mxu2 %vm558_vm0, %v1038_v55  ;;  %v3179_v55 = vor.u32 %v3503_v35, %v3178_v48  ;;  %v3521_v35 = vld [vmem:[%s5649_s4 + $0x68] sm:$0xff] }
 0x371   :  { %1454 = vmatpush.bf16.msra.mxu1 %v3179_v55 }
 0x372   :  { %v963_v14 = vpop.f32.mrf.mxu3 }
 0x374   :  { %v1023_v22 = vpop.f32.mrf.mxu1 }
 0x37c   :  { %v1025_v9 = vpop.f32.mrf.mxu1 }
 0x37d   :  { %v1039_v12 = vpack.c.bf16 %v1025_v9, %v1023_v22  ;;  %v3498_v22 = vld [vmem:[%s5651_s6 + $0x4] sm:$0xf]  ;;  %v3164_v9 = vld [vmem:[%s5651_s6 + $0x8] sm:$0xf0] }
 0x37f   :  { %3137 = vmatmul.msk.bf16.gmra.mxu3 %vm558_vm0, %v1039_v12  ;;  %3133 = vmatmul.msk.bf16.gmra.mxu2 %vm558_vm0, %v1039_v12 }
 0x384   :  { %v1028_v1 = vpop.f32.mrf.mxu1 }
 0x38c   :  { %v1030_v29 = vpop.f32.mrf.mxu1 }
 0x38d   :  { %v1040_v54 = vpack.c.bf16 %v1030_v29, %v1028_v1  ;;  %v3167_v1 = vor.u32 %v3498_v22, %v3164_v9 }
 0x38f   :  { %3138 = vmatmul.msk.bf16.gmra.mxu3 %vm558_vm0, %v1040_v54  ;;  %3134 = vmatmul.msk.bf16.gmra.mxu2 %vm558_vm0, %v1040_v54  ;;  %v3170_v54 = vld [vmem:[%s5651_s6 + $0x10] sm:$0xf] }
 0x390   :  { %1485 = vmatpush.bf16.msrb.mxu2 %v3167_v1  ;;  %v3520_v1 = vld [vmem:[%s5649_s4 + $0x60] sm:$0xff] }
 0x394   :  { %v1033_v32 = vpop.f32.mrf.mxu1 }
 0x39c   :  { %v1035_v58 = vpop.f32.mrf.mxu1 }
 0x39d   :  { %v1041_v41 = vpack.c.bf16 %v1035_v58, %v1033_v32  ;;  %v3501_v32 = vld [vmem:[%s5651_s6 + $0x14] sm:$0xf0]  ;;  %v1367_v58 = vpop.f32.mrf.mxu0 }
 0x39e   :  { %v1385_v8 = vpack.c.bf16 %v1367_v58, %v1365_v60  ;;  %v3205_v60 = vld [vmem:[%s5650_s3 + $0x18] sm:$0xf] }
 0x39f   :  { %3139 = vmatmul.msk.bf16.gmra.mxu3 %vm558_vm0, %v1041_v41  ;;  %3135 = vmatmul.msk.bf16.gmra.mxu2 %vm558_vm0, %v1041_v41  ;;  %v3171_v41 = vor.u32 %v3501_v32, %v3170_v54  ;;  %v3206_v23 = vor.u32 %v3507_v59, %v3205_v60 }
 0x3a1   :  { %1455 = vmatpush.bf16.msra.mxu1 %v3171_v41 }
 0x3af   :  { %1679 = vmatmul.bf16.vlgmr.msrb.gmra.mxu3 %v1663_v62  ;;  %3196 = vmatmul.msk.bf16.vlgmr.msrb.gmra.mxu2 %vm558_vm0, %v1385_v8  ;;  %v3163_v62 = vor.u32 %v3499_v11, %v3162_v46 }
 0x3b1   :  { %1456 = vmatpush.bf16.msra.mxu1 %v3163_v62  ;;  %v3518_v62 = vld [vmem:[%s5649_s4 + $0x50] sm:$0xff] }
 0x3b4   :  { %3192 = vmatmul.msk.bf16.vlgmr.msra.gmra.mxu1 %vm558_vm0, %v1385_v8 }
 0x3bf   :  { %1684 = vmatmul.bf16.gmra.mxu3 %v1664_v26  ;;  %v1370_v26 = vpop.f32.mrf.mxu0 }
 0x3cf   :  { %1689 = vmatmul.bf16.gmra.mxu3 %v1665_v53  ;;  %v1372_v53 = vpop.f32.mrf.mxu0 }
 0x3d0   :  { %v1386_v19 = vpack.c.bf16 %v1372_v53, %v1370_v26 }
 0x3d2   :  { %3197 = vmatmul.msk.bf16.gmra.mxu2 %vm558_vm0, %v1386_v19  ;;  %3193 = vmatmul.msk.bf16.gmra.mxu1 %vm558_vm0, %v1386_v19  ;;  %v3516_v19 = vld [vmem:[%s5649_s4 + $0x40] sm:$0xff] }
 0x3df   :  { %1694 = vmatmul.bf16.gmra.mxu3 %v1666_v37  ;;  %v1375_v37 = vpop.f32.mrf.mxu0 }
 0x3e7   :  { %v1377_v38 = vpop.f32.mrf.mxu0 }
 0x3e8   :  { %v1387_v39 = vpack.c.bf16 %v1377_v38, %v1375_v37  ;;  %v3207_v37 = vld [vmem:[%s5650_s3 + $0x20] sm:$0xf0] }
 0x3ea   :  { %3198 = vmatmul.msk.bf16.gmra.mxu2 %vm558_vm0, %v1387_v39  ;;  %3194 = vmatmul.msk.bf16.gmra.mxu1 %vm558_vm0, %v1387_v39 }
 0x3ef   :  { %v1380_v50 = vpop.f32.mrf.mxu0 }
 0x3f2   :  { %v4467_v43 = vpop.f32.mrf.mxu3  ;;  %v4469_v61 = vpop.f32.mrf.mxu2 }
 0x3f3   :  { %v1184_v44 = vmax.f32 %v4469_v61, %v4467_v43  ;;  %v1160_v3 = vmin.f32 %v4469_v61, %v4467_v43 }
 0x3f7   :  { %v1382_v33 = vpop.f32.mrf.mxu0 }
 0x3fa   :  { %v4473_v45 = vpop.f32.mrf.mxu3  ;;  %v4475_v49 = vpop.f32.mrf.mxu2 }
 0x402   :  { %v4481_v47 = vpop.f32.mrf.mxu3  ;;  %v4483_v7 = vpop.f32.mrf.mxu2 }
 0x403   :  { %v1190_v0 = vmax.f32 %v4483_v7, %v4481_v47 }
 0x40a   :  { %v4487_v24 = vpop.f32.mrf.mxu3  ;;  %v4613_v15 = vpop.f32.mrf.mxu2 }
 0x412   :  { %v4493_v34 = vpop.f32.mrf.mxu3  ;;  %v4627_v48 = vpop.f32.mrf.mxu2 }
 0x41a   :  { %v4495_v25 = vpop.f32.mrf.mxu3  ;;  %v4645_v41 = vpop.f32.mrf.mxu2 }
 0x422   :  { %v4497_v56 = vpop.f32.mrf.mxu3 }
 0x42a   :  { %v4499_v10 = vpop.f32.mrf.mxu3 }
 0x432   :  { %v4501_v36 = vpop.f32.mrf.mxu3 }
 0x433   :  { %v1700_v28 = vsel %vm558_vm0, %v4501_v36, -inf }
 0x43a   :  { %v4503_v31 = vpop.f32.mrf.mxu3 }
 0x43b   :  { %v1703_v21 = vsel %vm558_vm0, %v4503_v31, -inf }
 0x442   :  { %v4505_v40 = vpop.f32.mrf.mxu3 }
 0x443   :  { %v1706_v27 = vsel %vm558_vm0, %v4505_v40, -inf }
 0x44a   :  { %v4507_v16 = vpop.f32.mrf.mxu3 }
 0x44b   :  { %v1709_v5 = vsel %vm558_vm0, %v4507_v16, -inf }
 0x452   :  { %v4509_v57 = vpop.f32.mrf.mxu3 }
 0x453   :  { %v1712_v52 = vsel %vm558_vm0, %v4509_v57, -inf }
 0x454   :  { %1713 = vmax.xlane.f32.xlu0 %v1712_v52  ;;  %v1388_v52 = vpack.c.bf16 %v1382_v33, %v1380_v50 }
 0x456   :  { %3199 = vmatmul.msk.bf16.gmra.mxu2 %vm558_vm0, %v1388_v52  ;;  %3195 = vmatmul.msk.bf16.gmra.mxu1 %vm558_vm0, %v1388_v52 }
 0x45a   :  { %v4525_v6 = vpop.f32.mrf.mxu3 }
 0x45b   :  { %v1715_v13 = vsel %vm558_vm0, %v4525_v6, -inf }
 0x45c   :  { %1710 = vmax.xlane.f32.xlu0 %v1709_v5  ;;  %v3509_v5 = vld [vmem:[%s5649_s4 + $0x8] sm:$0xff] }
 0x45d   :  { %2051 = vmatpush.bf16.msra.mxu0 %v3509_v5 }
 0x461   :  { %2052 = vmatpush.bf16.msra.mxu0 %v3508_v51 }
 0x462   :  { %v4553_v12 = vpop.f32.mrf.mxu3 }
 0x463   :  { %v1718_v29 = vsel %vm558_vm0, %v4553_v12, -inf }
 0x464   :  { %1719 = vmax.xlane.f32.xlu1 %v1718_v29  ;;  %2053 = vmatmul.bf16.vlgmr.msra.gmra.mxu0 %v3206_v23  ;;  %v4639_v29 = vld [vmem:[%s5650_s3 + $0x28] sm:$0x77] }
 0x465   :  { %2063 = vmatpush.bf16.msrb.mxu0 %v3523_v4  ;;  %v1939_v54 = vunpack.c.l.b16 %v4639_v29  ;;  %v1169_v4 = vmin.f32 %v4613_v15, %v4487_v24 }
 0x467   :  { %v1943_v32 = vpack.c.b16 %v1939_v54, %v1939_v54 }
 0x469   :  { %2064 = vmatpush.bf16.msrb.mxu0 %v3522_v30 }
 0x46a   :  { %v4570_v14 = vpop.f32.mrf.mxu3 }
 0x46b   :  { %v1721_v17 = vsel %vm558_vm0, %v4570_v14, -inf }
 0x46c   :  { %1716 = vmax.xlane.f32.xlu1 %v1715_v13  ;;  %1722 = vmax.xlane.f32.xlu2 %v1721_v17  ;;  %v3517_v17 = vld [vmem:[%s5649_s4 + $0x48] sm:$0xff] }
 0x46d   :  { %2065 = vmatpush.bf16.msrb.mxu0 %v3521_v35 }
 0x471   :  { %2066 = vmatpush.bf16.msrb.mxu0 %v3520_v1 }
 0x474   :  { %1701 = vmax.xlane.f32.xlu1 %v1700_v28  ;;  %1707 = vmax.xlane.f32.xlu2 %v1706_v27  ;;  %v4661_v27 = vpop.f32.mrf.mxu2 }
 0x475   :  { %2058 = vmatmul.bf16.gmra.mxu0 %v1943_v32  ;;  %v1178_v32 = vmin.f32 %v4661_v27, %v4497_v56 }
 0x47c   :  { %1704 = vmax.xlane.f32.xlu2 %v1703_v21  ;;  %v4682_v2 = vpop.f32.mrf.mxu2 }
 0x4c7   :  { %v1714_v55 = vpop.xlane.xlu0 %1713 }
 0x4c8   :  { %v1728_v22 = vsub.f32 %v4509_v57, %v1714_v55  ;;  %v3519_v57 = vld [vmem:[%s5649_s4 + $0x58] sm:$0xff]  ;;  %v4696_v55 = vpop.f32.mrf.mxu1 }
 0x4c9   :  { %2067 = vmatpush.bf16.msrb.mxu0 %v3519_v57  ;;  %5687 = vst [vmem:[#allocation2_spill] sm:$0xff] %v4696_v55 }
 0x4ca   :  { %v1740_v9 = vmul.f32 1.442695, %v1728_v22 }
 0x4cc   :  { %3593 = vpow2.f32 %v1740_v9 }
 0x4cd   :  { %2068 = vmatpush.bf16.msrb.mxu0 %v3518_v62 }
 0x4cf   :  { %v1711_v58 = vpop.xlane.xlu0 %1710 }
 0x4d0   :  { %v1727_v8 = vsub.f32 %v4507_v16, %v1711_v58  ;;  %v4712_v62 = vpop.f32.mrf.mxu1 }
 0x4d1   :  { %2069 = vmatpush.bf16.msrb.mxu0 %v3517_v17  ;;  %5689 = vst [vmem:[#allocation4_spill] sm:$0xff] %v4712_v62 }
 0x4d2   :  { %v4648_v46 = vpop.eup %3593  ;;  %v1738_v11 = vmul.f32 1.442695, %v1727_v8  ;;  %v1940_v8 = vunpack.c.h.b16 %v4639_v29  ;;  %v1187_v29 = vmax.f32 %v4475_v49, %v4473_v45 }
 0x4d3   :  { %v1760_v13 = vsel %vm558_vm0, %v4648_v46, 0.0 }
 0x4d4   :  { %3595 = vpow2.f32 %v1738_v11  ;;  %1761 = vadd.xlane.f32.xlu2 %v1760_v13 }
 0x4d5   :  { %2070 = vmatpush.bf16.msrb.mxu0 %v3516_v19 }
 0x4d7   :  { %v1720_v26 = vpop.xlane.xlu1 %1719 }
 0x4d8   :  { %v1730_v16 = vsub.f32 %v4553_v12, %v1720_v26  ;;  %v3506_v12 = vld [vmem:[%s5650_s3 + $0x1c] sm:$0xf]  ;;  %v1163_v26 = vmin.f32 %v4475_v49, %v4473_v45 }
 0x4d9   :  { %v3210_v38 = vor.u32 %v3506_v12, %v3207_v37  ;;  %v1196_v12 = vmax.f32 %v4627_v48, %v4493_v34  ;;  %v1166_v37 = vmin.f32 %v4483_v7, %v4481_v47 }
 0x4da   :  { %v4659_v28 = vpop.eup %3595  ;;  %v1744_v53 = vmul.f32 1.442695, %v1730_v16 }
 0x4db   :  { %v1757_v21 = vsel %vm558_vm0, %v4659_v28, 0.0  ;;  %2071 = vmatmul.bf16.vlgmr.msrb.gmra.mxu0 %v3210_v38  ;;  %v1205_v38 = vmax.f32 %v4682_v2, %v4499_v10 }
 0x4dc   :  { %3597 = vpow2.f32 %v1744_v53  ;;  %1758 = vadd.xlane.f32.xlu2 %v1757_v21  ;;  %v4724_v53 = vpop.f32.mrf.mxu1  ;;  %v1172_v21 = vmin.f32 %v4627_v48, %v4493_v34 }
 0x4dd   :  { %5691 = vst [vmem:[#allocation6_spill] sm:$0xff] %v4724_v53 }
 0x4df   :  { %v1717_v39 = vpop.xlane.xlu1 %1716  ;;  %v1723_v50 = vpop.xlane.xlu2 %1722 }
 0x4e0   :  { %v1729_v33 = vsub.f32 %v4525_v6, %v1717_v39  ;;  %v1731_v52 = vsub.f32 %v4570_v14, %v1723_v50  ;;  %v1181_v39 = vmin.f32 %v4682_v2, %v4499_v10 }
 0x4e2   :  { %v4676_v18 = vpop.eup %3597  ;;  %v1742_v63 = vmul.f32 1.442695, %v1729_v33  ;;  %v1746_v42 = vmul.f32 1.442695, %v1731_v52  ;;  %v1175_v52 = vmin.f32 %v4645_v41, %v4495_v25 }
 0x4e3   :  { %v1766_v20 = vsel %vm558_vm0, %v4676_v18, 0.0 }
 0x4e4   :  { %3599 = vpow2.f32 %v1742_v63  ;;  %1767 = vadd.xlane.f32.xlu0 %v1766_v20  ;;  %1161 = vmin.xlane.f32.xlu2 %v1160_v3  ;;  %v4738_v50 = vpop.f32.mrf.mxu1  ;;  %v1199_v20 = vmax.f32 %v4645_v41, %v4495_v25 }
 0x4e5   :  { %3601 = vpow2.f32 %v1746_v42  ;;  %5693 = vst [vmem:[#allocation8_spill] sm:$0xff] %v4738_v50 }
 0x4e7   :  { %v1702_v5 = vpop.xlane.xlu1 %1701  ;;  %v1708_v6 = vpop.xlane.xlu2 %1707 }
 0x4e8   :  { %v1724_v14 = vsub.f32 %v4501_v36, %v1702_v5  ;;  %v1726_v51 = vsub.f32 %v4505_v40, %v1708_v6  ;;  %v4698_v40 = vpop.f32.mrf.mxu2  ;;  %v1193_v5 = vmax.f32 %v4613_v15, %v4487_v24 }
 0x4e9   :  { %5688 = vst [vmem:[#allocation3_spill] sm:$0xff] %v4698_v40 }
 0x4ea   :  { %v4686_v60 = vpop.eup %3599  ;;  %v1732_v59 = vmul.f32 1.442695, %v1724_v14  ;;  %v1736_v23 = vmul.f32 1.442695, %v1726_v51  ;;  %v1202_v51 = vmax.f32 %v4661_v27, %v4497_v56 }
 0x4eb   :  { %v4690_v30 = vpop.eup %3601  ;;  %v1763_v35 = vsel %vm558_vm0, %v4686_v60, 0.0 }
 0x4ec   :  { %3603 = vpow2.f32 %v1732_v59  ;;  %1764 = vadd.xlane.f32.xlu0 %v1763_v35  ;;  %1170 = vmin.xlane.f32.xlu2 %v1169_v4  ;;  %v1769_v36 = vsel %vm558_vm0, %v4690_v30, 0.0  ;;  %v4747_v63 = vpop.f32.mrf.mxu1  ;;  %v1531_v59 = vmax.f32 %v4696_v55, %v4698_v40 }
 0x4ed   :  { %3605 = vpow2.f32 %v1736_v23  ;;  %1770 = vadd.xlane.f32.xlu1 %v1769_v36  ;;  %5695 = vst [vmem:[#allocation10_spill] sm:$0xff] %v4747_v63 }
 0x4ef   :  { %v1705_v22 = vpop.xlane.xlu2 %1704 }
 0x4f0   :  { %v1725_v9 = vsub.f32 %v4503_v31, %v1705_v22  ;;  %v1944_v31 = vpack.c.b16 %v1940_v8, %v1940_v8  ;;  %v4714_v13 = vpop.f32.mrf.mxu2 }
 0x4f1   :  { %5690 = vst [vmem:[#allocation5_spill] sm:$0xff] %v4714_v13  ;;  %v1510_v4 = vmin.f32 %v4712_v62, %v4714_v13  ;;  %v1534_v8 = vmax.f32 %v4712_v62, %v4714_v13 }
 0x4f2   :  { %v4701_v1 = vpop.eup %3603  ;;  %v1734_v54 = vmul.f32 1.442695, %v1725_v9  ;;  %2076 = vmatmul.bf16.gmra.mxu0 %v1944_v31  ;;  %v4794_v31 = vpop.f32.mrf.mxu0 }
 0x4f3   :  { %v4705_v57 = vpop.eup %3605  ;;  %v1748_v58 = vsel %vm558_vm0, %v4701_v1, 0.0 }
 0x4f4   :  { %3607 = vpow2.f32 %v1734_v54  ;;  %1749 = vadd.xlane.f32.xlu0 %v1748_v58  ;;  %v1754_v11 = vsel %vm558_vm0, %v4705_v57, 0.0  ;;  %1179 = vmin.xlane.f32.xlu2 %v1178_v32 }
 0x4f5   :  { %1755 = vadd.xlane.f32.xlu1 %v1754_v11 }
 0x4f8   :  { %v4726_v19 = vpop.f32.mrf.mxu2 }
 0x4f9   :  { %5692 = vst [vmem:[#allocation7_spill] sm:$0xff] %v4726_v19  ;;  %v1513_v3 = vmin.f32 %v4724_v53, %v4726_v19 }
 0x4fa   :  { %v4716_v17 = vpop.eup %3607 }
 0x4fb   :  { %v1751_v16 = vsel %vm558_vm0, %v4716_v17, 0.0 }
 0x4fc   :  { %1164 = vmin.xlane.f32.xlu0 %v1163_v26  ;;  %1188 = vmax.xlane.f32.xlu2 %v1187_v29  ;;  %v1537_v26 = vmax.f32 %v4724_v53, %v4726_v19  ;;  %v4798_v29 = vpop.f32.mrf.mxu0 }
 0x4fd   :  { %1752 = vadd.xlane.f32.xlu1 %v1751_v16 }
 0x500   :  { %v4740_v33 = vpop.f32.mrf.mxu2 }
 0x501   :  { %5694 = vst [vmem:[#allocation9_spill] sm:$0xff] %v4740_v33  ;;  %v1516_v23 = vmin.f32 %v4738_v50, %v4740_v33  ;;  %v1540_v22 = vmax.f32 %v4738_v50, %v4740_v33 }
 0x504   :  { %1173 = vmin.xlane.f32.xlu0 %v1172_v21  ;;  %1197 = vmax.xlane.f32.xlu2 %v1196_v12  ;;  %v4802_v12 = vpop.f32.mrf.mxu0 }
 0x505   :  { %1167 = vmin.xlane.f32.xlu1 %v1166_v37 }
 0x508   :  { %v4749_v42 = vpop.f32.mrf.mxu2 }
 0x509   :  { %5696 = vst [vmem:[#allocation11_spill] sm:$0xff] %v4749_v42  ;;  %v1519_v54 = vmin.f32 %v4747_v63, %v4749_v42  ;;  %v1543_v21 = vmax.f32 %v4747_v63, %v4749_v42 }
 0x50c   :  { %1206 = vmax.xlane.f32.xlu2 %v1205_v38  ;;  %1182 = vmin.xlane.f32.xlu0 %v1181_v39 }
 0x50d   :  { %1176 = vmin.xlane.f32.xlu1 %v1175_v52 }
 0x510   :  { %v4762_v6 = vpop.f32.mrf.mxu2 }
 0x511   :  { %5698 = vst [vmem:[#allocation13_spill] sm:$0xff] %v4762_v6 }
 0x514   :  { %1191 = vmax.xlane.f32.xlu0 %v1190_v0  ;;  %1514 = vmin.xlane.f32.xlu2 %v1513_v3  ;;  %v4760_v0 = vpop.f32.mrf.mxu1  ;;  %v2061_v3 = vpop.f32.mrf.mxu0 }
 0x515   :  { %1185 = vmax.xlane.f32.xlu1 %v1184_v44  ;;  %5697 = vst [vmem:[#allocation12_spill] sm:$0xff] %v4760_v0  ;;  %v1522_v14 = vmin.f32 %v4760_v0, %v4762_v6  ;;  %v1507_v44 = vmin.f32 %v4696_v55, %v4698_v40  ;;  %v1546_v38 = vmax.f32 %v4760_v0, %v4762_v6 }
 0x518   :  { %v4778_v36 = vpop.f32.mrf.mxu2 }
 0x519   :  { %5700 = vst [vmem:[#allocation15_spill] sm:$0xff] %v4778_v36 }
 0x51c   :  { %1200 = vmax.xlane.f32.xlu0 %v1199_v20  ;;  %1523 = vmin.xlane.f32.xlu2 %v1522_v14  ;;  %v4776_v35 = vpop.f32.mrf.mxu1 }
 0x51d   :  { %1194 = vmax.xlane.f32.xlu1 %v1193_v5  ;;  %5699 = vst [vmem:[#allocation14_spill] sm:$0xff] %v4776_v35  ;;  %v1525_v9 = vmin.f32 %v4776_v35, %v4778_v36  ;;  %v1549_v39 = vmax.f32 %v4776_v35, %v4778_v36 }
 0x520   :  { %v4788_v58 = vpop.f32.mrf.mxu2 }
 0x521   :  { %5702 = vst [vmem:[#allocation17_spill] sm:$0xff] %v4788_v58 }
 0x524   :  { %1508 = vmin.xlane.f32.xlu0 %v1507_v44  ;;  %1532 = vmax.xlane.f32.xlu2 %v1531_v59  ;;  %v4786_v32 = vpop.f32.mrf.mxu1 }
 0x525   :  { %1203 = vmax.xlane.f32.xlu1 %v1202_v51  ;;  %5701 = vst [vmem:[#allocation16_spill] sm:$0xff] %v4786_v32  ;;  %v1528_v11 = vmin.f32 %v4786_v32, %v4788_v58  ;;  %v1552_v52 = vmax.f32 %v4786_v32, %v4788_v58 }
 0x52c   :  { %1517 = vmin.xlane.f32.xlu0 %v1516_v23  ;;  %1541 = vmax.xlane.f32.xlu2 %v1540_v22 }
 0x52d   :  { %1511 = vmin.xlane.f32.xlu1 %v1510_v4 }
 0x534   :  { %1526 = vmin.xlane.f32.xlu0 %v1525_v9  ;;  %1550 = vmax.xlane.f32.xlu2 %v1549_v39 }
 0x535   :  { %1520 = vmin.xlane.f32.xlu1 %v1519_v54 }
 0x53c   :  { %1535 = vmax.xlane.f32.xlu0 %v1534_v8 }
 0x53d   :  { %1529 = vmin.xlane.f32.xlu1 %v1528_v11 }
 0x544   :  { %1544 = vmax.xlane.f32.xlu0 %v1543_v21 }
 0x545   :  { %1538 = vmax.xlane.f32.xlu1 %v1537_v26 }
 0x547   :  { %v1762_v16 = vpop.xlane.xlu2 %1761 }
 0x548   :  { %3609 = vrcp.f32 %v1762_v16  ;;  %v1841_v26 = vand.u32 2147483647, %v1762_v16  ;;  %v1843_v21 = vand.u32 2147483648, %v1762_v16  ;;  %vm1837_vm4 = vweird.f32 %v1762_v16 }
 0x54a   :  { %vm4844_vm6 = vcmp.eq.f32.partialorder %v1841_v26, 8.507059e+37 }
 0x54c   :  { %1553 = vmax.xlane.f32.xlu0 %v1552_v52 }
 0x54d   :  { %1547 = vmax.xlane.f32.xlu1 %v1546_v38 }
 0x54e   :  { %v4813_v20 = vpop.eup %3609 }
 0x54f   :  { %v4804_v37 = vpop.xlane.xlu2 %1758  ;;  %v1833_v44 = vmul.f32 %v4813_v20, %v1762_v16  ;;  %vm1838_vm5 = vweird.f32 %v4813_v20 }
 0x550   :  { %3611 = vrcp.f32 %v4804_v37  ;;  %v1828_v52 = vand.u32 2147483648, %v4804_v37  ;;  %vm1822_vm7 = vweird.f32 %v4804_v37  ;;  %vm4870_vm8 = vmor %vm1837_vm4, %vm1838_vm5 }
 0x551   :  { %v1834_v23 = vsub.f32 1.0, %v1833_v44 }
 0x552   :  { %v4859_v26 = vor.u32 1.1754944e-38, %v1828_v52 }
 0x553   :  { %v1835_v11 = vmul.f32 %v4813_v20, %v1834_v23  ;;  %v1844_v23 = vor.u32 1.1754944e-38, %v1843_v21 }
 0x555   :  { %v1836_v58 = vadd.f32 %v4813_v20, %v1835_v11 }
 0x556   :  { %v4821_v51 = vpop.eup %3611 }
 0x557   :  { %v4815_v5 = vpop.xlane.xlu0 %1767  ;;  %v4818_v14 = vpop.xlane.xlu2 %1161  ;;  %v1818_v4 = vmul.f32 %v4821_v51, %v4804_v37  ;;  %vm1823_vm11 = vweird.f32 %v4821_v51  ;;  %v1840_v16 = vsel %vm4870_vm8, %v4813_v20, %v1836_v58 }
 0x558   :  { %3613 = vrcp.f32 %v4815_v5  ;;  %v4848_v32 = vpop.f32.mrf.mxu0  ;;  %v1873_v6 = vand.u32 2147483648, %v4815_v5  ;;  %vm1867_vm9 = vweird.f32 %v4815_v5  ;;  %v1871_v53 = vand.u32 2147483647, %v4815_v5  ;;  %vm4899_vm2 = vmor %vm1822_vm7, %vm1823_vm11 }
 0x559   :  { %v1819_v38 = vsub.f32 1.0, %v1818_v4 }
 0x55a   :  { %vm1872_vm7 = vcmp.eq.f32.partialorder %v1871_v53, 8.507059e+37 }
 0x55b   :  { %v1820_v36 = vmul.f32 %v4821_v51, %v1819_v38 }
 0x55d   :  { %v1821_v19 = vadd.f32 %v4821_v51, %v1820_v36 }
 0x55e   :  { %v4823_v59 = vpop.eup %3613 }
 0x55f   :  { %v1863_v22 = vmul.f32 %v4823_v59, %v4815_v5  ;;  %v4829_v9 = vpop.xlane.xlu0 %1764  ;;  %v4836_v39 = vpop.xlane.xlu2 %1170  ;;  %vm1868_vm10 = vweird.f32 %v4823_v59 }
 0x560   :  { %3615 = vrcp.f32 %v4829_v9  ;;  %v4832_v54 = vpop.xlane.xlu1 %1770  ;;  %vm4890_vm14 = vmor %vm1867_vm9, %vm1868_vm10  ;;  %vm1852_vm15 = vweird.f32 %v4829_v9 }
 0x561   :  { %v1864_v8 = vsub.f32 1.0, %v1863_v22  ;;  %3617 = vrcp.f32 %v4832_v54  ;;  %vm1882_vm5 = vweird.f32 %v4832_v54  ;;  %v1886_v33 = vand.u32 2147483647, %v4832_v54 }
 0x563   :  { %v1865_v3 = vmul.f32 %v4823_v59, %v1864_v8  ;;  %v1826_v8 = vand.u32 2147483647, %v4804_v37  ;;  %vm1887_vm10 = vcmp.eq.f32.partialorder %v1886_v33, 8.507059e+37 }
 0x565   :  { %v1866_v42 = vadd.f32 %v4823_v59, %v1865_v3  ;;  %vm4886_vm13 = vcmp.eq.f32.partialorder %v1826_v8, 8.507059e+37  ;;  %v1888_v8 = vand.u32 2147483648, %v4832_v54 }
 0x566   :  { %v4840_v44 = vpop.eup %3615 }
 0x567   :  { %v4850_v4 = vpop.eup %3617  ;;  %v1848_v11 = vmul.f32 %v4840_v44, %v4829_v9  ;;  %v4857_v35 = vpop.xlane.xlu0 %1749  ;;  %vm1853_vm12 = vweird.f32 %v4840_v44  ;;  %v1870_v20 = vsel %vm4890_vm14, %v4823_v59, %v1866_v42 }
 0x568   :  { %v1878_v21 = vmul.f32 %v4850_v4, %v4832_v54  ;;  %3619 = vrcp.f32 %v4857_v35  ;;  %v4865_v0 = vpop.xlane.xlu1 %1755  ;;  %vm1883_vm1 = vweird.f32 %v4850_v4  ;;  %v4909_v38 = vpop.xlane.xlu2 %1179  ;;  %vm4913_vm4 = vmor %vm1852_vm15, %vm1853_vm12  ;;  %v1825_v54 = vsel %vm4899_vm2, %v4821_v51, %v1821_v19 }
 0x569   :  { %v1849_v52 = vsub.f32 1.0, %v1848_v11  ;;  %3621 = vrcp.f32 %v4865_v0  ;;  %5713 = vst [vmem:[#allocation18_spill] sm:$0xff] %v4909_v38  ;;  %vm4923_vm8 = vmor %vm1882_vm5, %vm1883_vm1  ;;  %v4945_v38 = vpop.f32.mrf.mxu0  ;;  %v1813_v51 = vand.u32 2147483648, %v4865_v0  ;;  %vm1807_vm9 = vweird.f32 %v4865_v0 }
 0x56a   :  { %v1879_v63 = vsub.f32 1.0, %v1878_v21  ;;  %v1874_v21 = vor.u32 1.1754944e-38, %v1873_v6  ;;  %v1858_v6 = vand.u32 2147483648, %v4829_v9  ;;  %vm1777_vm15 = vweird.f32 %v4857_v35 }
 0x56b   :  { %v1850_v3 = vmul.f32 %v4840_v44, %v1849_v52  ;;  %v1856_v52 = vand.u32 2147483647, %v4829_v9  ;;  %v1845_v9 = vsel %vm4844_vm6, %v1844_v23, %v1840_v16  ;;  %v1889_v23 = vor.u32 1.1754944e-38, %v1888_v8 }
 0x56c   :  { %v1880_v58 = vmul.f32 %v4850_v4, %v1879_v63  ;;  %v1875_v62 = vsel %vm1872_vm7, %v1874_v21, %v1870_v20  ;;  %v1859_v22 = vor.u32 1.1754944e-38, %v1858_v6  ;;  %v1830_v6 = vsel %vm4886_vm13, %v4859_v26, %v1825_v54 }
 0x56d   :  { %v1851_v5 = vadd.f32 %v4840_v44, %v1850_v3  ;;  %vm1857_vm6 = vcmp.eq.f32.partialorder %v1856_v52, 8.507059e+37  ;;  %v1783_v54 = vand.u32 2147483648, %v4857_v35 }
 0x56e   :  { %v4911_v63 = vpop.eup %3619  ;;  %v1881_v50 = vadd.f32 %v4850_v4, %v1880_v58 }
 0x56f   :  { %v3622_v42 = vpop.eup %3621  ;;  %v1773_v3 = vmul.f32 %v4911_v63, %v4857_v35  ;;  %v4929_v13 = vpop.xlane.xlu0 %1164  ;;  %v1855_v55 = vsel %vm4913_vm4, %v4840_v44, %v1851_v5  ;;  %vm1778_vm13 = vweird.f32 %v4911_v63 }
 0x570   :  { %v1885_v53 = vsel %vm4923_vm8, %v4850_v4, %v1881_v50  ;;  %v1803_v58 = vmul.f32 %v3622_v42, %v4865_v0  ;;  %v4940_v40 = vpop.xlane.xlu1 %1752  ;;  %v1811_v50 = vand.u32 2147483647, %v4865_v0  ;;  %v1876_v4 = vmul.f32 %v4676_v18, %v1875_v62  ;;  %v1189_v62 = vpop.xlane.xlu2 %1188  ;;  %vm4979_vm1 = vmor %vm1777_vm15, %vm1778_vm13 }
 0x571   :  { %v1774_v16 = vsub.f32 1.0, %v1773_v3  ;;  %3623 = vrcp.f32 %v4940_v40  ;;  %v1890_v21 = vsel %vm1887_vm10, %v1889_v23, %v1885_v53  ;;  %v1860_v36 = vsel %vm1857_vm6, %v1859_v22, %v1855_v55  ;;  %v4970_v3 = vpop.f32.mrf.mxu0 }
 0x572   :  { %v1804_v19 = vsub.f32 1.0, %v1803_v58  ;;  %vm1808_vm11 = vweird.f32 %v3622_v42  ;;  %v1891_v5 = vmul.f32 %v4690_v30, %v1890_v21  ;;  %v1861_v52 = vmul.f32 %v4686_v60, %v1860_v36 }
 0x573   :  { %v1775_v44 = vmul.f32 %v4911_v63, %v1774_v16  ;;  %vm4958_vm12 = vmor %vm1807_vm9, %vm1808_vm11  ;;  %vm1812_vm14 = vcmp.eq.f32.partialorder %v1811_v50, 8.507059e+37  ;;  %v1814_v55 = vor.u32 1.1754944e-38, %v1813_v51  ;;  %v1846_v30 = vmul.f32 %v4648_v46, %v1845_v9 }
 0x574   :  { %v1805_v20 = vmul.f32 %v3622_v42, %v1804_v19  ;;  %v1895_v37 = vpack.c.bf16 %v1891_v5, %v1876_v4  ;;  %v1831_v46 = vmul.f32 %v4659_v28, %v1830_v6  ;;  %v1781_v9 = vand.u32 2147483647, %v4857_v35 }
 0x575   :  { %v1776_v26 = vadd.f32 %v4911_v63, %v1775_v44  ;;  %v1894_v22 = vpack.c.bf16 %v1861_v52, %v1846_v30  ;;  %v1798_v19 = vand.u32 2147483648, %v4940_v40  ;;  %vm1792_vm5 = vweird.f32 %v4940_v40  ;;  %v3524_v30 = vld [vmem:[%s5652_s5] sm:$0xff] }
 0x576   :  { %v1806_v8 = vadd.f32 %v3622_v42, %v1805_v20  ;;  %2093 = vmatpush.bf16.msrb.mxu1 %v1895_v37  ;;  %2155 = vmatpush.bf16.msra.mxu2 %v1895_v37  ;;  %vm1782_vm4 = vcmp.eq.f32.partialorder %v1781_v9, 8.507059e+37  ;;  %v2075_v18 = vadd.f32 %v4945_v38, %v4798_v29  ;;  %v1209_v29 = vadd.f32 %v4467_v43, %v4467_v43 }
 0x577   :  { %v3624_v33 = vpop.eup %3623  ;;  %v4962_v59 = vpop.xlane.xlu0 %1173  ;;  %v1780_v35 = vsel %vm4979_vm1, %v4911_v63, %v1776_v26  ;;  %v1799_v4 = vor.u32 1.1754944e-38, %v1798_v19  ;;  %v1210_v38 = vadd.f32 %v4475_v49, %v4475_v49  ;;  %v1214_v43 = vadd.f32 %v4613_v15, %v4613_v15 }
 0x578   :  { %v1788_v0 = vmul.f32 %v3624_v33, %v4940_v40  ;;  %v1168_v60 = vpop.xlane.xlu1 %1167  ;;  %v1810_v11 = vsel %vm4958_vm12, %v3622_v42, %v1806_v8  ;;  %v1796_v42 = vand.u32 2147483647, %v4940_v40  ;;  %vm1793_vm2 = vweird.f32 %v3624_v33  ;;  %v1198_v8 = vpop.xlane.xlu2 %1197 }
 0x579   :  { %v1815_v53 = vsel %vm1812_vm14, %v1814_v55, %v1810_v11  ;;  %vm1794_vm7 = vmor %vm1792_vm5, %vm1793_vm2  ;;  %v2079_v5 = vpop.f32.mrf.mxu0  ;;  %v2073_v40 = vadd.f32 %v4848_v32, %v4794_v31  ;;  %v1208_v32 = vadd.f32 %v4469_v61, %v4469_v61  ;;  %v1225_v31 = vadd.f32 %v1189_v62, %v4929_v13 }
 0x57a   :  { %v1789_v58 = vsub.f32 1.0, %v1788_v0  ;;  %v1816_v23 = vmul.f32 %v4705_v57, %v1815_v53  ;;  %2094 = vmatpush.bf16.msrb.mxu1 %v1894_v22  ;;  %2156 = vmatpush.bf16.msra.mxu2 %v1894_v22  ;;  %v1784_v57 = vor.u32 1.1754944e-38, %v1783_v54  ;;  %vm1797_vm8 = vcmp.eq.f32.partialorder %v1796_v42, 8.507059e+37 }
 0x57b   :  { %v2081_v26 = vpack.c.bf16 %v2075_v18, %v2073_v40  ;;  %v1213_v54 = vadd.f32 %v4481_v47, %v4481_v47  ;;  %v1212_v61 = vadd.f32 %v4483_v7, %v4483_v7  ;;  %v1217_v49 = vadd.f32 %v4493_v34, %v4493_v34 }
 0x57c   :  { %v1790_v50 = vmul.f32 %v3624_v33, %v1789_v58  ;;  %v1893_v28 = vpack.c.bf16 %v1831_v46, %v1816_v23  ;;  %v1785_v36 = vsel %vm1782_vm4, %v1784_v57, %v1780_v35  ;;  %vm1234_vm11 = vcmp.gt.f32.partialorder %v1210_v38, %v1225_v31 }
 0x57d   :  { %v1786_v63 = vmul.f32 %v4701_v1, %v1785_v36  ;;  %v1216_v47 = vadd.f32 %v4627_v48, %v4627_v48  ;;  %v1228_v7 = vadd.f32 %v1198_v8, %v4962_v59  ;;  %v1218_v34 = vadd.f32 %v4645_v41, %v4645_v41 }
 0x57e   :  { %v1791_v51 = vadd.f32 %v3624_v33, %v1790_v50  ;;  %2095 = vmatpush.bf16.msrb.mxu1 %v1893_v28  ;;  %2157 = vmatpush.bf16.msra.mxu2 %v1893_v28  ;;  %v1219_v48 = vadd.f32 %v4495_v25, %v4495_v25  ;;  %v1221_v53 = vadd.f32 %v4497_v56, %v4497_v56  ;;  %v3625_v9 = vmov 0   ;;  %v3525_v25 = vld [vmem:[%s5652_s5 + $0x8] sm:$0xff] }
 0x57f   :  { %v4989_v21 = vpop.xlane.xlu0 %1182  ;;  %v1220_v46 = vadd.f32 %v4661_v27, %v4661_v27  ;;  %v1222_v41 = vadd.f32 %v4682_v2, %v4682_v2 }
 0x580   :  { %v1177_v44 = vpop.xlane.xlu1 %1176  ;;  %v1795_v20 = vsel %vm1794_vm7, %v3624_v33, %v1791_v51  ;;  %vm1240_vm7 = vcmp.gt.f32.partialorder %v1216_v47, %v1228_v7 }
 0x581   :  { %v1800_v6 = vsel %vm1797_vm8, %v1799_v4, %v1795_v20  ;;  %vm1241_vm8 = vcmp.gt.f32.partialorder %v1217_v49, %v1228_v7  ;;  %v3526_v7 = vld [vmem:[%s5652_s5 + $0x10] sm:$0xff] }
 0x582   :  { %v1801_v52 = vmul.f32 %v4716_v17, %v1800_v6  ;;  %v1207_v17 = vpop.xlane.xlu2 %1206 }
 0x583   :  { %v1231_v19 = vadd.f32 %v1207_v17, %v4989_v21 }
 0x584   :  { %v1892_v55 = vpack.c.bf16 %v1801_v52, %v1786_v63 }
 0x586   :  { %2096 = vmatpush.bf16.msrb.mxu1 %v1892_v55  ;;  %2158 = vmatpush.bf16.msra.mxu2 %v1892_v55 }
 0x587   :  { %v1192_v33 = vpop.xlane.xlu0 %1191 }
 0x588   :  { %v1186_v0 = vpop.xlane.xlu1 %1185  ;;  %v1226_v11 = vadd.f32 %v1192_v33, %v1168_v60  ;;  %v3536_v60 = vld [vmem:[%s5652_s5 + $0x20] sm:$0xff] }
 0x589   :  { %3296 = vmatmul.msk.bf16.vlgmr.msra.gmra.mxu2 %vm558_vm0, %v3524_v30  ;;  %3275 = vmatmul.msk.bf16.vlgmr.msrb.gmra.mxu1 %vm558_vm0, %v2081_v26  ;;  %v1224_v1 = vadd.f32 %v1186_v0, %v4818_v14 }
 0x58a   :  { %2503 = vmatpush.bf16.msra.mxu1 %v1895_v37  ;;  %v1211_v37 = vadd.f32 %v4473_v45, %v4473_v45  ;;  %v1215_v45 = vadd.f32 %v4487_v24, %v4487_v24  ;;  %vm1236_vm13 = vcmp.gt.f32.partialorder %v1212_v61, %v1226_v11  ;;  %v2078_v24 = vadd.f32 %v4970_v3, %v4802_v12  ;;  %v5041_v59 = vpop.xlane.xlu2 %1514 }
 0x58b   :  { %vm1232_vm6 = vcmp.gt.f32.partialorder %v1208_v32, %v1224_v1  ;;  %vm1233_vm10 = vcmp.gt.f32.partialorder %v1209_v29, %v1224_v1  ;;  %vm1237_vm2 = vcmp.gt.f32.partialorder %v1213_v54, %v1226_v11 }
 0x58c   :  { %vm1235_vm9 = vcmp.gt.f32.partialorder %v1211_v37, %v1225_v31  ;;  %vm5027_vm12 = vmpackc.low %vm1234_vm11, %vm1232_vm6  ;;  %v2082_v16 = vpack.c.bf16 %v2078_v24, %v2078_v24 }
 0x58d   :  { %vm5031_vm14 = vmpackc.low %vm1235_vm9, %vm1233_vm10  ;;  %v1250_v12 = vsel %vm5027_vm12, 16711935, %v3625_v9 }
 0x58e   :  { %2504 = vmatpush.bf16.msra.mxu1 %v1894_v22  ;;  %v1256_v56 = vsel %vm5031_vm14, 16711935, %v3625_v9  ;;  %v1223_v22 = vadd.f32 %v4499_v10, %v4499_v10  ;;  %vm1246_vm14 = vcmp.gt.f32.partialorder %v1222_v41, %v1231_v19 }
 0x58f   :  { %v1201_v14 = vpop.xlane.xlu0 %1200 }
 0x590   :  { %v1195_v13 = vpop.xlane.xlu1 %1194 }
 0x591   :  { %v1227_v62 = vadd.f32 %v1195_v13, %v4836_v39  ;;  %v1229_v39 = vadd.f32 %v1201_v14, %v1177_v44 }
 0x592   :  { %2505 = vmatpush.bf16.msra.mxu1 %v1893_v28  ;;  %v5726_v28 = vld [vmem:[#allocation18_spill] sm:$0xff]  ;;  %v5080_v30 = vpop.xlane.xlu2 %1523 }
 0x593   :  { %vm1238_vm15 = vcmp.gt.f32.partialorder %v1214_v43, %v1227_v62  ;;  %vm1239_vm1 = vcmp.gt.f32.partialorder %v1215_v45, %v1227_v62  ;;  %vm1242_vm10 = vcmp.gt.f32.partialorder %v1218_v34, %v1229_v39  ;;  %vm1243_vm9 = vcmp.gt.f32.partialorder %v1219_v48, %v1229_v39 }
 0x594   :  { %vm1249_vm4 = vmpackc.low %vm1238_vm15, %vm1236_vm13 }
 0x595   :  { %v1251_v3 = vsel %vm1249_vm4, 16711935, %v3625_v9  ;;  %vm1255_vm5 = vmpackc.low %vm1239_vm1, %vm1237_vm2  ;;  %vm1247_vm2 = vcmp.gt.f32.partialorder %v1223_v22, %v1231_v19 }
 0x596   :  { %2506 = vmatpush.bf16.msra.mxu1 %v1892_v55  ;;  %v1252_v27 = vpack.c.b8 %v1251_v3, %v1250_v12  ;;  %v1257_v58 = vsel %vm1255_vm5, 16711935, %v3625_v9  ;;  %vm1260_vm12 = vmpackc.low %vm1242_vm10, %vm1240_vm7 }
 0x597   :  { %v1258_v23 = vpack.c.b8 %v1257_v58, %v1256_v56  ;;  %v5062_v42 = vpop.xlane.xlu0 %1508  ;;  %vm5074_vm13 = vmpackc.low %vm1243_vm9, %vm1241_vm8  ;;  %v1262_v18 = vsel %vm1260_vm12, 16711935, %v3625_v9  ;;  %v5729_v58 = vld [vmem:[#allocation2_spill] sm:$0xff] }
 0x598   :  { %vm1253_vm6 = vnez %v1252_v27  ;;  %v1204_v2 = vpop.xlane.xlu1 %1203  ;;  %v1268_v31 = vsel %vm5074_vm13, 16711935, %v3625_v9  ;;  %v1555_v22 = vadd.f32 %v5729_v58, %v5729_v58 }
 0x599   :  { %vm1259_vm11 = vnez %v1258_v23  ;;  %v1272_v50 = vsel %vm1253_vm6, 16843009, %v3625_v9  ;;  %v1230_v35 = vadd.f32 %v1204_v2, %v5726_v28  ;;  %3297 = vmatmul.msk.bf16.gmra.mxu2 %vm558_vm0, %v3525_v25  ;;  %3276 = vmatmul.msk.bf16.gmra.mxu1 %vm558_vm0, %v2082_v16  ;;  %v5730_v23 = vld [vmem:[#allocation4_spill] sm:$0xff] }
 0x59a   :  { %v1273_v10 = vsel %vm1259_vm11, 16843009, %v3625_v9  ;;  %v1276_v57 = vunpack.c.0.s8 %v1272_v50  ;;  %v1278_v51 = vunpack.c.1.s8 %v1272_v50  ;;  %v1280_v4 = vunpack.c.2.s8 %v1272_v50 }
 0x59b   :  { %v1277_v36 = vunpack.c.0.s8 %v1273_v10  ;;  %v1279_v21 = vunpack.c.1.s8 %v1273_v10  ;;  %v1281_v44 = vunpack.c.2.s8 %v1273_v10  ;;  %v1282_v20 = vunpack.c.3.s8 %v1272_v50  ;;  %v5731_v50 = vld [vmem:[#allocation3_spill] sm:$0xff] }
 0x59c   :  { %v1283_v5 = vunpack.c.3.s8 %v1273_v10  ;;  %vm1244_vm15 = vcmp.gt.f32.partialorder %v1220_v46, %v1230_v35  ;;  %vm1245_vm1 = vcmp.gt.f32.partialorder %v1221_v53, %v1230_v35  ;;  %v1533_v46 = vpop.xlane.xlu2 %1532  ;;  %v1557_v16 = vadd.f32 %v5730_v23, %v5730_v23  ;;  %v5732_v35 = vld [vmem:[#allocation5_spill] sm:$0xff] }
 0x59d   :  { %v1292_v8 = vpack.c.b16 %v1277_v36, %v1276_v57  ;;  %v1294_v63 = vpack.c.b16 %v1279_v21, %v1278_v51  ;;  %v1296_v52 = vpack.c.b16 %v1281_v44, %v1280_v4  ;;  %vm1261_vm4 = vmpackc.low %vm1246_vm14, %vm1244_vm15  ;;  %v1571_v19 = vadd.f32 %v1533_v46, %v5062_v42  ;;  %v5733_v51 = vld [vmem:[#allocation8_spill] sm:$0xff]  ;;  %v3527_v36 = vld [vmem:[%s5652_s5 + $0x18] sm:$0xff] }
 0x59e   :  { %v1298_v40 = vpack.c.b16 %v1283_v5, %v1282_v20  ;;  %v1263_v55 = vsel %vm1261_vm4, 16711935, %v3625_v9  ;;  %vm1267_vm5 = vmpackc.low %vm1247_vm2, %vm1245_vm1  ;;  %v1556_v28 = vadd.f32 %v5731_v50, %v5731_v50  ;;  %v1558_v10 = vadd.f32 %v5732_v35, %v5732_v35  ;;  %v5734_v44 = vld [vmem:[#allocation9_spill] sm:$0xff]  ;;  %v3537_v20 = vld [vmem:[%s5652_s5 + $0x28] sm:$0xff] }
 0x59f   :  { %v1293_v33 = vpack.c.b8 %v1292_v8, %v1292_v8  ;;  %v1295_v26 = vpack.c.b8 %v1294_v63, %v1294_v63  ;;  %v1297_v0 = vpack.c.b8 %v1296_v52, %v1296_v52  ;;  %v1264_v1 = vpack.c.b8 %v1263_v55, %v1262_v18  ;;  %v1518_v17 = vpop.xlane.xlu0 %1517  ;;  %v5735_v5 = vld [vmem:[#allocation6_spill] sm:$0xff]  ;;  %v5736_v8 = vld [vmem:[#allocation7_spill] sm:$0xff]  ;;  %v3326_v18 = vld [vmem:[%s5651_s6 + $0x30] sm:$0xf] }
 0x5a0   :  { %v1299_v32 = vpack.c.b8 %v1298_v40, %v1298_v40  ;;  %v1269_v29 = vsel %vm1267_vm5, 16711935, %v3625_v9  ;;  %v1512_v38 = vpop.xlane.xlu1 %1511  ;;  %v1561_v4 = vadd.f32 %v5733_v51, %v5733_v51  ;;  %vm1579_vm6 = vcmp.gt.f32.partialorder %v1555_v22, %v1571_v19  ;;  %v3535_v55 = vld [vmem:[%s5651_s6 + $0x34] sm:$0xf0]  ;;  %v5742_v46 = vld [vmem:[#allocation15_spill] sm:$0xff] }
 0x5a1   :  { %1308 = vst [vmem:[%s5654_s8] sm:$0xf] %v1293_v33  ;;  %vm1265_vm7 = vnez %v1264_v1  ;;  %v1270_v37 = vpack.c.b8 %v1269_v29, %v1268_v31  ;;  %v1562_v42 = vadd.f32 %v5734_v44, %v5734_v44  ;;  %vm1580_vm11 = vcmp.gt.f32.partialorder %v1556_v28, %v1571_v19  ;;  %v5737_v29 = vld [vmem:[#allocation10_spill] sm:$0xff]  ;;  %v3538_v28 = vld [vmem:[%s5652_s5 + $0x30] sm:$0xff] }
 0x5a2   :  { %1309 = vst [vmem:[%s5654_s8 + $0x4] sm:$0xf] %v1295_v26  ;;  %v1274_v11 = vsel %vm1265_vm7, 16843009, %v3625_v9  ;;  %v1559_v6 = vadd.f32 %v5735_v5, %v5735_v5  ;;  %v1560_v63 = vadd.f32 %v5736_v8, %v5736_v8  ;;  %v3327_v33 = vor.u32 %v3535_v55, %v3326_v18 }
 0x5a3   :  { %1310 = vst [vmem:[%s5654_s8 + $0x8] sm:$0xf] %v1297_v0  ;;  %vm1271_vm8 = vnez %v1270_v37  ;;  %v1284_v14 = vunpack.c.0.s8 %v1274_v11  ;;  %v1286_v54 = vunpack.c.1.s8 %v1274_v11  ;;  %v1288_v61 = vunpack.c.2.s8 %v1274_v11  ;;  %v5738_v37 = vld [vmem:[#allocation11_spill] sm:$0xff] }
 0x5a4   :  { %1311 = vst [vmem:[%s5654_s8 + $0xc] sm:$0xf] %v1299_v32  ;;  %v1275_v43 = vsel %vm1271_vm8, 16843009, %v3625_v9  ;;  %v1290_v13 = vunpack.c.3.s8 %v1274_v11  ;;  %v1542_v57 = vpop.xlane.xlu2 %1541  ;;  %2248 = vmatpush.bf16.msra.mxu3 %v3327_v33  ;;  %v1564_v11 = vadd.f32 %v5738_v37, %v5738_v37 }
 0x5a5   :  { %v1285_v49 = vunpack.c.0.s8 %v1275_v43  ;;  %v1287_v45 = vunpack.c.1.s8 %v1275_v43  ;;  %v1289_v62 = vunpack.c.2.s8 %v1275_v43  ;;  %v1291_v47 = vunpack.c.3.s8 %v1275_v43 }
 0x5a6   :  { %v1574_v21 = vadd.f32 %v1542_v57, %v1518_v17 }
 0x5a7   :  { %v1300_v15 = vpack.c.b16 %v1285_v49, %v1284_v14  ;;  %v1302_v24 = vpack.c.b16 %v1287_v45, %v1286_v54  ;;  %v1304_v34 = vpack.c.b16 %v1289_v62, %v1288_v61  ;;  %v1306_v48 = vpack.c.b16 %v1291_v47, %v1290_v13  ;;  %v5106_v39 = vpop.xlane.xlu0 %1526  ;;  %v5739_v14 = vld [vmem:[#allocation12_spill] sm:$0xff]  ;;  %v5740_v61 = vld [vmem:[#allocation13_spill] sm:$0xff] }
 0x5a8   :  { %v5108_v53 = vpop.xlane.xlu1 %1520  ;;  %vm1585_vm14 = vcmp.gt.f32.partialorder %v1561_v4, %v1574_v21  ;;  %vm1586_vm15 = vcmp.gt.f32.partialorder %v1562_v42, %v1574_v21  ;;  %v1565_v54 = vadd.f32 %v5739_v14, %v5739_v14  ;;  %v1566_v43 = vadd.f32 %v5740_v61, %v5740_v61  ;;  %v3534_v14 = vld [vmem:[%s5651_s6 + $0x34] sm:$0xf]  ;;  %v3318_v61 = vld [vmem:[%s5651_s6 + $0x20] sm:$0xf] }
 0x5a9   :  { %v1301_v12 = vpack.c.b8 %v1300_v15, %v1300_v15  ;;  %v1303_v3 = vpack.c.b8 %v1302_v24, %v1302_v24  ;;  %v1305_v25 = vpack.c.b8 %v1304_v34, %v1304_v34  ;;  %3298 = vmatmul.msk.bf16.gmra.mxu2 %vm558_vm0, %v3526_v7  ;;  %v1307_v41 = vpack.c.b8 %v1306_v48, %v1306_v48  ;;  %v5741_v34 = vld [vmem:[#allocation14_spill] sm:$0xff] }
 0x5aa   :  { %3364 = vmatmul.msk.bf16.vlgmr.msra.gmra.mxu1 %vm558_vm0, %v3536_v60  ;;  %v1567_v48 = vadd.f32 %v5741_v34, %v5741_v34  ;;  %v3312_v34 = vld [vmem:[%s5651_s6 + $0x18] sm:$0xf0] }
 0x5ab   :  { %1312 = vst [vmem:[%s5654_s8 + $0x10] sm:$0xf] %v1301_v12  ;;  %v1568_v12 = vadd.f32 %v5742_v46, %v5742_v46  ;;  %v3302_v46 = vld [vmem:[%s5651_s6] sm:$0xf] }
 0x5ac   :  { %1313 = vst [vmem:[%s5654_s8 + $0x14] sm:$0xf] %v1303_v3  ;;  %v5743_v3 = vld [vmem:[#allocation16_spill] sm:$0xff]  ;;  %v1551_v58 = vpop.xlane.xlu2 %1550 }
 0x5ad   :  { %1314 = vst [vmem:[%s5654_s8 + $0x18] sm:$0xf] %v1305_v25  ;;  %v1569_v25 = vadd.f32 %v5743_v3, %v5743_v3  ;;  %v1577_v57 = vadd.f32 %v1551_v58, %v5106_v39 }
 0x5ae   :  { %1315 = vst [vmem:[%s5654_s8 + $0x1c] sm:$0xf] %v1307_v41 }
 0x5af   :  { %v1536_v56 = vpop.xlane.xlu0 %1535 }
 0x5b0   :  { %v5124_v27 = vpop.xlane.xlu1 %1529  ;;  %v1572_v2 = vadd.f32 %v1536_v56, %v1512_v38  ;;  %v1563_v38 = vadd.f32 %v5737_v29, %v5737_v29 }
 0x5b2   :  { %vm1581_vm10 = vcmp.gt.f32.partialorder %v1557_v16, %v1572_v2  ;;  %vm1582_vm9 = vcmp.gt.f32.partialorder %v1558_v10, %v1572_v2  ;;  %v5744_v2 = vld [vmem:[#allocation17_spill] sm:$0xff] }
 0x5b3   :  { %vm1595_vm12 = vmpackc.low %vm1581_vm10, %vm1579_vm6  ;;  %v1570_v50 = vadd.f32 %v5744_v2, %v5744_v2 }
 0x5b4   :  { %vm1601_vm13 = vmpackc.low %vm1582_vm9, %vm1580_vm11  ;;  %v1597_v26 = vsel %vm1595_vm12, 16711935, %v3625_v9 }
 0x5b7   :  { %v1545_v0 = vpop.xlane.xlu0 %1544 }
 0x5b8   :  { %v1539_v52 = vpop.xlane.xlu1 %1538  ;;  %v1575_v19 = vadd.f32 %v1545_v0, %v5108_v53 }
 0x5b9   :  { %3299 = vmatmul.msk.bf16.gmra.mxu2 %vm558_vm0, %v3527_v36  ;;  %v1573_v40 = vadd.f32 %v1539_v52, %v5041_v59  ;;  %v1603_v59 = vsel %vm1601_vm13, 16711935, %v3625_v9 }
 0x5ba   :  { %3365 = vmatmul.msk.bf16.gmra.mxu1 %vm558_vm0, %v3537_v20  ;;  %vm1587_vm6 = vcmp.gt.f32.partialorder %v1563_v38, %v1575_v19  ;;  %vm1588_vm10 = vcmp.gt.f32.partialorder %v1564_v11, %v1575_v19 }
 0x5bb   :  { %vm1583_vm1 = vcmp.gt.f32.partialorder %v1559_v6, %v1573_v40  ;;  %vm1584_vm2 = vcmp.gt.f32.partialorder %v1560_v63, %v1573_v40 }
 0x5bc   :  { %vm1596_vm4 = vmpackc.low %vm1585_vm14, %vm1583_vm1  ;;  %vm1591_vm14 = vcmp.gt.f32.partialorder %v1567_v48, %v1577_v57 }
 0x5bd   :  { %v1598_v1 = vsel %vm1596_vm4, 16711935, %v3625_v9  ;;  %vm1602_vm5 = vmpackc.low %vm1586_vm15, %vm1584_vm2  ;;  %vm1592_vm15 = vcmp.gt.f32.partialorder %v1568_v12, %v1577_v57  ;;  %v3529_v12 = vld [vmem:[%s5651_s6 + $0x4] sm:$0xf0] }
 0x5be   :  { %v1604_v17 = vsel %vm1602_vm5, 16711935, %v3625_v9  ;;  %v1599_v32 = vpack.c.b8 %v1598_v1, %v1597_v26  ;;  %v3303_v3 = vor.u32 %v3529_v12, %v3302_v46 }
 0x5bf   :  { %v1605_v31 = vpack.c.b8 %v1604_v17, %v1603_v59  ;;  %v1554_v51 = vpop.xlane.xlu0 %1553 }
 0x5c0   :  { %vm1600_vm7 = vnez %v1599_v32  ;;  %v1548_v56 = vpop.xlane.xlu1 %1547  ;;  %v1578_v53 = vadd.f32 %v1554_v51, %v5124_v27  ;;  %v3539_v32 = vld [vmem:[%s5652_s5 + $0x38] sm:$0xff]  ;;  %v3386_v51 = vld [vmem:[%s5651_s6 + $0x20] sm:$0xf] }
 0x5c1   :  { %vm1606_vm8 = vnez %v1605_v31  ;;  %v1619_v13 = vsel %vm1600_vm7, 16843009, %v3625_v9  ;;  %v1576_v10 = vadd.f32 %v1548_v56, %v5080_v30 }
 0x5c2   :  { %v1620_v49 = vsel %vm1606_vm8, 16843009, %v3625_v9  ;;  %v1623_v45 = vunpack.c.0.s8 %v1619_v13  ;;  %v1625_v62 = vunpack.c.1.s8 %v1619_v13  ;;  %v1627_v47 = vunpack.c.2.s8 %v1619_v13 }
 0x5c3   :  { %v1624_v7 = vunpack.c.0.s8 %v1620_v49  ;;  %v1626_v60 = vunpack.c.1.s8 %v1620_v49  ;;  %v1628_v15 = vunpack.c.2.s8 %v1620_v49  ;;  %v1629_v24 = vunpack.c.3.s8 %v1619_v13 }
 0x5c4   :  { %v1630_v41 = vunpack.c.3.s8 %v1620_v49  ;;  %vm1589_vm11 = vcmp.gt.f32.partialorder %v1565_v54, %v1576_v10  ;;  %vm1590_vm9 = vcmp.gt.f32.partialorder %v1566_v43, %v1576_v10  ;;  %vm1593_vm1 = vcmp.gt.f32.partialorder %v1569_v25, %v1578_v53  ;;  %v3328_v54 = vld [vmem:[%s5651_s6 + $0x38] sm:$0xf0]  ;;  %v3533_v43 = vld [vmem:[%s5651_s6 + $0x24] sm:$0xf0]  ;;  %v3310_v49 = vld [vmem:[%s5651_s6 + $0x10] sm:$0xf] }
 0x5c5   :  { %v1639_v22 = vpack.c.b16 %v1624_v7, %v1623_v45  ;;  %v1641_v23 = vpack.c.b16 %v1626_v60, %v1625_v62  ;;  %v1643_v16 = vpack.c.b16 %v1628_v15, %v1627_v47  ;;  %vm1607_vm12 = vmpackc.low %vm1589_vm11, %vm1587_vm6  ;;  %vm1594_vm2 = vcmp.gt.f32.partialorder %v1570_v50, %v1578_v53  ;;  %v3531_v62 = vld [vmem:[%s5651_s6 + $0x14] sm:$0xf0]  ;;  %v3532_v47 = vld [vmem:[%s5651_s6 + $0x24] sm:$0xf] }
 0x5c6   :  { %v1645_v35 = vpack.c.b16 %v1630_v41, %v1629_v24  ;;  %vm1613_vm13 = vmpackc.low %vm1590_vm9, %vm1588_vm10  ;;  %v1609_v30 = vsel %vm1607_vm12, 16711935, %v3625_v9  ;;  %v3331_v13 = vor.u32 %v3534_v14, %v3328_v54  ;;  %v3319_v45 = vor.u32 %v3533_v43, %v3318_v61  ;;  %v3320_v7 = vld [vmem:[%s5651_s6 + $0x28] sm:$0xf0]  ;;  %v3530_v24 = vld [vmem:[%s5651_s6 + $0x14] sm:$0xf] }
 0x5c7   :  { %v1640_v4 = vpack.c.b8 %v1639_v22, %v1639_v22  ;;  %v1642_v36 = vpack.c.b8 %v1641_v23, %v1641_v23  ;;  %v1644_v21 = vpack.c.b8 %v1643_v16, %v1643_v16  ;;  %v1615_v39 = vsel %vm1613_vm13, 16711935, %v3625_v9  ;;  %vm1608_vm4 = vmpackc.low %vm1593_vm1, %vm1591_vm14  ;;  %v3528_v25 = vld [vmem:[%s5651_s6 + $0x4] sm:$0xf]  ;;  %v3304_v41 = vld [vmem:[%s5651_s6 + $0x8] sm:$0xf0] }
 0x5c8   :  { %v1646_v44 = vpack.c.b8 %v1645_v35, %v1645_v35  ;;  %v1610_v27 = vsel %vm1608_vm4, 16711935, %v3625_v9  ;;  %vm1614_vm5 = vmpackc.low %vm1594_vm2, %vm1592_vm15  ;;  %2277 = vmatpush.bf16.msra.mxu0 %v3331_v13  ;;  %v3323_v60 = vor.u32 %v3532_v47, %v3320_v7  ;;  %2249 = vmatpush.bf16.msra.mxu3 %v3319_v45  ;;  %v3311_v15 = vor.u32 %v3531_v62, %v3310_v49  ;;  %v3394_v50 = vld [vmem:[%s5651_s6 + $0x30] sm:$0xf] }
 0x5c9   :  { %1655 = vst [vmem:[%s5654_s8 + $0x20] sm:$0xf] %v1640_v4  ;;  %v1611_v42 = vpack.c.b8 %v1610_v27, %v1609_v30  ;;  %v1616_v20 = vsel %vm1614_vm5, 16711935, %v3625_v9  ;;  %v3315_v48 = vor.u32 %v3530_v24, %v3312_v34  ;;  %v3307_v56 = vor.u32 %v3528_v25, %v3304_v41  ;;  %v3545_v4 = vld [vmem:[%s5651_s6 + $0x24] sm:$0xf0] }
 0x5ca   :  { %3366 = vmatmul.msk.bf16.gmra.mxu1 %vm558_vm0, %v3538_v28  ;;  %1656 = vst [vmem:[%s5654_s8 + $0x24] sm:$0xf] %v1642_v36  ;;  %v1617_v5 = vpack.c.b8 %v1616_v20, %v1615_v39  ;;  %v3547_v28 = vld [vmem:[%s5651_s6 + $0x34] sm:$0xf0]  ;;  %v3387_v36 = vor.u32 %v3545_v4, %v3386_v51  ;;  %v3546_v27 = vld [vmem:[%s5651_s6 + $0x34] sm:$0xf] }
 0x5cb   :  { %1657 = vst [vmem:[%s5654_s8 + $0x28] sm:$0xf] %v1644_v21  ;;  %vm1612_vm7 = vnez %v1611_v42  ;;  %v3395_v10 = vor.u32 %v3547_v28, %v3394_v50  ;;  %v3378_v21 = vld [vmem:[%s5651_s6 + $0x10] sm:$0xf]  ;;  %v3396_v42 = vld [vmem:[%s5651_s6 + $0x38] sm:$0xf0] }
 0x5cc   :  { %1658 = vst [vmem:[%s5654_s8 + $0x2c] sm:$0xf] %v1646_v44  ;;  %vm1618_vm8 = vnez %v1617_v5  ;;  %v1621_v6 = vsel %vm1612_vm7, 16843009, %v3625_v9  ;;  %2278 = vmatpush.bf16.msra.mxu0 %v3323_v60  ;;  %2250 = vmatpush.bf16.msra.mxu3 %v3311_v15  ;;  %v3543_v44 = vld [vmem:[%s5651_s6 + $0x14] sm:$0xf0] }
 0x5cd   :  { %v1622_v8 = vsel %vm1618_vm8, 16843009, %v3625_v9  ;;  %v1631_v63 = vunpack.c.0.s8 %v1621_v6  ;;  %v1633_v52 = vunpack.c.1.s8 %v1621_v6  ;;  %v1635_v40 = vunpack.c.2.s8 %v1621_v6  ;;  %2596 = vmatpush.bf16.msrb.mxu2 %v3395_v10  ;;  %v3544_v5 = vld [vmem:[%s5651_s6 + $0x24] sm:$0xf] }
 0x5ce   :  { %v1632_v18 = vunpack.c.0.s8 %v1622_v8  ;;  %v1634_v55 = vunpack.c.1.s8 %v1622_v8  ;;  %v1636_v33 = vunpack.c.2.s8 %v1622_v8  ;;  %v1637_v26 = vunpack.c.3.s8 %v1621_v6 }
 0x5cf   :  { %v1638_v59 = vunpack.c.3.s8 %v1622_v8  ;;  %v3379_v30 = vor.u32 %v3543_v44, %v3378_v21  ;;  %v3399_v6 = vor.u32 %v3546_v27, %v3396_v42  ;;  %v3388_v8 = vld [vmem:[%s5651_s6 + $0x28] sm:$0xf0] }
 0x5d0   :  { %v1647_v0 = vpack.c.b16 %v1632_v18, %v1631_v63  ;;  %v1649_v1 = vpack.c.b16 %v1634_v55, %v1633_v52  ;;  %v1651_v17 = vpack.c.b16 %v1636_v33, %v1635_v40  ;;  %2279 = vmatpush.bf16.msra.mxu0 %v3315_v48  ;;  %2251 = vmatpush.bf16.msra.mxu3 %v3303_v3  ;;  %v3370_v63 = vld [vmem:[%s5651_s6] sm:$0xf]  ;;  %v3541_v52 = vld [vmem:[%s5651_s6 + $0x4] sm:$0xf0]  ;;  %v3542_v55 = vld [vmem:[%s5651_s6 + $0x14] sm:$0xf] }
 0x5d1   :  { %v1653_v31 = vpack.c.b16 %v1638_v59, %v1637_v26  ;;  %2597 = vmatpush.bf16.msrb.mxu2 %v3387_v36  ;;  %v3391_v40 = vor.u32 %v3544_v5, %v3388_v8  ;;  %v3371_v18 = vor.u32 %v3541_v52, %v3370_v63  ;;  %v3380_v33 = vld [vmem:[%s5651_s6 + $0x18] sm:$0xf0] }
 0x5d2   :  { %v1648_v29 = vpack.c.b8 %v1647_v0, %v1647_v0  ;;  %v1650_v38 = vpack.c.b8 %v1649_v1, %v1649_v1  ;;  %v1652_v37 = vpack.c.b8 %v1651_v17, %v1651_v17  ;;  %v3383_v59 = vor.u32 %v3542_v55, %v3380_v33  ;;  %v3540_v1 = vld [vmem:[%s5651_s6 + $0x4] sm:$0xf]  ;;  %v3372_v17 = vld [vmem:[%s5651_s6 + $0x8] sm:$0xf0] }
 0x5d3   :  { %v1654_v11 = vpack.c.b8 %v1653_v31, %v1653_v31  ;;  %v3375_v31 = vor.u32 %v3540_v1, %v3372_v17 }
 0x5d4   :  { %1659 = vst [vmem:[%s5654_s8 + $0x30] sm:$0xf] %v1648_v29  ;;  %2280 = vmatpush.bf16.msra.mxu0 %v3307_v56  ;;  %2625 = vmatpush.bf16.msrb.mxu3 %v3399_v6 }
 0x5d5   :  { %1660 = vst [vmem:[%s5654_s8 + $0x34] sm:$0xf] %v1650_v38  ;;  %2598 = vmatpush.bf16.msrb.mxu2 %v3379_v30 }
 0x5d6   :  { %1661 = vst [vmem:[%s5654_s8 + $0x38] sm:$0xf] %v1652_v37 }
 0x5d7   :  { %1662 = vst [vmem:[%s5654_s8 + $0x3c] sm:$0xf] %v1654_v11 }
 0x5d8   :  { %2626 = vmatpush.bf16.msrb.mxu3 %v3391_v40 }
 0x5d9   :  { %2599 = vmatpush.bf16.msrb.mxu2 %v3371_v18 }
 0x5da   :  { %3367 = vmatmul.msk.bf16.gmra.mxu1 %vm558_vm0, %v3539_v32 }
 0x5dc   :  { %2627 = vmatpush.bf16.msrb.mxu3 %v3383_v59 }
 0x5e0   :  { %2628 = vmatpush.bf16.msrb.mxu3 %v3375_v31 }
 0x606   :  { %v2098_v58 = vpop.f32.mrf.mxu1 }
 0x607   :  { %3277 = vst.msk [vmem:[%s5653_s7 + $0x18] sm:$0xff] %vm558_vm0, %v2098_v58 }
 0x60c   :  { %v2160_v22 = vpop.f32.mrf.mxu2 }
 0x60e   :  { %v2100_v23 = vpop.f32.mrf.mxu1 }
 0x60f   :  { %3278 = vst.msk [vmem:[%s5653_s7 + $0x20] sm:$0xff] %vm558_vm0, %v2100_v23 }
 0x614   :  { %v2162_v16 = vpop.f32.mrf.mxu2 }
 0x615   :  { %v2180_v19 = vpack.c.bf16 %v2162_v16, %v2160_v22 }
 0x616   :  { %v2103_v2 = vpop.f32.mrf.mxu1 }
 0x617   :  { %3332 = vmatmul.msk.bf16.vlgmr.msra.gmra.mxu3 %vm558_vm0, %v2180_v19  ;;  %3336 = vmatmul.msk.bf16.vlgmr.msra.gmra.mxu0 %vm558_vm0, %v2180_v19  ;;  %3279 = vst.msk [vmem:[%s5653_s7 + $0x28] sm:$0x1f] %vm967_vm3, %v2103_v2 }
 0x61c   :  { %v2165_v35 = vpop.f32.mrf.mxu2 }
 0x61e   :  { %v2105_v57 = vpop.f32.mrf.mxu1 }
 0x624   :  { %v2167_v53 = vpop.f32.mrf.mxu2 }
 0x625   :  { %v2181_v39 = vpack.c.bf16 %v2167_v53, %v2165_v35 }
 0x627   :  { %3333 = vmatmul.msk.bf16.gmra.mxu3 %vm558_vm0, %v2181_v39  ;;  %3337 = vmatmul.msk.bf16.gmra.mxu0 %vm558_vm0, %v2181_v39  ;;  %v2508_v20 = vpop.f32.mrf.mxu1 }
 0x62c   :  { %v2170_v26 = vpop.f32.mrf.mxu2 }
 0x62f   :  { %v2510_v0 = vpop.f32.mrf.mxu1 }
 0x630   :  { %v2528_v32 = vpack.c.bf16 %v2510_v0, %v2508_v20 }
 0x632   :  { %3400 = vmatmul.msk.bf16.vlgmr.msrb.gmra.mxu2 %vm558_vm0, %v2528_v32 }
 0x634   :  { %v2172_v29 = vpop.f32.mrf.mxu2 }
 0x635   :  { %v2182_v38 = vpack.c.bf16 %v2172_v29, %v2170_v26 }
 0x637   :  { %3334 = vmatmul.msk.bf16.gmra.mxu3 %vm558_vm0, %v2182_v38  ;;  %3338 = vmatmul.msk.bf16.gmra.mxu0 %vm558_vm0, %v2182_v38  ;;  %v2513_v37 = vpop.f32.mrf.mxu1 }
 0x63c   :  { %v2175_v11 = vpop.f32.mrf.mxu2 }
 0x63f   :  { %v2515_v14 = vpop.f32.mrf.mxu1 }
 0x640   :  { %v2529_v54 = vpack.c.bf16 %v2515_v14, %v2513_v37 }
 0x642   :  { %3401 = vmatmul.msk.bf16.gmra.mxu2 %vm558_vm0, %v2529_v54 }
 0x644   :  { %v2177_v61 = vpop.f32.mrf.mxu2 }
 0x645   :  { %v2183_v43 = vpack.c.bf16 %v2177_v61, %v2175_v11 }
 0x647   :  { %3335 = vmatmul.msk.bf16.gmra.mxu3 %vm558_vm0, %v2183_v43  ;;  %3339 = vmatmul.msk.bf16.gmra.mxu0 %vm558_vm0, %v2183_v43  ;;  %v2518_v13 = vpop.f32.mrf.mxu1 }
 0x64f   :  { %v2520_v49 = vpop.f32.mrf.mxu1 }
 0x650   :  { %v2530_v45 = vpack.c.bf16 %v2520_v49, %v2518_v13 }
 0x652   :  { %3402 = vmatmul.msk.bf16.gmra.mxu2 %vm558_vm0, %v2530_v45 }
 0x657   :  { %3404 = vmatmul.msk.bf16.vlgmr.msrb.gmra.mxu3 %vm558_vm0, %v2528_v32  ;;  %v2523_v62 = vpop.f32.mrf.mxu1 }
 0x65f   :  { %v2525_v47 = vpop.f32.mrf.mxu1 }
 0x660   :  { %v2531_v7 = vpack.c.bf16 %v2525_v47, %v2523_v62 }
 0x662   :  { %3403 = vmatmul.msk.bf16.gmra.mxu2 %vm558_vm0, %v2531_v7 }
 0x667   :  { %3405 = vmatmul.msk.bf16.gmra.mxu3 %vm558_vm0, %v2529_v54 }
 0x677   :  { %3406 = vmatmul.msk.bf16.gmra.mxu3 %vm558_vm0, %v2530_v45 }
 0x687   :  { %3407 = vmatmul.msk.bf16.gmra.mxu3 %vm558_vm0, %v2531_v7 }
 0x694   :  { %v5340_v60 = vpop.f32.mrf.mxu0 }
 0x69a   :  { %v5342_v15 = vpop.f32.mrf.mxu3 }
 0x69b   :  { %v2302_v24 = vmin.f32 %v5342_v15, %v5340_v60  ;;  %v2326_v34 = vmax.f32 %v5342_v15, %v5340_v60 }
 0x69c   :  { %v5348_v48 = vpop.f32.mrf.mxu0 }
 0x69d   :  { %2303 = vmin.xlane.f32.xlu1 %v2302_v24  ;;  %2327 = vmax.xlane.f32.xlu0 %v2326_v34 }
 0x6a2   :  { %v5350_v46 = vpop.f32.mrf.mxu3 }
 0x6a3   :  { %v2329_v12 = vmax.f32 %v5350_v46, %v5348_v48  ;;  %v2305_v3 = vmin.f32 %v5350_v46, %v5348_v48 }
 0x6a4   :  { %v5356_v25 = vpop.f32.mrf.mxu0 }
 0x6a5   :  { %2330 = vmax.xlane.f32.xlu1 %v2329_v12  ;;  %2306 = vmin.xlane.f32.xlu2 %v2305_v3 }
 0x6aa   :  { %v5358_v41 = vpop.f32.mrf.mxu3 }
 0x6ab   :  { %v2332_v56 = vmax.f32 %v5358_v41, %v5356_v25  ;;  %v2308_v58 = vmin.f32 %v5358_v41, %v5356_v25 }
 0x6ac   :  { %v5364_v22 = vpop.f32.mrf.mxu0 }
 0x6ad   :  { %2333 = vmax.xlane.f32.xlu2 %v2332_v56  ;;  %2309 = vmin.xlane.f32.xlu0 %v2308_v58  ;;  %v2350_v58 = vadd.f32 %v5342_v15, %v5342_v15 }
 0x6b2   :  { %v5366_v23 = vpop.f32.mrf.mxu3 }
 0x6b3   :  { %v2311_v16 = vmin.f32 %v5366_v23, %v5364_v22  ;;  %v2335_v19 = vmax.f32 %v5366_v23, %v5364_v22 }
 0x6b4   :  { %v5372_v2 = vpop.f32.mrf.mxu0 }
 0x6b5   :  { %2312 = vmin.xlane.f32.xlu1 %v2311_v16  ;;  %2336 = vmax.xlane.f32.xlu0 %v2335_v19  ;;  %v5396_v30 = vpop.f32.mrf.mxu2  ;;  %v2352_v16 = vadd.f32 %v5350_v46, %v5350_v46  ;;  %v2353_v19 = vadd.f32 %v5348_v48, %v5348_v48 }
 0x6ba   :  { %v5374_v50 = vpop.f32.mrf.mxu3 }
 0x6bb   :  { %v2338_v28 = vmax.f32 %v5374_v50, %v5372_v2  ;;  %v2314_v35 = vmin.f32 %v5374_v50, %v5372_v2 }
 0x6bc   :  { %v5380_v10 = vpop.f32.mrf.mxu0 }
 0x6bd   :  { %2339 = vmax.xlane.f32.xlu1 %v2338_v28  ;;  %2315 = vmin.xlane.f32.xlu2 %v2314_v35  ;;  %v5406_v5 = vpop.f32.mrf.mxu2  ;;  %v2351_v35 = vadd.f32 %v5340_v60, %v5340_v60 }
 0x6c2   :  { %v5382_v57 = vpop.f32.mrf.mxu3 }
 0x6c3   :  { %v2341_v51 = vmax.f32 %v5382_v57, %v5380_v10  ;;  %v2317_v4 = vmin.f32 %v5382_v57, %v5380_v10 }
 0x6c4   :  { %v5388_v36 = vpop.f32.mrf.mxu0 }
 0x6c5   :  { %2342 = vmax.xlane.f32.xlu2 %v2341_v51  ;;  %2318 = vmin.xlane.f32.xlu0 %v2317_v4  ;;  %v5414_v52 = vpop.f32.mrf.mxu2 }
 0x6ca   :  { %v5390_v21 = vpop.f32.mrf.mxu3 }
 0x6cb   :  { %v2320_v44 = vmin.f32 %v5390_v21, %v5388_v36  ;;  %v2344_v53 = vmax.f32 %v5390_v21, %v5388_v36 }
 0x6cc   :  { %v5400_v27 = vpop.f32.mrf.mxu0 }
 0x6cd   :  { %2321 = vmin.xlane.f32.xlu1 %v2320_v44  ;;  %2345 = vmax.xlane.f32.xlu0 %v2344_v53  ;;  %v5424_v26 = vpop.f32.mrf.mxu2 }
 0x6d2   :  { %v5398_v39 = vpop.f32.mrf.mxu3 }
 0x6d3   :  { %v2347_v42 = vmax.f32 %v5398_v39, %v5400_v27  ;;  %v2323_v20 = vmin.f32 %v5398_v39, %v5400_v27 }
 0x6d5   :  { %2348 = vmax.xlane.f32.xlu1 %v2347_v42  ;;  %2324 = vmin.xlane.f32.xlu2 %v2323_v20  ;;  %v5436_v31 = vpop.f32.mrf.mxu2  ;;  %v2354_v42 = vadd.f32 %v5358_v41, %v5358_v41  ;;  %v2356_v20 = vadd.f32 %v5366_v23, %v5366_v23 }
 0x6da   :  { %v5408_v6 = vpop.f32.mrf.mxu3 }
 0x6db   :  { %v2674_v8 = vmax.f32 %v5396_v30, %v5408_v6  ;;  %v2650_v63 = vmin.f32 %v5396_v30, %v5408_v6 }
 0x6dd   :  { %2675 = vmax.xlane.f32.xlu1 %v2674_v8  ;;  %2651 = vmin.xlane.f32.xlu2 %v2650_v63  ;;  %v5444_v11 = vpop.f32.mrf.mxu2  ;;  %v2357_v8 = vadd.f32 %v5364_v22, %v5364_v22 }
 0x6e2   :  { %v5416_v40 = vpop.f32.mrf.mxu3 }
 0x6e3   :  { %v2677_v18 = vmax.f32 %v5406_v5, %v5416_v40  ;;  %v2653_v55 = vmin.f32 %v5406_v5, %v5416_v40 }
 0x6e5   :  { %2678 = vmax.xlane.f32.xlu2 %v2677_v18  ;;  %2654 = vmin.xlane.f32.xlu0 %v2653_v55  ;;  %v5450_v61 = vpop.f32.mrf.mxu2  ;;  %v2355_v18 = vadd.f32 %v5356_v25, %v5356_v25 }
 0x6ea   :  { %v5422_v33 = vpop.f32.mrf.mxu3 }
 0x6eb   :  { %v2656_v59 = vmin.f32 %v5414_v52, %v5422_v33  ;;  %v2680_v0 = vmax.f32 %v5414_v52, %v5422_v33 }
 0x6ed   :  { %2657 = vmin.xlane.f32.xlu1 %v2656_v59  ;;  %2681 = vmax.xlane.f32.xlu0 %v2680_v0  ;;  %v5458_v62 = vpop.f32.mrf.mxu2 }
 0x6f2   :  { %v5430_v1 = vpop.f32.mrf.mxu3 }
 0x6f3   :  { %v2683_v17 = vmax.f32 %v5424_v26, %v5430_v1  ;;  %v2659_v32 = vmin.f32 %v5424_v26, %v5430_v1 }
 0x6f5   :  { %2684 = vmax.xlane.f32.xlu1 %v2683_v17  ;;  %2660 = vmin.xlane.f32.xlu2 %v2659_v32 }
 0x6fa   :  { %v5438_v29 = vpop.f32.mrf.mxu3 }
 0x6fb   :  { %v2686_v38 = vmax.f32 %v5436_v31, %v5438_v29  ;;  %v2662_v37 = vmin.f32 %v5436_v31, %v5438_v29 }
 0x6fd   :  { %2687 = vmax.xlane.f32.xlu2 %v2686_v38  ;;  %2663 = vmin.xlane.f32.xlu0 %v2662_v37 }
 0x702   :  { %v5446_v14 = vpop.f32.mrf.mxu3 }
 0x703   :  { %v2665_v54 = vmin.f32 %v5444_v11, %v5446_v14  ;;  %v2689_v15 = vmax.f32 %v5444_v11, %v5446_v14 }
 0x705   :  { %2666 = vmin.xlane.f32.xlu1 %v2665_v54 }
 0x70a   :  { %v5452_v43 = vpop.f32.mrf.mxu3 }
 0x70b   :  { %v2692_v13 = vmax.f32 %v5450_v61, %v5452_v43  ;;  %v2668_v49 = vmin.f32 %v5450_v61, %v5452_v43 }
 0x70d   :  { %2693 = vmax.xlane.f32.xlu1 %v2692_v13  ;;  %2669 = vmin.xlane.f32.xlu2 %v2668_v49 }
 0x710   :  { %v2304_v45 = vpop.xlane.xlu1 %2303  ;;  %v2328_v24 = vpop.xlane.xlu0 %2327 }
 0x711   :  { %v2366_v12 = vadd.f32 %v2328_v24, %v2304_v45 }
 0x712   :  { %v5460_v47 = vpop.f32.mrf.mxu3 }
 0x713   :  { %v2695_v7 = vmax.f32 %v5458_v62, %v5460_v47  ;;  %v2671_v34 = vmin.f32 %v5458_v62, %v5460_v47  ;;  %vm2374_vm0 = vcmp.gt.f32.partialorder %v2350_v58, %v2366_v12  ;;  %vm2375_vm10 = vcmp.gt.f32.partialorder %v2351_v35, %v2366_v12 }
 0x715   :  { %2696 = vmax.xlane.f32.xlu2 %v2695_v7  ;;  %2672 = vmin.xlane.f32.xlu0 %v2671_v34 }
 0x718   :  { %v2331_v3 = vpop.xlane.xlu1 %2330  ;;  %v2307_v56 = vpop.xlane.xlu2 %2306 }
 0x719   :  { %v2367_v28 = vadd.f32 %v2331_v3, %v2307_v56 }
 0x71b   :  { %vm2376_vm3 = vcmp.gt.f32.partialorder %v2352_v16, %v2367_v28  ;;  %vm2377_vm6 = vcmp.gt.f32.partialorder %v2353_v19, %v2367_v28 }
 0x71c   :  { %vm5474_vm11 = vmpackc.low %vm2376_vm3, %vm2374_vm0 }
 0x71d   :  { %vm5480_vm9 = vmpackc.low %vm2377_vm6, %vm2375_vm10  ;;  %2690 = vmax.xlane.f32.xlu0 %v2689_v15  ;;  %v2392_v55 = vsel %vm5474_vm11, 16711935, %v3625_v9 }
 0x71e   :  { %v2398_v22 = vsel %vm5480_vm9, 16711935, %v3625_v9 }
 0x720   :  { %v2310_v48 = vpop.xlane.xlu0 %2309  ;;  %v2334_v4 = vpop.xlane.xlu2 %2333 }
 0x721   :  { %v2368_v44 = vadd.f32 %v2334_v4, %v2310_v48  ;;  %v2358_v48 = vadd.f32 %v5374_v50, %v5374_v50  ;;  %v2360_v4 = vadd.f32 %v5382_v57, %v5382_v57 }
 0x723   :  { %vm2378_vm12 = vcmp.gt.f32.partialorder %v2354_v42, %v2368_v44  ;;  %vm2379_vm15 = vcmp.gt.f32.partialorder %v2355_v18, %v2368_v44  ;;  %v2361_v44 = vadd.f32 %v5380_v10, %v5380_v10  ;;  %v2364_v18 = vadd.f32 %v5398_v39, %v5398_v39 }
 0x728   :  { %v2313_v60 = vpop.xlane.xlu1 %2312  ;;  %v2337_v53 = vpop.xlane.xlu0 %2336 }
 0x729   :  { %v2369_v63 = vadd.f32 %v2337_v53, %v2313_v60  ;;  %v2359_v53 = vadd.f32 %v5372_v2, %v5372_v2 }
 0x72b   :  { %vm2380_vm14 = vcmp.gt.f32.partialorder %v2356_v20, %v2369_v63  ;;  %vm2381_vm13 = vcmp.gt.f32.partialorder %v2357_v8, %v2369_v63  ;;  %v2362_v63 = vadd.f32 %v5390_v21, %v5390_v21 }
 0x72c   :  { %vm2391_vm1 = vmpackc.low %vm2380_vm14, %vm2378_vm12 }
 0x72d   :  { %v2393_v41 = vsel %vm2391_vm1, 16711935, %v3625_v9  ;;  %vm2397_vm2 = vmpackc.low %vm2381_vm13, %vm2379_vm15 }
 0x72e   :  { %v2394_v23 = vpack.c.b8 %v2393_v41, %v2392_v55  ;;  %v2399_v59 = vsel %vm2397_vm2, 16711935, %v3625_v9  ;;  %v2365_v55 = vadd.f32 %v5400_v27, %v5400_v27 }
 0x72f   :  { %v2400_v25 = vpack.c.b8 %v2399_v59, %v2398_v22  ;;  %v2363_v22 = vadd.f32 %v5388_v36, %v5388_v36 }
 0x730   :  { %vm2395_vm4 = vnez %v2394_v23  ;;  %v2316_v0 = vpop.xlane.xlu2 %2315  ;;  %v2340_v34 = vpop.xlane.xlu1 %2339 }
 0x731   :  { %vm2401_vm5 = vnez %v2400_v25  ;;  %v2414_v17 = vsel %vm2395_vm4, 16843009, %v3625_v9  ;;  %v2370_v35 = vadd.f32 %v2340_v34, %v2316_v0 }
 0x732   :  { %v2415_v32 = vsel %vm2401_vm5, 16843009, %v3625_v9  ;;  %v2418_v38 = vunpack.c.0.s8 %v2414_v17  ;;  %v2420_v37 = vunpack.c.1.s8 %v2414_v17  ;;  %v2422_v54 = vunpack.c.2.s8 %v2414_v17 }
 0x733   :  { %v2419_v13 = vunpack.c.0.s8 %v2415_v32  ;;  %v2421_v49 = vunpack.c.1.s8 %v2415_v32  ;;  %v2423_v45 = vunpack.c.2.s8 %v2415_v32  ;;  %v2424_v7 = vunpack.c.3.s8 %v2414_v17 }
 0x734   :  { %v2425_v24 = vunpack.c.3.s8 %v2415_v32  ;;  %vm2382_vm7 = vcmp.gt.f32.partialorder %v2358_v48, %v2370_v35  ;;  %vm2383_vm3 = vcmp.gt.f32.partialorder %v2359_v53, %v2370_v35  ;;  %v2700_v48 = vadd.f32 %v5406_v5, %v5406_v5 }
 0x735   :  { %v2434_v12 = vpack.c.b16 %v2419_v13, %v2418_v38  ;;  %v2436_v3 = vpack.c.b16 %v2421_v49, %v2420_v37  ;;  %v2438_v56 = vpack.c.b16 %v2423_v45, %v2422_v54 }
 0x736   :  { %v2440_v58 = vpack.c.b16 %v2425_v24, %v2424_v7 }
 0x737   :  { %v2435_v16 = vpack.c.b8 %v2434_v12, %v2434_v12  ;;  %v2437_v19 = vpack.c.b8 %v2436_v3, %v2436_v3  ;;  %v2439_v28 = vpack.c.b8 %v2438_v56, %v2438_v56 }
 0x738   :  { %v2441_v51 = vpack.c.b8 %v2440_v58, %v2440_v58  ;;  %v2343_v15 = vpop.xlane.xlu2 %2342  ;;  %v2319_v46 = vpop.xlane.xlu0 %2318 }
 0x739   :  { %3340 = vst [vmem:[%s5654_s8 + $0x40] sm:$0xf] %v2435_v16  ;;  %v2371_v60 = vadd.f32 %v2343_v15, %v2319_v46  ;;  %v2698_v46 = vadd.f32 %v5396_v30, %v5396_v30 }
 0x73a   :  { %3341 = vst [vmem:[%s5654_s8 + $0x44] sm:$0xf] %v2437_v19 }
 0x73b   :  { %3342 = vst [vmem:[%s5654_s8 + $0x48] sm:$0xf] %v2439_v28  ;;  %vm2384_vm8 = vcmp.gt.f32.partialorder %v2360_v4, %v2371_v60  ;;  %vm2385_vm0 = vcmp.gt.f32.partialorder %v2361_v44, %v2371_v60  ;;  %v2701_v4 = vadd.f32 %v5416_v40, %v5416_v40  ;;  %v2699_v60 = vadd.f32 %v5408_v6, %v5408_v6 }
 0x73c   :  { %3343 = vst [vmem:[%s5654_s8 + $0x4c] sm:$0xf] %v2441_v51  ;;  %vm5522_vm6 = vmpackc.low %vm2384_vm8, %vm2382_vm7 }
 0x73d   :  { %vm5526_vm10 = vmpackc.low %vm2385_vm0, %vm2383_vm3  ;;  %v2404_v23 = vsel %vm5522_vm6, 16711935, %v3625_v9 }
 0x73e   :  { %v2410_v39 = vsel %vm5526_vm10, 16711935, %v3625_v9 }
 0x740   :  { %v2322_v10 = vpop.xlane.xlu1 %2321  ;;  %v2346_v57 = vpop.xlane.xlu0 %2345 }
 0x741   :  { %v2372_v42 = vadd.f32 %v2346_v57, %v2322_v10  ;;  %v2702_v10 = vadd.f32 %v5414_v52, %v5414_v52  ;;  %v2704_v57 = vadd.f32 %v5424_v26, %v5424_v26 }
 0x743   :  { %vm2386_vm11 = vcmp.gt.f32.partialorder %v2362_v63, %v2372_v42  ;;  %vm2387_vm14 = vcmp.gt.f32.partialorder %v2363_v22, %v2372_v42  ;;  %v2705_v42 = vadd.f32 %v5430_v1, %v5430_v1 }
 0x748   :  { %v2349_v20 = vpop.xlane.xlu1 %2348  ;;  %v2325_v8 = vpop.xlane.xlu2 %2324 }
 0x749   :  { %v2373_v41 = vadd.f32 %v2349_v20, %v2325_v8  ;;  %v2703_v8 = vadd.f32 %v5422_v33, %v5422_v33 }
 0x74b   :  { %vm2388_vm9 = vcmp.gt.f32.partialorder %v2364_v18, %v2373_v41  ;;  %vm2389_vm12 = vcmp.gt.f32.partialorder %v2365_v55, %v2373_v41 }
 0x74c   :  { %vm2403_vm13 = vmpackc.low %vm2388_vm9, %vm2386_vm11 }
 0x74d   :  { %v2405_v21 = vsel %vm2403_vm13, 16711935, %v3625_v9  ;;  %vm2409_vm15 = vmpackc.low %vm2389_vm12, %vm2387_vm14 }
 0x74e   :  { %v2406_v27 = vpack.c.b8 %v2405_v21, %v2404_v23  ;;  %v2411_v59 = vsel %vm2409_vm15, 16711935, %v3625_v9 }
 0x74f   :  { %v2412_v36 = vpack.c.b8 %v2411_v59, %v2410_v39 }
 0x750   :  { %vm2407_vm1 = vnez %v2406_v27  ;;  %v2652_v25 = vpop.xlane.xlu2 %2651  ;;  %v2676_v24 = vpop.xlane.xlu1 %2675 }
 0x751   :  { %vm2413_vm2 = vnez %v2412_v36  ;;  %v2416_v0 = vsel %vm2407_vm1, 16843009, %v3625_v9  ;;  %v2714_v28 = vadd.f32 %v2676_v24, %v2652_v25 }
 0x752   :  { %v2417_v17 = vsel %vm2413_vm2, 16843009, %v3625_v9  ;;  %v2426_v32 = vunpack.c.0.s8 %v2416_v0  ;;  %v2428_v38 = vunpack.c.1.s8 %v2416_v0  ;;  %v2430_v37 = vunpack.c.2.s8 %v2416_v0 }
 0x753   :  { %v2427_v54 = vunpack.c.0.s8 %v2417_v17  ;;  %v2429_v13 = vunpack.c.1.s8 %v2417_v17  ;;  %v2431_v49 = vunpack.c.2.s8 %v2417_v17  ;;  %v2432_v45 = vunpack.c.3.s8 %v2416_v0 }
 0x754   :  { %v2433_v7 = vunpack.c.3.s8 %v2417_v17  ;;  %vm2722_vm4 = vcmp.gt.f32.partialorder %v2698_v46, %v2714_v28  ;;  %vm2723_vm8 = vcmp.gt.f32.partialorder %v2699_v60, %v2714_v28  ;;  %v2713_v28 = vadd.f32 %v5460_v47, %v5460_v47 }
 0x755   :  { %v2442_v34 = vpack.c.b16 %v2427_v54, %v2426_v32  ;;  %v2444_v12 = vpack.c.b16 %v2429_v13, %v2428_v38  ;;  %v2446_v3 = vpack.c.b16 %v2431_v49, %v2430_v37  ;;  %v2708_v47 = vadd.f32 %v5444_v11, %v5444_v11 }
 0x756   :  { %v2448_v56 = vpack.c.b16 %v2433_v7, %v2432_v45 }
 0x757   :  { %v2443_v58 = vpack.c.b8 %v2442_v34, %v2442_v34  ;;  %v2445_v16 = vpack.c.b8 %v2444_v12, %v2444_v12  ;;  %v2447_v19 = vpack.c.b8 %v2446_v3, %v2446_v3 }
 0x758   :  { %v2449_v35 = vpack.c.b8 %v2448_v56, %v2448_v56  ;;  %v2679_v51 = vpop.xlane.xlu2 %2678  ;;  %v2655_v15 = vpop.xlane.xlu0 %2654 }
 0x759   :  { %3344 = vst [vmem:[%s5654_s8 + $0x50] sm:$0xf] %v2443_v58  ;;  %v2715_v44 = vadd.f32 %v2679_v51, %v2655_v15  ;;  %v2711_v51 = vadd.f32 %v5452_v43, %v5452_v43  ;;  %v2709_v43 = vadd.f32 %v5446_v14, %v5446_v14 }
 0x75a   :  { %3345 = vst [vmem:[%s5654_s8 + $0x54] sm:$0xf] %v2445_v16  ;;  %v2710_v16 = vadd.f32 %v5450_v61, %v5450_v61 }
 0x75b   :  { %3346 = vst [vmem:[%s5654_s8 + $0x58] sm:$0xf] %v2447_v19  ;;  %vm2724_vm5 = vcmp.gt.f32.partialorder %v2700_v48, %v2715_v44  ;;  %vm2725_vm7 = vcmp.gt.f32.partialorder %v2701_v4, %v2715_v44  ;;  %v2712_v19 = vadd.f32 %v5458_v62, %v5458_v62  ;;  %v2706_v62 = vadd.f32 %v5436_v31, %v5436_v31 }
 0x75c   :  { %3347 = vst [vmem:[%s5654_s8 + $0x5c] sm:$0xf] %v2449_v35  ;;  %vm5568_vm0 = vmpackc.low %vm2724_vm5, %vm2722_vm4  ;;  %v2707_v4 = vadd.f32 %v5438_v29, %v5438_v29 }
 0x75d   :  { %vm5572_vm3 = vmpackc.low %vm2725_vm7, %vm2723_vm8  ;;  %v2740_v63 = vsel %vm5568_vm0, 16711935, %v3625_v9 }
 0x75e   :  { %v2746_v26 = vsel %vm5572_vm3, 16711935, %v3625_v9 }
 0x760   :  { %v2658_v6 = vpop.xlane.xlu1 %2657  ;;  %v2682_v40 = vpop.xlane.xlu0 %2681 }
 0x761   :  { %v2716_v53 = vadd.f32 %v2682_v40, %v2658_v6 }
 0x763   :  { %vm2726_vm6 = vcmp.gt.f32.partialorder %v2702_v10, %v2716_v53  ;;  %vm2727_vm9 = vcmp.gt.f32.partialorder %v2703_v8, %v2716_v53 }
 0x768   :  { %v2685_v50 = vpop.xlane.xlu1 %2684  ;;  %v2661_v2 = vpop.xlane.xlu2 %2660 }
 0x769   :  { %v2717_v20 = vadd.f32 %v2685_v50, %v2661_v2 }
 0x76b   :  { %vm2728_vm10 = vcmp.gt.f32.partialorder %v2704_v57, %v2717_v20  ;;  %vm2729_vm11 = vcmp.gt.f32.partialorder %v2705_v42, %v2717_v20 }
 0x76c   :  { %vm2739_vm12 = vmpackc.low %vm2728_vm10, %vm2726_vm6 }
 0x76d   :  { %v2741_v52 = vsel %vm2739_vm12, 16711935, %v3625_v9  ;;  %vm2745_vm14 = vmpackc.low %vm2729_vm11, %vm2727_vm9 }
 0x76e   :  { %v2742_v1 = vpack.c.b8 %v2741_v52, %v2740_v63  ;;  %v2747_v18 = vsel %vm2745_vm14, 16711935, %v3625_v9 }
 0x76f   :  { %v2748_v33 = vpack.c.b8 %v2747_v18, %v2746_v26 }
 0x770   :  { %vm2743_vm13 = vnez %v2742_v1  ;;  %v2688_v45 = vpop.xlane.xlu2 %2687  ;;  %v2664_v34 = vpop.xlane.xlu0 %2663 }
 0x771   :  { %vm2749_vm15 = vnez %v2748_v33  ;;  %v2762_v55 = vsel %vm2743_vm13, 16843009, %v3625_v9  ;;  %v2718_v61 = vadd.f32 %v2688_v45, %v2664_v34 }
 0x772   :  { %v2763_v41 = vsel %vm2749_vm15, 16843009, %v3625_v9  ;;  %v2766_v22 = vunpack.c.0.s8 %v2762_v55  ;;  %v2768_v23 = vunpack.c.1.s8 %v2762_v55  ;;  %v2770_v21 = vunpack.c.2.s8 %v2762_v55 }
 0x773   :  { %v2767_v39 = vunpack.c.0.s8 %v2763_v41  ;;  %v2769_v27 = vunpack.c.1.s8 %v2763_v41  ;;  %v2771_v59 = vunpack.c.2.s8 %v2763_v41  ;;  %v2772_v36 = vunpack.c.3.s8 %v2762_v55 }
 0x774   :  { %v2773_v25 = vunpack.c.3.s8 %v2763_v41  ;;  %vm2730_vm0 = vcmp.gt.f32.partialorder %v2706_v62, %v2718_v61  ;;  %vm2731_vm10 = vcmp.gt.f32.partialorder %v2707_v4, %v2718_v61 }
 0x775   :  { %v2782_v0 = vpack.c.b16 %v2767_v39, %v2766_v22  ;;  %v2784_v17 = vpack.c.b16 %v2769_v27, %v2768_v23  ;;  %v2786_v32 = vpack.c.b16 %v2771_v59, %v2770_v21 }
 0x776   :  { %v2788_v38 = vpack.c.b16 %v2773_v25, %v2772_v36 }
 0x777   :  { %v2783_v37 = vpack.c.b8 %v2782_v0, %v2782_v0  ;;  %v2785_v54 = vpack.c.b8 %v2784_v17, %v2784_v17  ;;  %v2787_v13 = vpack.c.b8 %v2786_v32, %v2786_v32 }
 0x778   :  { %v2789_v49 = vpack.c.b8 %v2788_v38, %v2788_v38  ;;  %v2667_v7 = vpop.xlane.xlu1 %2666 }
 0x779   :  { %3408 = vst [vmem:[%s5654_s8 + $0x60] sm:$0xf] %v2783_v37 }
 0x77a   :  { %3409 = vst [vmem:[%s5654_s8 + $0x64] sm:$0xf] %v2785_v54 }
 0x77b   :  { %3410 = vst [vmem:[%s5654_s8 + $0x68] sm:$0xf] %v2787_v13 }
 0x77c   :  { %3411 = vst [vmem:[%s5654_s8 + $0x6c] sm:$0xf] %v2789_v49 }
 0x780   :  { %v2670_v24 = vpop.xlane.xlu2 %2669  ;;  %v2694_v12 = vpop.xlane.xlu1 %2693 }
 0x781   :  { %v2720_v3 = vadd.f32 %v2694_v12, %v2670_v24 }
 0x783   :  { %vm2734_vm1 = vcmp.gt.f32.partialorder %v2710_v16, %v2720_v3  ;;  %vm2735_vm5 = vcmp.gt.f32.partialorder %v2711_v51, %v2720_v3 }
 0x788   :  { %v2697_v56 = vpop.xlane.xlu2 %2696  ;;  %v2673_v58 = vpop.xlane.xlu0 %2672 }
 0x789   :  { %v2721_v35 = vadd.f32 %v2697_v56, %v2673_v58 }
 0x78b   :  { %vm2736_vm2 = vcmp.gt.f32.partialorder %v2712_v19, %v2721_v35  ;;  %vm2737_vm4 = vcmp.gt.f32.partialorder %v2713_v28, %v2721_v35 }
 0x78c   :  { %vm2751_vm7 = vmpackc.low %vm2736_vm2, %vm2734_vm1 }
 0x78d   :  { %vm5614_vm8 = vmpackc.low %vm2737_vm4, %vm2735_vm5  ;;  %v2753_v44 = vsel %vm2751_vm7, 16711935, %v3625_v9 }
 0x78e   :  { %v2759_v31 = vsel %vm5614_vm8, 16711935, %v3625_v9 }
 0x790   :  { %v2691_v46 = vpop.xlane.xlu0 %2690 }
 0x791   :  { %v2719_v48 = vadd.f32 %v2691_v46, %v2667_v7 }
 0x793   :  { %vm2732_vm3 = vcmp.gt.f32.partialorder %v2708_v47, %v2719_v48  ;;  %vm2733_vm6 = vcmp.gt.f32.partialorder %v2709_v43, %v2719_v48 }
 0x794   :  { %vm2750_vm11 = vmpackc.low %vm2732_vm3, %vm2730_vm0 }
 0x795   :  { %v2752_v60 = vsel %vm2750_vm11, 16711935, %v3625_v9  ;;  %vm2756_vm9 = vmpackc.low %vm2733_vm6, %vm2731_vm10 }
 0x796   :  { %v2754_v11 = vpack.c.b8 %v2753_v44, %v2752_v60  ;;  %v2758_v14 = vsel %vm2756_vm9, 16711935, %v3625_v9 }
 0x797   :  { %v2760_v30 = vpack.c.b8 %v2759_v31, %v2758_v14 }
 0x798   :  { %vm2755_vm12 = vnez %v2754_v11 }
 0x799   :  { %vm2761_vm14 = vnez %v2760_v30  ;;  %v2764_v29 = vsel %vm2755_vm12, 16843009, %v3625_v9 }
 0x79a   :  { %v2765_v5 = vsel %vm2761_vm14, 16843009, %v3625_v9  ;;  %v2774_v6 = vunpack.c.0.s8 %v2764_v29  ;;  %v2776_v40 = vunpack.c.1.s8 %v2764_v29  ;;  %v2778_v53 = vunpack.c.2.s8 %v2764_v29 }
 0x79b   :  { %v2775_v50 = vunpack.c.0.s8 %v2765_v5  ;;  %v2777_v2 = vunpack.c.1.s8 %v2765_v5  ;;  %v2779_v10 = vunpack.c.2.s8 %v2765_v5  ;;  %v2780_v57 = vunpack.c.3.s8 %v2764_v29 }
 0x79c   :  { %v2781_v42 = vunpack.c.3.s8 %v2765_v5 }
 0x79d   :  { %v2790_v20 = vpack.c.b16 %v2775_v50, %v2774_v6  ;;  %v2792_v8 = vpack.c.b16 %v2777_v2, %v2776_v40  ;;  %v2794_v63 = vpack.c.b16 %v2779_v10, %v2778_v53 }
 0x79e   :  { %v2796_v52 = vpack.c.b16 %v2781_v42, %v2780_v57 }
 0x79f   :  { %v2791_v26 = vpack.c.b8 %v2790_v20, %v2790_v20  ;;  %v2793_v1 = vpack.c.b8 %v2792_v8, %v2792_v8  ;;  %v2795_v18 = vpack.c.b8 %v2794_v63, %v2794_v63 }
 0x7a0   :  { %v2797_v33 = vpack.c.b8 %v2796_v52, %v2796_v52 }
 0x7a1   :  { %3412 = vst [vmem:[%s5654_s8 + $0x70] sm:$0xf] %v2791_v26 }
 0x7a2   :  { %3413 = vst [vmem:[%s5654_s8 + $0x74] sm:$0xf] %v2793_v1 }
 0x7a3   :  { %3414 = vst [vmem:[%s5654_s8 + $0x78] sm:$0xf] %v2795_v18 }
 0x7a4   :  { %3415 = vst [vmem:[%s5654_s8 + $0x7c] sm:$0xf] %v2797_v33 }

</bundles_post_ra>
